<compile_context>
chip_gen: v7x
topology: tpu7x:2x2x1
jax: 0.10.0
libtpu: 0.0.40
codegen_flags: <defaults>
</compile_context>

<pallas_src>
import functools

import jax
import jax.numpy as jnp
from jax import lax
from jax.experimental import pallas as pl
from jax.experimental.pallas import tpu as pltpu


def seq2seq_kernel(B, H, S, T, V, out_size, out_pad,
                   tf_ref,                              # SMEM (T,) int32
                   src_ref, trg_ref, emb_ref,           # VMEM bf16
                   w_ih_e_ref, w_hh_e_ref, b_e_ref,     # encoder LSTM
                   w_ih_d_ref, b_d_ref,                 # decoder LSTMCell
                   w_hhfc_ref, b_fc_ref,                # fused [W_hh_d|W_fc], out bias
                   out_ref,                             # VMEM (T*B, out_pad) f32
                   enc_proj_ref, trg_proj_ref, h_dec_ref):
    f32 = jnp.float32
    bf16 = jnp.bfloat16

    # ----- one-shot batched input projections (off the serial path) --------
    enc_proj_ref[...] = (
        jnp.dot(src_ref[...], w_ih_e_ref[...], preferred_element_type=f32)
        + b_e_ref[...])
    trg_proj_ref[...] = (
        jnp.dot(trg_ref[...], w_ih_d_ref[...], preferred_element_type=f32)
        + b_d_ref[...])
    # feedback table: embedding rows pre-projected through the decoder W_ih.
    # Bias is NOT folded in; it is added explicitly on feedback steps.
    e_proj = jnp.dot(emb_ref[...], w_ih_d_ref[...],
                     preferred_element_type=f32).astype(bf16)        # (V, 4H)

    # ----- loop invariants hoisted (JAX does not CSE broadcast_in_dim) -----
    w_hh_e = w_hh_e_ref[...]                   # (H, 4H) bf16
    w_hhfc = w_hhfc_ref[...]                   # (H, 4H + out_pad) bf16 fused
    w_hh_d = w_hhfc_ref[:, :4 * H]             # (H, 4H) bf16
    w_fc = w_hhfc_ref[:, 4 * H:]               # (H, out_pad) bf16
    b_d_b = jnp.broadcast_to(b_d_ref[...], (B, 4 * H))
    col_iota = lax.broadcasted_iota(jnp.int32, (B, out_pad), 1)
    voc_iota = lax.broadcasted_iota(jnp.int32, (B, V), 1)
    # argmax-safe logits bias: real bias on valid lanes, -1e9 on padded lanes
    b_fc_argmax = (jnp.broadcast_to(b_fc_ref[...], (B, out_pad))
                   + jnp.where(col_iota < out_size, 0.0, -1e9).astype(f32))

    def cell(xg, hg, c):
        # gate order permuted to [i, f, o, g] in the wrapper: one sigmoid over
        # a contiguous (B, 3H) slab, one tanh over (B, H).
        gates = xg + hg
        ifo = jax.nn.sigmoid(gates[:, :3 * H])
        g = jnp.tanh(gates[:, 3 * H:])
        c_new = ifo[:, H:2 * H] * c + ifo[:, :H] * g
        h_new = ifo[:, 2 * H:] * jnp.tanh(c_new)
        return h_new, c_new

    # ----------------------------- encoder ---------------------------------
    def enc_body(s, carry):
        h, c = carry
        xg = enc_proj_ref[pl.ds(pl.multiple_of(s * B, B), B), :]
        hg = jnp.dot(h.astype(bf16), w_hh_e, preferred_element_type=f32)
        return cell(xg, hg, c)

    h0 = jnp.zeros((B, H), f32)
    c0 = jnp.zeros((B, H), f32)
    h_enc, c_enc = lax.fori_loop(0, S, enc_body, (h0, c0), unroll=True)

    # ----------------------------- decoder ---------------------------------
    h_dec_ref[pl.ds(0, B), :] = jnp.zeros((B, H), f32)   # t = 0 row (unused)
    hg0 = jnp.dot(h_enc.astype(bf16), w_hh_d, preferred_element_type=f32)
    xg0 = trg_proj_ref[pl.ds(0, B), :]                    # input = trg[:, 0]

    def dec_body(t, carry):
        hg, c, xg = carry
        h, c_new = cell(xg, hg, c)
        h_dec_ref[pl.ds(pl.multiple_of(t * B, B), B), :] = h   # for deferred head

        # teacher-forced input projection for the NEXT step (cheap vreg load)
        xg_tf = trg_proj_ref[pl.ds(pl.multiple_of(t * B, B), B), :]
        h_bf = h.astype(bf16)

        def feedback(_):
            # fused MXU pass: next-step gate contribution + logits in one shot
            hz = jnp.dot(h_bf, w_hhfc, preferred_element_type=f32)  # (B,4H+P)
            hg_n = hz[:, :4 * H]
            pred = hz[:, 4 * H:] + b_fc_argmax
            # first-occurrence argmax (PyTorch semantics); pads can never win
            max_val = jnp.max(pred, axis=1, keepdims=True)
            masked = jnp.where(pred == max_val, col_iota, out_pad)
            top1 = jnp.min(masked, axis=1, keepdims=True)            # (B, 1)
            onehot = (voc_iota == top1).astype(bf16)                 # (B, V)
            xg_n = (jnp.dot(onehot, e_proj, preferred_element_type=f32)
                    + b_d_b)
            return hg_n, xg_n

        def teacher(_):
            hg_n = jnp.dot(h_bf, w_hh_d, preferred_element_type=f32)
            return hg_n, xg_tf

        hg_new, xg_new = lax.cond(tf_ref[t] == 0, feedback, teacher, None)
        return hg_new, c_new, xg_new

    lax.fori_loop(1, T, dec_body, (hg0, c_enc, xg0), unroll=True)

    # ---- deferred lane-dense fc head: ONE batched matmul for all steps ----
    out_ref[...] = (jnp.dot(h_dec_ref[...].astype(bf16), w_fc,
                            preferred_element_type=f32) + b_fc_ref[...])
    out_ref[pl.ds(0, B), :] = jnp.zeros((B, out_pad), f32)   # t = 0 row zeros


def seq2seq_forward(src_ids, trg_ids, params, tf_flags):
    """src_ids, trg_ids: int32 (B, S) / (B, T) token ids."""
    emb_f32 = params["embedding"]                 # (vocab, H)
    V, H = emb_f32.shape
    B, S = src_ids.shape
    _, T = trg_ids.shape
    out_size = params["w_fc"].shape[1]
    assert out_size <= V, "feedback tokens must index into the embedding table"
    out_pad = max(128, pl.cdiv(out_size, 128) * 128)   # lane-dense output

    f32 = jnp.float32
    bf16 = lambda x: x.astype(jnp.bfloat16)

    # permute PyTorch gate order [i, f, g, o] -> [i, f, o, g] (contiguous ifo)
    def perm(w):
        return jnp.concatenate(
            [w[..., :2 * H], w[..., 3 * H:4 * H], w[..., 2 * H:3 * H]], axis=-1)

    w_ih_e, w_hh_e, b_e = perm(params["w_ih_e"]), perm(params["w_hh_e"]), perm(params["b_e"])
    w_ih_d, w_hh_d, b_d = perm(params["w_ih_d"]), perm(params["w_hh_d"]), perm(params["b_d"])

    # pad the fc head to 128 lanes; output bias pads are 0 so the raw padded
    # output buffer holds clean zeros (the -1e9 pad mask is applied only to
    # the in-kernel argmax logits).
    w_fc_pad = jnp.zeros((H, out_pad), f32).at[:, :out_size].set(params["w_fc"])
    b_fc_out = jnp.zeros((1, out_pad), f32).at[:, :out_size].set(params["b_fc"])
    # fused weight: one MXU pass -> [next-step gate contribution | logits]
    w_hhfc = jnp.concatenate([w_hh_d, w_fc_pad], axis=1)        # (H, 4H+out_pad)

    emb = bf16(emb_f32)
    # embedding lookups (glue), time-major, flattened so row index = t*B + b
    # and each recurrence step reads one contiguous (B, H) sublane block.
    src_emb = jnp.transpose(jnp.take(emb, src_ids, axis=0),
                            (1, 0, 2)).reshape(S * B, H)
    trg_emb = jnp.transpose(jnp.take(emb, trg_ids, axis=0),
                            (1, 0, 2)).reshape(T * B, H)

    kernel = functools.partial(seq2seq_kernel, B, H, S, T, V, out_size, out_pad)
    vmem = pl.BlockSpec(memory_space=pltpu.MemorySpace.VMEM)
    smem = pl.BlockSpec(memory_space=pltpu.MemorySpace.SMEM)

    # VMEM limit from the actual resident footprint (+ generous headroom),
    # instead of hard-coding the 32 MiB default.
    footprint = (
        4 * (S * B * 4 * H + T * B * 4 * H + T * B * H       # scratch
             + T * B * out_pad                               # output
             + 2 * 4 * H + out_pad)                          # f32 biases
        + 2 * (S * B * H + T * B * H + V * H                 # bf16 activations
               + 2 * H * 4 * H + H * 4 * H                   # bf16 weights
               + H * (4 * H + out_pad) + V * 4 * H))         # fused w, e_proj
    vmem_limit = int(min(max(2 * footprint + (4 << 20), 8 << 20), 100 << 20))

    out_flat = pl.pallas_call(
        kernel,
        out_shape=jax.ShapeDtypeStruct((T * B, out_pad), jnp.float32),
        in_specs=[smem] + [vmem] * 10,
        out_specs=vmem,
        scratch_shapes=[pltpu.VMEM((S * B, 4 * H), jnp.float32),   # enc_proj
                        pltpu.VMEM((T * B, 4 * H), jnp.float32),   # trg_proj
                        pltpu.VMEM((T * B, H), jnp.float32)],      # decoder h_t
        compiler_params=pltpu.CompilerParams(vmem_limit_bytes=vmem_limit),
    )(tf_flags, src_emb, trg_emb, emb,
      bf16(w_ih_e), bf16(w_hh_e), b_e,
      bf16(w_ih_d), b_d,
      bf16(w_hhfc), b_fc_out)

    # PyTorch `outputs` is batch-first: (B, trg_len, output_size)
    out_tmaj = out_flat.reshape(T, B, out_pad)[:, :, :out_size]
    return jnp.transpose(out_tmaj, (1, 0, 2))


def init_params(key, vocab, hidden, output_size):
    k = 1.0 / jnp.sqrt(jnp.float32(hidden))
    keys = jax.random.split(key, 12)
    u = lambda kk, shape: jax.random.uniform(kk, shape, jnp.float32, -k, k)
    return {
        "embedding": jax.random.normal(keys[0], (vocab, hidden), jnp.float32),
        # encoder nn.LSTM(hidden, hidden): weights stored transposed (in, 4H)
        "w_ih_e": u(keys[1], (hidden, 4 * hidden)),
        "w_hh_e": u(keys[2], (hidden, 4 * hidden)),
        "b_e": u(keys[3], (1, 4 * hidden)) + u(keys[4], (1, 4 * hidden)),
        # decoder nn.LSTMCell(hidden, hidden)
        "w_ih_d": u(keys[5], (hidden, 4 * hidden)),
        "w_hh_d": u(keys[6], (hidden, 4 * hidden)),
        "b_d": u(keys[7], (1, 4 * hidden)) + u(keys[8], (1, 4 * hidden)),
        # fc: Linear(hidden, output_size), stored as (hidden, out)
        "w_fc": u(keys[9], (hidden, output_size)),
        "b_fc": u(keys[10], (1, output_size)),
    }


if __name__ == "__main__":
    # small shapes: batch=8, hidden=output=32, src_len=8, trg_len=8, vocab=64
    B, H, S, T, V = 8, 32, 8, 8, 64
    output_size = H
    pad_idx = 0  # unused in forward
    teacher_forcing_ratio = 0.5

    root = jax.random.PRNGKey(0)
    k_par, k_src, k_trg, k_tf = jax.random.split(root, 4)

    params = init_params(k_par, V, H, output_size)
    src = jax.random.randint(k_src, (B, S), 0, V, dtype=jnp.int32)
    trg = jax.random.randint(k_trg, (B, T), 0, V, dtype=jnp.int32)
    # deterministic replacement for host-side random.random() < ratio, per step
    tf_flags = jax.random.bernoulli(
        k_tf, teacher_forcing_ratio, (T,)).astype(jnp.int32)

    fwd = jax.jit(functools.partial(seq2seq_forward, params=params,
                                    tf_flags=tf_flags))
    outputs = fwd(src, trg)                   # (B, T, output_size)
    jax.block_until_ready(outputs)
    assert outputs.shape == (B, T, output_size)
    assert bool(jnp.all(jnp.isfinite(outputs)))
    print("KERNEL_OK")
</pallas_src>

<mosaic_0001>
module attributes {stable_mosaic.version = 11 : i64} {
  func.func @seq2seq_kernel(%arg0: memref<8xi32, #tpu.memory_space<smem>>, %arg1: memref<64x32xbf16, #tpu.memory_space<vmem>>, %arg2: memref<64x32xbf16, #tpu.memory_space<vmem>>, %arg3: memref<64x32xbf16, #tpu.memory_space<vmem>>, %arg4: memref<32x128xbf16, #tpu.memory_space<vmem>>, %arg5: memref<32x128xbf16, #tpu.memory_space<vmem>>, %arg6: memref<1x128xf32, #tpu.memory_space<vmem>>, %arg7: memref<32x128xbf16, #tpu.memory_space<vmem>>, %arg8: memref<1x128xf32, #tpu.memory_space<vmem>>, %arg9: memref<32x256xbf16, #tpu.memory_space<vmem>>, %arg10: memref<1x128xf32, #tpu.memory_space<vmem>>, %arg11: memref<64x128xf32, #tpu.memory_space<vmem>>, %arg12: memref<64x128xf32, #tpu.memory_space<vmem>>, %arg13: memref<64x128xf32, #tpu.memory_space<vmem>>, %arg14: memref<64x32xf32, #tpu.memory_space<vmem>>) attributes {dimension_semantics = [], scalar_prefetch = 0 : i64, scratch_operands = 3 : i64, tpu.core_type = #tpu.core_type<tc>} {
    %c0 = arith.constant 0 : index
    %c0_0 = arith.constant 0 : index
    %0 = vector.load %arg1[%c0, %c0_0] : memref<64x32xbf16, #tpu.memory_space<vmem>>, vector<64x32xbf16>
    %c0_1 = arith.constant 0 : index
    %c0_2 = arith.constant 0 : index
    %1 = vector.load %arg4[%c0_1, %c0_2] : memref<32x128xbf16, #tpu.memory_space<vmem>>, vector<32x128xbf16>
    %cst = arith.constant dense<0.000000e+00> : vector<64x128xf32>
    %2 = tpu.matmul %0, %1, %cst {dimension_numbers = #tpu.dot_dimension_numbers<[1], [0], [0], [1], [0, 0, 1, 1], [], []>} : vector<64x32xbf16>, vector<32x128xbf16>, vector<64x128xf32> -> vector<64x128xf32>
    %c0_3 = arith.constant 0 : index
    %c0_4 = arith.constant 0 : index
    %3 = vector.load %arg6[%c0_3, %c0_4] : memref<1x128xf32, #tpu.memory_space<vmem>>, vector<1x128xf32>
    %4 = vector.broadcast %3 : vector<1x128xf32> to vector<64x128xf32>
    %5 = arith.addf %2, %4 : vector<64x128xf32>
    %c0_5 = arith.constant 0 : index
    %c0_6 = arith.constant 0 : index
    %6 = vector.load %arg12[%c0_5, %c0_6] : memref<64x128xf32, #tpu.memory_space<vmem>>, vector<64x128xf32>
    tpu.vector_store %arg12[%c0_5, %c0_6], %5 {strides = array<i32>} : memref<64x128xf32, #tpu.memory_space<vmem>>, vector<64x128xf32>,
    %c0_7 = arith.constant 0 : index
    %c0_8 = arith.constant 0 : index
    %7 = vector.load %arg2[%c0_7, %c0_8] : memref<64x32xbf16, #tpu.memory_space<vmem>>, vector<64x32xbf16>
    %c0_9 = arith.constant 0 : index
    %c0_10 = arith.constant 0 : index
    %8 = vector.load %arg7[%c0_9, %c0_10] : memref<32x128xbf16, #tpu.memory_space<vmem>>, vector<32x128xbf16>
    %cst_11 = arith.constant dense<0.000000e+00> : vector<64x128xf32>
    %9 = tpu.matmul %7, %8, %cst_11 {dimension_numbers = #tpu.dot_dimension_numbers<[1], [0], [0], [1], [0, 0, 1, 1], [], []>} : vector<64x32xbf16>, vector<32x128xbf16>, vector<64x128xf32> -> vector<64x128xf32>
    %c0_12 = arith.constant 0 : index
    %c0_13 = arith.constant 0 : index
    %10 = vector.load %arg8[%c0_12, %c0_13] : memref<1x128xf32, #tpu.memory_space<vmem>>, vector<1x128xf32>
    %11 = vector.broadcast %10 : vector<1x128xf32> to vector<64x128xf32>
    %12 = arith.addf %9, %11 : vector<64x128xf32>
    %c0_14 = arith.constant 0 : index
    %c0_15 = arith.constant 0 : index
    %13 = vector.load %arg13[%c0_14, %c0_15] : memref<64x128xf32, #tpu.memory_space<vmem>>, vector<64x128xf32>
    tpu.vector_store %arg13[%c0_14, %c0_15], %12 {strides = array<i32>} : memref<64x128xf32, #tpu.memory_space<vmem>>, vector<64x128xf32>,
    %c0_16 = arith.constant 0 : index
    %c0_17 = arith.constant 0 : index
    %14 = vector.load %arg3[%c0_16, %c0_17] : memref<64x32xbf16, #tpu.memory_space<vmem>>, vector<64x32xbf16>
    %c0_18 = arith.constant 0 : index
    %c0_19 = arith.constant 0 : index
    %15 = vector.load %arg7[%c0_18, %c0_19] : memref<32x128xbf16, #tpu.memory_space<vmem>>, vector<32x128xbf16>
    %cst_20 = arith.constant dense<0.000000e+00> : vector<64x128xf32>
    %16 = tpu.matmul %14, %15, %cst_20 {dimension_numbers = #tpu.dot_dimension_numbers<[1], [0], [0], [1], [0, 0, 1, 1], [], []>} : vector<64x32xbf16>, vector<32x128xbf16>, vector<64x128xf32> -> vector<64x128xf32>
    %17 = arith.truncf %16 : vector<64x128xf32> to vector<64x128xbf16>
    %c0_21 = arith.constant 0 : index
    %c0_22 = arith.constant 0 : index
    %18 = vector.load %arg5[%c0_21, %c0_22] : memref<32x128xbf16, #tpu.memory_space<vmem>>, vector<32x128xbf16>
    %c0_23 = arith.constant 0 : index
    %c0_24 = arith.constant 0 : index
    %19 = vector.load %arg9[%c0_23, %c0_24] : memref<32x256xbf16, #tpu.memory_space<vmem>>, vector<32x256xbf16>
    %c0_25 = arith.constant 0 : index
    %c0_26 = arith.constant 0 : index
    %20 = vector.load %arg9[%c0_25, %c0_26] : memref<32x256xbf16, #tpu.memory_space<vmem>>, vector<32x128xbf16>
    %c0_27 = arith.constant 0 : index
    %c128 = arith.constant 128 : index
    %21 = vector.load %arg9[%c0_27, %c128] : memref<32x256xbf16, #tpu.memory_space<vmem>>, vector<32x128xbf16>
    %c0_28 = arith.constant 0 : index
    %c0_29 = arith.constant 0 : index
    %22 = vector.load %arg8[%c0_28, %c0_29] : memref<1x128xf32, #tpu.memory_space<vmem>>, vector<1x128xf32>
    %23 = vector.shape_cast %22 : vector<1x128xf32> to vector<1x128xf32>
    %24 = vector.broadcast %23 : vector<1x128xf32> to vector<8x128xf32>
    %25 = tpu.iota {dimensions = array<i32: 1>} : vector<8x128xi32>
    %26 = tpu.iota {dimensions = array<i32: 1>} : vector<8x64xi32>
    %c0_30 = arith.constant 0 : index
    %c0_31 = arith.constant 0 : index
    %27 = vector.load %arg10[%c0_30, %c0_31] : memref<1x128xf32, #tpu.memory_space<vmem>>, vector<1x128xf32>
    %28 = vector.shape_cast %27 : vector<1x128xf32> to vector<1x128xf32>
    %29 = vector.broadcast %28 : vector<1x128xf32> to vector<8x128xf32>
    %c32_i32 = arith.constant 32 : i32
    %30 = vector.broadcast %c32_i32 : i32 to vector<8x128xi32>
    %31 = arith.cmpi slt, %25, %30 : vector<8x128xi32>
    %cst_32 = arith.constant 0.000000e+00 : f32
    %cst_33 = arith.constant -1.000000e+09 : f32
    %32 = vector.broadcast %cst_32 : f32 to vector<8x128xf32>
    %33 = vector.broadcast %cst_33 : f32 to vector<8x128xf32>
    %34 = arith.select %31, %32, %33 : vector<8x128xi1>, vector<8x128xf32>
    %35 = arith.addf %29, %34 : vector<8x128xf32>
    %cst_34 = arith.constant 0.000000e+00 : f32
    %36 = vector.broadcast %cst_34 : f32 to vector<8x32xf32>
    %cst_35 = arith.constant 0.000000e+00 : f32
    %37 = vector.broadcast %cst_35 : f32 to vector<8x32xf32>
    %c0_i32 = arith.constant 0 : i32
    %c8_i32 = arith.constant 8 : i32
    %38 = arith.muli %c0_i32, %c8_i32 : i32
    %39 = tpu.assume_multiple %38, 8 : i32
    %40 = arith.index_cast %39 : i32 to index
    %c0_36 = arith.constant 0 : index
    %41 = vector.load %arg12[%40, %c0_36] : memref<64x128xf32, #tpu.memory_space<vmem>>, vector<8x128xf32>
    %42 = arith.truncf %36 : vector<8x32xf32> to vector<8x32xbf16>
    %cst_37 = arith.constant dense<0.000000e+00> : vector<8x128xf32>
    %43 = tpu.matmul %42, %18, %cst_37 {dimension_numbers = #tpu.dot_dimension_numbers<[1], [0], [0], [1], [0, 0, 1, 1], [], []>} : vector<8x32xbf16>, vector<32x128xbf16>, vector<8x128xf32> -> vector<8x128xf32>
    %44 = arith.addf %41, %43 : vector<8x128xf32>
    %45 = vector.extract_strided_slice %44 {offsets = [0, 0], sizes = [8, 96], strides = [1, 1]} : vector<8x128xf32> to vector<8x96xf32>
    %46 = arith.negf %45 : vector<8x96xf32>
    %47 = math.exp %46 : vector<8x96xf32>
    %cst_38 = arith.constant 1.000000e+00 : f32
    %48 = vector.broadcast %cst_38 : f32 to vector<8x96xf32>
    %49 = arith.addf %48, %47 : vector<8x96xf32>
    %50 = arith.divf %48, %49 : vector<8x96xf32>
    %51 = vector.extract_strided_slice %44 {offsets = [0, 96], sizes = [8, 32], strides = [1, 1]} : vector<8x128xf32> to vector<8x32xf32>
    %52 = math.tanh %51 : vector<8x32xf32>
    %53 = vector.extract_strided_slice %50 {offsets = [0, 32], sizes = [8, 32], strides = [1, 1]} : vector<8x96xf32> to vector<8x32xf32>
    %54 = arith.mulf %53, %37 : vector<8x32xf32>
    %55 = vector.extract_strided_slice %50 {offsets = [0, 0], sizes = [8, 32], strides = [1, 1]} : vector<8x96xf32> to vector<8x32xf32>
    %56 = arith.mulf %55, %52 : vector<8x32xf32>
    %57 = arith.addf %54, %56 : vector<8x32xf32>
    %58 = vector.extract_strided_slice %50 {offsets = [0, 64], sizes = [8, 32], strides = [1, 1]} : vector<8x96xf32> to vector<8x32xf32>
    %59 = math.tanh %57 : vector<8x32xf32>
    %60 = arith.mulf %58, %59 : vector<8x32xf32>
    %c1_i32 = arith.constant 1 : i32
    %c8_i32_39 = arith.constant 8 : i32
    %61 = arith.muli %c1_i32, %c8_i32_39 : i32
    %62 = tpu.assume_multiple %61, 8 : i32
    %63 = arith.index_cast %62 : i32 to index
    %c0_40 = arith.constant 0 : index
    %64 = vector.load %arg12[%63, %c0_40] : memref<64x128xf32, #tpu.memory_space<vmem>>, vector<8x128xf32>
    %65 = arith.truncf %60 : vector<8x32xf32> to vector<8x32xbf16>
    %cst_41 = arith.constant dense<0.000000e+00> : vector<8x128xf32>
    %66 = tpu.matmul %65, %18, %cst_41 {dimension_numbers = #tpu.dot_dimension_numbers<[1], [0], [0], [1], [0, 0, 1, 1], [], []>} : vector<8x32xbf16>, vector<32x128xbf16>, vector<8x128xf32> -> vector<8x128xf32>
    %67 = arith.addf %64, %66 : vector<8x128xf32>
    %68 = vector.extract_strided_slice %67 {offsets = [0, 0], sizes = [8, 96], strides = [1, 1]} : vector<8x128xf32> to vector<8x96xf32>
    %69 = arith.negf %68 : vector<8x96xf32>
    %70 = math.exp %69 : vector<8x96xf32>
    %cst_42 = arith.constant 1.000000e+00 : f32
    %71 = vector.broadcast %cst_42 : f32 to vector<8x96xf32>
    %72 = arith.addf %71, %70 : vector<8x96xf32>
    %73 = arith.divf %71, %72 : vector<8x96xf32>
    %74 = vector.extract_strided_slice %67 {offsets = [0, 96], sizes = [8, 32], strides = [1, 1]} : vector<8x128xf32> to vector<8x32xf32>
    %75 = math.tanh %74 : vector<8x32xf32>
    %76 = vector.extract_strided_slice %73 {offsets = [0, 32], sizes = [8, 32], strides = [1, 1]} : vector<8x96xf32> to vector<8x32xf32>
    %77 = arith.mulf %76, %57 : vector<8x32xf32>
    %78 = vector.extract_strided_slice %73 {offsets = [0, 0], sizes = [8, 32], strides = [1, 1]} : vector<8x96xf32> to vector<8x32xf32>
    %79 = arith.mulf %78, %75 : vector<8x32xf32>
    %80 = arith.addf %77, %79 : vector<8x32xf32>
    %81 = vector.extract_strided_slice %73 {offsets = [0, 64], sizes = [8, 32], strides = [1, 1]} : vector<8x96xf32> to vector<8x32xf32>
    %82 = math.tanh %80 : vector<8x32xf32>
    %83 = arith.mulf %81, %82 : vector<8x32xf32>
    %c2_i32 = arith.constant 2 : i32
    %c8_i32_43 = arith.constant 8 : i32
    %84 = arith.muli %c2_i32, %c8_i32_43 : i32
    %85 = tpu.assume_multiple %84, 8 : i32
    %86 = arith.index_cast %85 : i32 to index
    %c0_44 = arith.constant 0 : index
    %87 = vector.load %arg12[%86, %c0_44] : memref<64x128xf32, #tpu.memory_space<vmem>>, vector<8x128xf32>
    %88 = arith.truncf %83 : vector<8x32xf32> to vector<8x32xbf16>
    %cst_45 = arith.constant dense<0.000000e+00> : vector<8x128xf32>
    %89 = tpu.matmul %88, %18, %cst_45 {dimension_numbers = #tpu.dot_dimension_numbers<[1], [0], [0], [1], [0, 0, 1, 1], [], []>} : vector<8x32xbf16>, vector<32x128xbf16>, vector<8x128xf32> -> vector<8x128xf32>
    %90 = arith.addf %87, %89 : vector<8x128xf32>
    %91 = vector.extract_strided_slice %90 {offsets = [0, 0], sizes = [8, 96], strides = [1, 1]} : vector<8x128xf32> to vector<8x96xf32>
    %92 = arith.negf %91 : vector<8x96xf32>
    %93 = math.exp %92 : vector<8x96xf32>
    %cst_46 = arith.constant 1.000000e+00 : f32
    %94 = vector.broadcast %cst_46 : f32 to vector<8x96xf32>
    %95 = arith.addf %94, %93 : vector<8x96xf32>
    %96 = arith.divf %94, %95 : vector<8x96xf32>
    %97 = vector.extract_strided_slice %90 {offsets = [0, 96], sizes = [8, 32], strides = [1, 1]} : vector<8x128xf32> to vector<8x32xf32>
    %98 = math.tanh %97 : vector<8x32xf32>
    %99 = vector.extract_strided_slice %96 {offsets = [0, 32], sizes = [8, 32], strides = [1, 1]} : vector<8x96xf32> to vector<8x32xf32>
    %100 = arith.mulf %99, %80 : vector<8x32xf32>
    %101 = vector.extract_strided_slice %96 {offsets = [0, 0], sizes = [8, 32], strides = [1, 1]} : vector<8x96xf32> to vector<8x32xf32>
    %102 = arith.mulf %101, %98 : vector<8x32xf32>
    %103 = arith.addf %100, %102 : vector<8x32xf32>
    %104 = vector.extract_strided_slice %96 {offsets = [0, 64], sizes = [8, 32], strides = [1, 1]} : vector<8x96xf32> to vector<8x32xf32>
    %105 = math.tanh %103 : vector<8x32xf32>
    %106 = arith.mulf %104, %105 : vector<8x32xf32>
    %c3_i32 = arith.constant 3 : i32
    %c8_i32_47 = arith.constant 8 : i32
    %107 = arith.muli %c3_i32, %c8_i32_47 : i32
    %108 = tpu.assume_multiple %107, 8 : i32
    %109 = arith.index_cast %108 : i32 to index
    %c0_48 = arith.constant 0 : index
    %110 = vector.load %arg12[%109, %c0_48] : memref<64x128xf32, #tpu.memory_space<vmem>>, vector<8x128xf32>
    %111 = arith.truncf %106 : vector<8x32xf32> to vector<8x32xbf16>
    %cst_49 = arith.constant dense<0.000000e+00> : vector<8x128xf32>
    %112 = tpu.matmul %111, %18, %cst_49 {dimension_numbers = #tpu.dot_dimension_numbers<[1], [0], [0], [1], [0, 0, 1, 1], [], []>} : vector<8x32xbf16>, vector<32x128xbf16>, vector<8x128xf32> -> vector<8x128xf32>
    %113 = arith.addf %110, %112 : vector<8x128xf32>
    %114 = vector.extract_strided_slice %113 {offsets = [0, 0], sizes = [8, 96], strides = [1, 1]} : vector<8x128xf32> to vector<8x96xf32>
    %115 = arith.negf %114 : vector<8x96xf32>
    %116 = math.exp %115 : vector<8x96xf32>
    %cst_50 = arith.constant 1.000000e+00 : f32
    %117 = vector.broadcast %cst_50 : f32 to vector<8x96xf32>
    %118 = arith.addf %117, %116 : vector<8x96xf32>
    %119 = arith.divf %117, %118 : vector<8x96xf32>
    %120 = vector.extract_strided_slice %113 {offsets = [0, 96], sizes = [8, 32], strides = [1, 1]} : vector<8x128xf32> to vector<8x32xf32>
    %121 = math.tanh %120 : vector<8x32xf32>
    %122 = vector.extract_strided_slice %119 {offsets = [0, 32], sizes = [8, 32], strides = [1, 1]} : vector<8x96xf32> to vector<8x32xf32>
    %123 = arith.mulf %122, %103 : vector<8x32xf32>
    %124 = vector.extract_strided_slice %119 {offsets = [0, 0], sizes = [8, 32], strides = [1, 1]} : vector<8x96xf32> to vector<8x32xf32>
    %125 = arith.mulf %124, %121 : vector<8x32xf32>
    %126 = arith.addf %123, %125 : vector<8x32xf32>
    %127 = vector.extract_strided_slice %119 {offsets = [0, 64], sizes = [8, 32], strides = [1, 1]} : vector<8x96xf32> to vector<8x32xf32>
    %128 = math.tanh %126 : vector<8x32xf32>
    %129 = arith.mulf %127, %128 : vector<8x32xf32>
    %c4_i32 = arith.constant 4 : i32
    %c8_i32_51 = arith.constant 8 : i32
    %130 = arith.muli %c4_i32, %c8_i32_51 : i32
    %131 = tpu.assume_multiple %130, 8 : i32
    %132 = arith.index_cast %131 : i32 to index
    %c0_52 = arith.constant 0 : index
    %133 = vector.load %arg12[%132, %c0_52] : memref<64x128xf32, #tpu.memory_space<vmem>>, vector<8x128xf32>
    %134 = arith.truncf %129 : vector<8x32xf32> to vector<8x32xbf16>
    %cst_53 = arith.constant dense<0.000000e+00> : vector<8x128xf32>
    %135 = tpu.matmul %134, %18, %cst_53 {dimension_numbers = #tpu.dot_dimension_numbers<[1], [0], [0], [1], [0, 0, 1, 1], [], []>} : vector<8x32xbf16>, vector<32x128xbf16>, vector<8x128xf32> -> vector<8x128xf32>
    %136 = arith.addf %133, %135 : vector<8x128xf32>
    %137 = vector.extract_strided_slice %136 {offsets = [0, 0], sizes = [8, 96], strides = [1, 1]} : vector<8x128xf32> to vector<8x96xf32>
    %138 = arith.negf %137 : vector<8x96xf32>
    %139 = math.exp %138 : vector<8x96xf32>
    %cst_54 = arith.constant 1.000000e+00 : f32
    %140 = vector.broadcast %cst_54 : f32 to vector<8x96xf32>
    %141 = arith.addf %140, %139 : vector<8x96xf32>
    %142 = arith.divf %140, %141 : vector<8x96xf32>
    %143 = vector.extract_strided_slice %136 {offsets = [0, 96], sizes = [8, 32], strides = [1, 1]} : vector<8x128xf32> to vector<8x32xf32>
    %144 = math.tanh %143 : vector<8x32xf32>
    %145 = vector.extract_strided_slice %142 {offsets = [0, 32], sizes = [8, 32], strides = [1, 1]} : vector<8x96xf32> to vector<8x32xf32>
    %146 = arith.mulf %145, %126 : vector<8x32xf32>
    %147 = vector.extract_strided_slice %142 {offsets = [0, 0], sizes = [8, 32], strides = [1, 1]} : vector<8x96xf32> to vector<8x32xf32>
    %148 = arith.mulf %147, %144 : vector<8x32xf32>
    %149 = arith.addf %146, %148 : vector<8x32xf32>
    %150 = vector.extract_strided_slice %142 {offsets = [0, 64], sizes = [8, 32], strides = [1, 1]} : vector<8x96xf32> to vector<8x32xf32>
    %151 = math.tanh %149 : vector<8x32xf32>
    %152 = arith.mulf %150, %151 : vector<8x32xf32>
    %c5_i32 = arith.constant 5 : i32
    %c8_i32_55 = arith.constant 8 : i32
    %153 = arith.muli %c5_i32, %c8_i32_55 : i32
    %154 = tpu.assume_multiple %153, 8 : i32
    %155 = arith.index_cast %154 : i32 to index
    %c0_56 = arith.constant 0 : index
    %156 = vector.load %arg12[%155, %c0_56] : memref<64x128xf32, #tpu.memory_space<vmem>>, vector<8x128xf32>
    %157 = arith.truncf %152 : vector<8x32xf32> to vector<8x32xbf16>
    %cst_57 = arith.constant dense<0.000000e+00> : vector<8x128xf32>
    %158 = tpu.matmul %157, %18, %cst_57 {dimension_numbers = #tpu.dot_dimension_numbers<[1], [0], [0], [1], [0, 0, 1, 1], [], []>} : vector<8x32xbf16>, vector<32x128xbf16>, vector<8x128xf32> -> vector<8x128xf32>
    %159 = arith.addf %156, %158 : vector<8x128xf32>
    %160 = vector.extract_strided_slice %159 {offsets = [0, 0], sizes = [8, 96], strides = [1, 1]} : vector<8x128xf32> to vector<8x96xf32>
    %161 = arith.negf %160 : vector<8x96xf32>
    %162 = math.exp %161 : vector<8x96xf32>
    %cst_58 = arith.constant 1.000000e+00 : f32
    %163 = vector.broadcast %cst_58 : f32 to vector<8x96xf32>
    %164 = arith.addf %163, %162 : vector<8x96xf32>
    %165 = arith.divf %163, %164 : vector<8x96xf32>
    %166 = vector.extract_strided_slice %159 {offsets = [0, 96], sizes = [8, 32], strides = [1, 1]} : vector<8x128xf32> to vector<8x32xf32>
    %167 = math.tanh %166 : vector<8x32xf32>
    %168 = vector.extract_strided_slice %165 {offsets = [0, 32], sizes = [8, 32], strides = [1, 1]} : vector<8x96xf32> to vector<8x32xf32>
    %169 = arith.mulf %168, %149 : vector<8x32xf32>
    %170 = vector.extract_strided_slice %165 {offsets = [0, 0], sizes = [8, 32], strides = [1, 1]} : vector<8x96xf32> to vector<8x32xf32>
    %171 = arith.mulf %170, %167 : vector<8x32xf32>
    %172 = arith.addf %169, %171 : vector<8x32xf32>
    %173 = vector.extract_strided_slice %165 {offsets = [0, 64], sizes = [8, 32], strides = [1, 1]} : vector<8x96xf32> to vector<8x32xf32>
    %174 = math.tanh %172 : vector<8x32xf32>
    %175 = arith.mulf %173, %174 : vector<8x32xf32>
    %c6_i32 = arith.constant 6 : i32
    %c8_i32_59 = arith.constant 8 : i32
    %176 = arith.muli %c6_i32, %c8_i32_59 : i32
    %177 = tpu.assume_multiple %176, 8 : i32
    %178 = arith.index_cast %177 : i32 to index
    %c0_60 = arith.constant 0 : index
    %179 = vector.load %arg12[%178, %c0_60] : memref<64x128xf32, #tpu.memory_space<vmem>>, vector<8x128xf32>
    %180 = arith.truncf %175 : vector<8x32xf32> to vector<8x32xbf16>
    %cst_61 = arith.constant dense<0.000000e+00> : vector<8x128xf32>
    %181 = tpu.matmul %180, %18, %cst_61 {dimension_numbers = #tpu.dot_dimension_numbers<[1], [0], [0], [1], [0, 0, 1, 1], [], []>} : vector<8x32xbf16>, vector<32x128xbf16>, vector<8x128xf32> -> vector<8x128xf32>
    %182 = arith.addf %179, %181 : vector<8x128xf32>
    %183 = vector.extract_strided_slice %182 {offsets = [0, 0], sizes = [8, 96], strides = [1, 1]} : vector<8x128xf32> to vector<8x96xf32>
    %184 = arith.negf %183 : vector<8x96xf32>
    %185 = math.exp %184 : vector<8x96xf32>
    %cst_62 = arith.constant 1.000000e+00 : f32
    %186 = vector.broadcast %cst_62 : f32 to vector<8x96xf32>
    %187 = arith.addf %186, %185 : vector<8x96xf32>
    %188 = arith.divf %186, %187 : vector<8x96xf32>
    %189 = vector.extract_strided_slice %182 {offsets = [0, 96], sizes = [8, 32], strides = [1, 1]} : vector<8x128xf32> to vector<8x32xf32>
    %190 = math.tanh %189 : vector<8x32xf32>
    %191 = vector.extract_strided_slice %188 {offsets = [0, 32], sizes = [8, 32], strides = [1, 1]} : vector<8x96xf32> to vector<8x32xf32>
    %192 = arith.mulf %191, %172 : vector<8x32xf32>
    %193 = vector.extract_strided_slice %188 {offsets = [0, 0], sizes = [8, 32], strides = [1, 1]} : vector<8x96xf32> to vector<8x32xf32>
    %194 = arith.mulf %193, %190 : vector<8x32xf32>
    %195 = arith.addf %192, %194 : vector<8x32xf32>
    %196 = vector.extract_strided_slice %188 {offsets = [0, 64], sizes = [8, 32], strides = [1, 1]} : vector<8x96xf32> to vector<8x32xf32>
    %197 = math.tanh %195 : vector<8x32xf32>
    %198 = arith.mulf %196, %197 : vector<8x32xf32>
    %c7_i32 = arith.constant 7 : i32
    %c8_i32_63 = arith.constant 8 : i32
    %199 = arith.muli %c7_i32, %c8_i32_63 : i32
    %200 = tpu.assume_multiple %199, 8 : i32
    %201 = arith.index_cast %200 : i32 to index
    %c0_64 = arith.constant 0 : index
    %202 = vector.load %arg12[%201, %c0_64] : memref<64x128xf32, #tpu.memory_space<vmem>>, vector<8x128xf32>
    %203 = arith.truncf %198 : vector<8x32xf32> to vector<8x32xbf16>
    %cst_65 = arith.constant dense<0.000000e+00> : vector<8x128xf32>
    %204 = tpu.matmul %203, %18, %cst_65 {dimension_numbers = #tpu.dot_dimension_numbers<[1], [0], [0], [1], [0, 0, 1, 1], [], []>} : vector<8x32xbf16>, vector<32x128xbf16>, vector<8x128xf32> -> vector<8x128xf32>
    %205 = arith.addf %202, %204 : vector<8x128xf32>
    %206 = vector.extract_strided_slice %205 {offsets = [0, 0], sizes = [8, 96], strides = [1, 1]} : vector<8x128xf32> to vector<8x96xf32>
    %207 = arith.negf %206 : vector<8x96xf32>
    %208 = math.exp %207 : vector<8x96xf32>
    %cst_66 = arith.constant 1.000000e+00 : f32
    %209 = vector.broadcast %cst_66 : f32 to vector<8x96xf32>
    %210 = arith.addf %209, %208 : vector<8x96xf32>
    %211 = arith.divf %209, %210 : vector<8x96xf32>
    %212 = vector.extract_strided_slice %205 {offsets = [0, 96], sizes = [8, 32], strides = [1, 1]} : vector<8x128xf32> to vector<8x32xf32>
    %213 = math.tanh %212 : vector<8x32xf32>
    %214 = vector.extract_strided_slice %211 {offsets = [0, 32], sizes = [8, 32], strides = [1, 1]} : vector<8x96xf32> to vector<8x32xf32>
    %215 = arith.mulf %214, %195 : vector<8x32xf32>
    %216 = vector.extract_strided_slice %211 {offsets = [0, 0], sizes = [8, 32], strides = [1, 1]} : vector<8x96xf32> to vector<8x32xf32>
    %217 = arith.mulf %216, %213 : vector<8x32xf32>
    %218 = arith.addf %215, %217 : vector<8x32xf32>
    %219 = vector.extract_strided_slice %211 {offsets = [0, 64], sizes = [8, 32], strides = [1, 1]} : vector<8x96xf32> to vector<8x32xf32>
    %220 = math.tanh %218 : vector<8x32xf32>
    %221 = arith.mulf %219, %220 : vector<8x32xf32>
    %c8_i32_67 = arith.constant 8 : i32
    %cst_68 = arith.constant 0.000000e+00 : f32
    %222 = vector.broadcast %cst_68 : f32 to vector<8x32xf32>
    %c0_69 = arith.constant 0 : index
    %c0_70 = arith.constant 0 : index
    %223 = vector.load %arg14[%c0_69, %c0_70] : memref<64x32xf32, #tpu.memory_space<vmem>>, vector<8x32xf32>
    tpu.vector_store %arg14[%c0_69, %c0_70], %222 {strides = array<i32>} : memref<64x32xf32, #tpu.memory_space<vmem>>, vector<8x32xf32>,
    %224 = arith.truncf %221 : vector<8x32xf32> to vector<8x32xbf16>
    %cst_71 = arith.constant dense<0.000000e+00> : vector<8x128xf32>
    %225 = tpu.matmul %224, %20, %cst_71 {dimension_numbers = #tpu.dot_dimension_numbers<[1], [0], [0], [1], [0, 0, 1, 1], [], []>} : vector<8x32xbf16>, vector<32x128xbf16>, vector<8x128xf32> -> vector<8x128xf32>
    %c0_72 = arith.constant 0 : index
    %c0_73 = arith.constant 0 : index
    %226 = vector.load %arg13[%c0_72, %c0_73] : memref<64x128xf32, #tpu.memory_space<vmem>>, vector<8x128xf32>
    %c1_i32_74 = arith.constant 1 : i32
    %227 = arith.addf %226, %225 : vector<8x128xf32>
    %228 = vector.extract_strided_slice %227 {offsets = [0, 0], sizes = [8, 96], strides = [1, 1]} : vector<8x128xf32> to vector<8x96xf32>
    %229 = arith.negf %228 : vector<8x96xf32>
    %230 = math.exp %229 : vector<8x96xf32>
    %cst_75 = arith.constant 1.000000e+00 : f32
    %231 = vector.broadcast %cst_75 : f32 to vector<8x96xf32>
    %232 = arith.addf %231, %230 : vector<8x96xf32>
    %233 = arith.divf %231, %232 : vector<8x96xf32>
    %234 = vector.extract_strided_slice %227 {offsets = [0, 96], sizes = [8, 32], strides = [1, 1]} : vector<8x128xf32> to vector<8x32xf32>
    %235 = math.tanh %234 : vector<8x32xf32>
    %236 = vector.extract_strided_slice %233 {offsets = [0, 32], sizes = [8, 32], strides = [1, 1]} : vector<8x96xf32> to vector<8x32xf32>
    %237 = arith.mulf %236, %218 : vector<8x32xf32>
    %238 = vector.extract_strided_slice %233 {offsets = [0, 0], sizes = [8, 32], strides = [1, 1]} : vector<8x96xf32> to vector<8x32xf32>
    %239 = arith.mulf %238, %235 : vector<8x32xf32>
    %240 = arith.addf %237, %239 : vector<8x32xf32>
    %241 = vector.extract_strided_slice %233 {offsets = [0, 64], sizes = [8, 32], strides = [1, 1]} : vector<8x96xf32> to vector<8x32xf32>
    %242 = math.tanh %240 : vector<8x32xf32>
    %243 = arith.mulf %241, %242 : vector<8x32xf32>
    %c8_i32_76 = arith.constant 8 : i32
    %244 = arith.muli %c1_i32_74, %c8_i32_76 : i32
    %245 = tpu.assume_multiple %244, 8 : i32
    %246 = arith.index_cast %245 : i32 to index
    %c0_77 = arith.constant 0 : index
    %247 = vector.load %arg14[%246, %c0_77] : memref<64x32xf32, #tpu.memory_space<vmem>>, vector<8x32xf32>
    tpu.vector_store %arg14[%246, %c0_77], %243 {strides = array<i32>} : memref<64x32xf32, #tpu.memory_space<vmem>>, vector<8x32xf32>,
    %c8_i32_78 = arith.constant 8 : i32
    %248 = arith.muli %c1_i32_74, %c8_i32_78 : i32
    %249 = tpu.assume_multiple %248, 8 : i32
    %250 = arith.index_cast %249 : i32 to index
    %c0_79 = arith.constant 0 : index
    %251 = vector.load %arg13[%250, %c0_79] : memref<64x128xf32, #tpu.memory_space<vmem>>, vector<8x128xf32>
    %252 = arith.truncf %243 : vector<8x32xf32> to vector<8x32xbf16>
    %253 = arith.index_cast %c1_i32_74 : i32 to index
    %254 = memref.load %arg0[%253] : memref<8xi32, #tpu.memory_space<smem>>
    %c0_i32_80 = arith.constant 0 : i32
    %255 = arith.cmpi eq, %254, %c0_i32_80 : i32
    %256 = arith.extui %255 : i1 to i32
    %c0_i32_81 = arith.constant 0 : i32
    %257 = arith.cmpi ne, %256, %c0_i32_81 : i32
    %258:2 = scf.if %257 -> (vector<8x128xf32>, vector<8x128xf32>) {
      %cst_141 = arith.constant dense<0.000000e+00> : vector<8x256xf32>
      %460 = tpu.matmul %252, %19, %cst_141 {dimension_numbers = #tpu.dot_dimension_numbers<[1], [0], [0], [1], [0, 0, 1, 1], [], []>} : vector<8x32xbf16>, vector<32x256xbf16>, vector<8x256xf32> -> vector<8x256xf32>
      %461 = vector.extract_strided_slice %460 {offsets = [0, 0], sizes = [8, 128], strides = [1, 1]} : vector<8x256xf32> to vector<8x128xf32>
      %462 = vector.extract_strided_slice %460 {offsets = [0, 128], sizes = [8, 128], strides = [1, 1]} : vector<8x256xf32> to vector<8x128xf32>
      %463 = arith.addf %462, %35 : vector<8x128xf32>
      %cst_142 = arith.constant dense<0xFF800000> : vector<8xf32>
      %464 = vector.multi_reduction <maximumf>, %463, %cst_142 [1] : vector<8x128xf32> to vector<8xf32>
      %465 = vector.shape_cast %464 : vector<8xf32> to vector<8x1xf32>
      %466 = vector.broadcast %465 : vector<8x1xf32> to vector<8x128xf32>
      %467 = arith.cmpf oeq, %463, %466 : vector<8x128xf32>
      %c128_i32 = arith.constant 128 : i32
      %468 = vector.broadcast %c128_i32 : i32 to vector<8x128xi32>
      %469 = arith.select %467, %25, %468 : vector<8x128xi1>, vector<8x128xi32>
      %cst_143 = arith.constant dense<2147483647> : vector<8xi32>
      %470 = vector.multi_reduction <minsi>, %469, %cst_143 [1] : vector<8x128xi32> to vector<8xi32>
      %471 = vector.shape_cast %470 : vector<8xi32> to vector<8x1xi32>
      %472 = vector.broadcast %471 : vector<8x1xi32> to vector<8x64xi32>
      %473 = arith.cmpi eq, %26, %472 : vector<8x64xi32>
      %474 = arith.extui %473 : vector<8x64xi1> to vector<8x64xi32>
      %475 = arith.sitofp %474 : vector<8x64xi32> to vector<8x64xf32>
      %476 = arith.truncf %475 : vector<8x64xf32> to vector<8x64xbf16>
      %cst_144 = arith.constant dense<0.000000e+00> : vector<8x128xf32>
      %477 = tpu.matmul %476, %17, %cst_144 {dimension_numbers = #tpu.dot_dimension_numbers<[1], [0], [0], [1], [0, 0, 1, 1], [], []>} : vector<8x64xbf16>, vector<64x128xbf16>, vector<8x128xf32> -> vector<8x128xf32>
      %478 = arith.addf %477, %24 : vector<8x128xf32>
      scf.yield %461, %478 : vector<8x128xf32>, vector<8x128xf32>
    } else {
      %cst_141 = arith.constant dense<0.000000e+00> : vector<8x128xf32>
      %460 = tpu.matmul %252, %20, %cst_141 {dimension_numbers = #tpu.dot_dimension_numbers<[1], [0], [0], [1], [0, 0, 1, 1], [], []>} : vector<8x32xbf16>, vector<32x128xbf16>, vector<8x128xf32> -> vector<8x128xf32>
      scf.yield %460, %251 : vector<8x128xf32>, vector<8x128xf32>
    }
    %c2_i32_82 = arith.constant 2 : i32
    %259 = arith.addf %258#1, %258#0 : vector<8x128xf32>
    %260 = vector.extract_strided_slice %259 {offsets = [0, 0], sizes = [8, 96], strides = [1, 1]} : vector<8x128xf32> to vector<8x96xf32>
    %261 = arith.negf %260 : vector<8x96xf32>
    %262 = math.exp %261 : vector<8x96xf32>
    %cst_83 = arith.constant 1.000000e+00 : f32
    %263 = vector.broadcast %cst_83 : f32 to vector<8x96xf32>
    %264 = arith.addf %263, %262 : vector<8x96xf32>
    %265 = arith.divf %263, %264 : vector<8x96xf32>
    %266 = vector.extract_strided_slice %259 {offsets = [0, 96], sizes = [8, 32], strides = [1, 1]} : vector<8x128xf32> to vector<8x32xf32>
    %267 = math.tanh %266 : vector<8x32xf32>
    %268 = vector.extract_strided_slice %265 {offsets = [0, 32], sizes = [8, 32], strides = [1, 1]} : vector<8x96xf32> to vector<8x32xf32>
    %269 = arith.mulf %268, %240 : vector<8x32xf32>
    %270 = vector.extract_strided_slice %265 {offsets = [0, 0], sizes = [8, 32], strides = [1, 1]} : vector<8x96xf32> to vector<8x32xf32>
    %271 = arith.mulf %270, %267 : vector<8x32xf32>
    %272 = arith.addf %269, %271 : vector<8x32xf32>
    %273 = vector.extract_strided_slice %265 {offsets = [0, 64], sizes = [8, 32], strides = [1, 1]} : vector<8x96xf32> to vector<8x32xf32>
    %274 = math.tanh %272 : vector<8x32xf32>
    %275 = arith.mulf %273, %274 : vector<8x32xf32>
    %c8_i32_84 = arith.constant 8 : i32
    %276 = arith.muli %c2_i32_82, %c8_i32_84 : i32
    %277 = tpu.assume_multiple %276, 8 : i32
    %278 = arith.index_cast %277 : i32 to index
    %c0_85 = arith.constant 0 : index
    %279 = vector.load %arg14[%278, %c0_85] : memref<64x32xf32, #tpu.memory_space<vmem>>, vector<8x32xf32>
    tpu.vector_store %arg14[%278, %c0_85], %275 {strides = array<i32>} : memref<64x32xf32, #tpu.memory_space<vmem>>, vector<8x32xf32>,
    %c8_i32_86 = arith.constant 8 : i32
    %280 = arith.muli %c2_i32_82, %c8_i32_86 : i32
    %281 = tpu.assume_multiple %280, 8 : i32
    %282 = arith.index_cast %281 : i32 to index
    %c0_87 = arith.constant 0 : index
    %283 = vector.load %arg13[%282, %c0_87] : memref<64x128xf32, #tpu.memory_space<vmem>>, vector<8x128xf32>
    %284 = arith.truncf %275 : vector<8x32xf32> to vector<8x32xbf16>
    %285 = arith.index_cast %c2_i32_82 : i32 to index
    %286 = memref.load %arg0[%285] : memref<8xi32, #tpu.memory_space<smem>>
    %c0_i32_88 = arith.constant 0 : i32
    %287 = arith.cmpi eq, %286, %c0_i32_88 : i32
    %288 = arith.extui %287 : i1 to i32
    %c0_i32_89 = arith.constant 0 : i32
    %289 = arith.cmpi ne, %288, %c0_i32_89 : i32
    %290:2 = scf.if %289 -> (vector<8x128xf32>, vector<8x128xf32>) {
      %cst_141 = arith.constant dense<0.000000e+00> : vector<8x256xf32>
      %460 = tpu.matmul %284, %19, %cst_141 {dimension_numbers = #tpu.dot_dimension_numbers<[1], [0], [0], [1], [0, 0, 1, 1], [], []>} : vector<8x32xbf16>, vector<32x256xbf16>, vector<8x256xf32> -> vector<8x256xf32>
      %461 = vector.extract_strided_slice %460 {offsets = [0, 0], sizes = [8, 128], strides = [1, 1]} : vector<8x256xf32> to vector<8x128xf32>
      %462 = vector.extract_strided_slice %460 {offsets = [0, 128], sizes = [8, 128], strides = [1, 1]} : vector<8x256xf32> to vector<8x128xf32>
      %463 = arith.addf %462, %35 : vector<8x128xf32>
      %cst_142 = arith.constant dense<0xFF800000> : vector<8xf32>
      %464 = vector.multi_reduction <maximumf>, %463, %cst_142 [1] : vector<8x128xf32> to vector<8xf32>
      %465 = vector.shape_cast %464 : vector<8xf32> to vector<8x1xf32>
      %466 = vector.broadcast %465 : vector<8x1xf32> to vector<8x128xf32>
      %467 = arith.cmpf oeq, %463, %466 : vector<8x128xf32>
      %c128_i32 = arith.constant 128 : i32
      %468 = vector.broadcast %c128_i32 : i32 to vector<8x128xi32>
      %469 = arith.select %467, %25, %468 : vector<8x128xi1>, vector<8x128xi32>
      %cst_143 = arith.constant dense<2147483647> : vector<8xi32>
      %470 = vector.multi_reduction <minsi>, %469, %cst_143 [1] : vector<8x128xi32> to vector<8xi32>
      %471 = vector.shape_cast %470 : vector<8xi32> to vector<8x1xi32>
      %472 = vector.broadcast %471 : vector<8x1xi32> to vector<8x64xi32>
      %473 = arith.cmpi eq, %26, %472 : vector<8x64xi32>
      %474 = arith.extui %473 : vector<8x64xi1> to vector<8x64xi32>
      %475 = arith.sitofp %474 : vector<8x64xi32> to vector<8x64xf32>
      %476 = arith.truncf %475 : vector<8x64xf32> to vector<8x64xbf16>
      %cst_144 = arith.constant dense<0.000000e+00> : vector<8x128xf32>
      %477 = tpu.matmul %476, %17, %cst_144 {dimension_numbers = #tpu.dot_dimension_numbers<[1], [0], [0], [1], [0, 0, 1, 1], [], []>} : vector<8x64xbf16>, vector<64x128xbf16>, vector<8x128xf32> -> vector<8x128xf32>
      %478 = arith.addf %477, %24 : vector<8x128xf32>
      scf.yield %461, %478 : vector<8x128xf32>, vector<8x128xf32>
    } else {
      %cst_141 = arith.constant dense<0.000000e+00> : vector<8x128xf32>
      %460 = tpu.matmul %284, %20, %cst_141 {dimension_numbers = #tpu.dot_dimension_numbers<[1], [0], [0], [1], [0, 0, 1, 1], [], []>} : vector<8x32xbf16>, vector<32x128xbf16>, vector<8x128xf32> -> vector<8x128xf32>
      scf.yield %460, %283 : vector<8x128xf32>, vector<8x128xf32>
    }
    %c3_i32_90 = arith.constant 3 : i32
    %291 = arith.addf %290#1, %290#0 : vector<8x128xf32>
    %292 = vector.extract_strided_slice %291 {offsets = [0, 0], sizes = [8, 96], strides = [1, 1]} : vector<8x128xf32> to vector<8x96xf32>
    %293 = arith.negf %292 : vector<8x96xf32>
    %294 = math.exp %293 : vector<8x96xf32>
    %cst_91 = arith.constant 1.000000e+00 : f32
    %295 = vector.broadcast %cst_91 : f32 to vector<8x96xf32>
    %296 = arith.addf %295, %294 : vector<8x96xf32>
    %297 = arith.divf %295, %296 : vector<8x96xf32>
    %298 = vector.extract_strided_slice %291 {offsets = [0, 96], sizes = [8, 32], strides = [1, 1]} : vector<8x128xf32> to vector<8x32xf32>
    %299 = math.tanh %298 : vector<8x32xf32>
    %300 = vector.extract_strided_slice %297 {offsets = [0, 32], sizes = [8, 32], strides = [1, 1]} : vector<8x96xf32> to vector<8x32xf32>
    %301 = arith.mulf %300, %272 : vector<8x32xf32>
    %302 = vector.extract_strided_slice %297 {offsets = [0, 0], sizes = [8, 32], strides = [1, 1]} : vector<8x96xf32> to vector<8x32xf32>
    %303 = arith.mulf %302, %299 : vector<8x32xf32>
    %304 = arith.addf %301, %303 : vector<8x32xf32>
    %305 = vector.extract_strided_slice %297 {offsets = [0, 64], sizes = [8, 32], strides = [1, 1]} : vector<8x96xf32> to vector<8x32xf32>
    %306 = math.tanh %304 : vector<8x32xf32>
    %307 = arith.mulf %305, %306 : vector<8x32xf32>
    %c8_i32_92 = arith.constant 8 : i32
    %308 = arith.muli %c3_i32_90, %c8_i32_92 : i32
    %309 = tpu.assume_multiple %308, 8 : i32
    %310 = arith.index_cast %309 : i32 to index
    %c0_93 = arith.constant 0 : index
    %311 = vector.load %arg14[%310, %c0_93] : memref<64x32xf32, #tpu.memory_space<vmem>>, vector<8x32xf32>
    tpu.vector_store %arg14[%310, %c0_93], %307 {strides = array<i32>} : memref<64x32xf32, #tpu.memory_space<vmem>>, vector<8x32xf32>,
    %c8_i32_94 = arith.constant 8 : i32
    %312 = arith.muli %c3_i32_90, %c8_i32_94 : i32
    %313 = tpu.assume_multiple %312, 8 : i32
    %314 = arith.index_cast %313 : i32 to index
    %c0_95 = arith.constant 0 : index
    %315 = vector.load %arg13[%314, %c0_95] : memref<64x128xf32, #tpu.memory_space<vmem>>, vector<8x128xf32>
    %316 = arith.truncf %307 : vector<8x32xf32> to vector<8x32xbf16>
    %317 = arith.index_cast %c3_i32_90 : i32 to index
    %318 = memref.load %arg0[%317] : memref<8xi32, #tpu.memory_space<smem>>
    %c0_i32_96 = arith.constant 0 : i32
    %319 = arith.cmpi eq, %318, %c0_i32_96 : i32
    %320 = arith.extui %319 : i1 to i32
    %c0_i32_97 = arith.constant 0 : i32
    %321 = arith.cmpi ne, %320, %c0_i32_97 : i32
    %322:2 = scf.if %321 -> (vector<8x128xf32>, vector<8x128xf32>) {
      %cst_141 = arith.constant dense<0.000000e+00> : vector<8x256xf32>
      %460 = tpu.matmul %316, %19, %cst_141 {dimension_numbers = #tpu.dot_dimension_numbers<[1], [0], [0], [1], [0, 0, 1, 1], [], []>} : vector<8x32xbf16>, vector<32x256xbf16>, vector<8x256xf32> -> vector<8x256xf32>
      %461 = vector.extract_strided_slice %460 {offsets = [0, 0], sizes = [8, 128], strides = [1, 1]} : vector<8x256xf32> to vector<8x128xf32>
      %462 = vector.extract_strided_slice %460 {offsets = [0, 128], sizes = [8, 128], strides = [1, 1]} : vector<8x256xf32> to vector<8x128xf32>
      %463 = arith.addf %462, %35 : vector<8x128xf32>
      %cst_142 = arith.constant dense<0xFF800000> : vector<8xf32>
      %464 = vector.multi_reduction <maximumf>, %463, %cst_142 [1] : vector<8x128xf32> to vector<8xf32>
      %465 = vector.shape_cast %464 : vector<8xf32> to vector<8x1xf32>
      %466 = vector.broadcast %465 : vector<8x1xf32> to vector<8x128xf32>
      %467 = arith.cmpf oeq, %463, %466 : vector<8x128xf32>
      %c128_i32 = arith.constant 128 : i32
      %468 = vector.broadcast %c128_i32 : i32 to vector<8x128xi32>
      %469 = arith.select %467, %25, %468 : vector<8x128xi1>, vector<8x128xi32>
      %cst_143 = arith.constant dense<2147483647> : vector<8xi32>
      %470 = vector.multi_reduction <minsi>, %469, %cst_143 [1] : vector<8x128xi32> to vector<8xi32>
      %471 = vector.shape_cast %470 : vector<8xi32> to vector<8x1xi32>
      %472 = vector.broadcast %471 : vector<8x1xi32> to vector<8x64xi32>
      %473 = arith.cmpi eq, %26, %472 : vector<8x64xi32>
      %474 = arith.extui %473 : vector<8x64xi1> to vector<8x64xi32>
      %475 = arith.sitofp %474 : vector<8x64xi32> to vector<8x64xf32>
      %476 = arith.truncf %475 : vector<8x64xf32> to vector<8x64xbf16>
      %cst_144 = arith.constant dense<0.000000e+00> : vector<8x128xf32>
      %477 = tpu.matmul %476, %17, %cst_144 {dimension_numbers = #tpu.dot_dimension_numbers<[1], [0], [0], [1], [0, 0, 1, 1], [], []>} : vector<8x64xbf16>, vector<64x128xbf16>, vector<8x128xf32> -> vector<8x128xf32>
      %478 = arith.addf %477, %24 : vector<8x128xf32>
      scf.yield %461, %478 : vector<8x128xf32>, vector<8x128xf32>
    } else {
      %cst_141 = arith.constant dense<0.000000e+00> : vector<8x128xf32>
      %460 = tpu.matmul %316, %20, %cst_141 {dimension_numbers = #tpu.dot_dimension_numbers<[1], [0], [0], [1], [0, 0, 1, 1], [], []>} : vector<8x32xbf16>, vector<32x128xbf16>, vector<8x128xf32> -> vector<8x128xf32>
      scf.yield %460, %315 : vector<8x128xf32>, vector<8x128xf32>
    }
    %c4_i32_98 = arith.constant 4 : i32
    %323 = arith.addf %322#1, %322#0 : vector<8x128xf32>
    %324 = vector.extract_strided_slice %323 {offsets = [0, 0], sizes = [8, 96], strides = [1, 1]} : vector<8x128xf32> to vector<8x96xf32>
    %325 = arith.negf %324 : vector<8x96xf32>
    %326 = math.exp %325 : vector<8x96xf32>
    %cst_99 = arith.constant 1.000000e+00 : f32
    %327 = vector.broadcast %cst_99 : f32 to vector<8x96xf32>
    %328 = arith.addf %327, %326 : vector<8x96xf32>
    %329 = arith.divf %327, %328 : vector<8x96xf32>
    %330 = vector.extract_strided_slice %323 {offsets = [0, 96], sizes = [8, 32], strides = [1, 1]} : vector<8x128xf32> to vector<8x32xf32>
    %331 = math.tanh %330 : vector<8x32xf32>
    %332 = vector.extract_strided_slice %329 {offsets = [0, 32], sizes = [8, 32], strides = [1, 1]} : vector<8x96xf32> to vector<8x32xf32>
    %333 = arith.mulf %332, %304 : vector<8x32xf32>
    %334 = vector.extract_strided_slice %329 {offsets = [0, 0], sizes = [8, 32], strides = [1, 1]} : vector<8x96xf32> to vector<8x32xf32>
    %335 = arith.mulf %334, %331 : vector<8x32xf32>
    %336 = arith.addf %333, %335 : vector<8x32xf32>
    %337 = vector.extract_strided_slice %329 {offsets = [0, 64], sizes = [8, 32], strides = [1, 1]} : vector<8x96xf32> to vector<8x32xf32>
    %338 = math.tanh %336 : vector<8x32xf32>
    %339 = arith.mulf %337, %338 : vector<8x32xf32>
    %c8_i32_100 = arith.constant 8 : i32
    %340 = arith.muli %c4_i32_98, %c8_i32_100 : i32
    %341 = tpu.assume_multiple %340, 8 : i32
    %342 = arith.index_cast %341 : i32 to index
    %c0_101 = arith.constant 0 : index
    %343 = vector.load %arg14[%342, %c0_101] : memref<64x32xf32, #tpu.memory_space<vmem>>, vector<8x32xf32>
    tpu.vector_store %arg14[%342, %c0_101], %339 {strides = array<i32>} : memref<64x32xf32, #tpu.memory_space<vmem>>, vector<8x32xf32>,
    %c8_i32_102 = arith.constant 8 : i32
    %344 = arith.muli %c4_i32_98, %c8_i32_102 : i32
    %345 = tpu.assume_multiple %344, 8 : i32
    %346 = arith.index_cast %345 : i32 to index
    %c0_103 = arith.constant 0 : index
    %347 = vector.load %arg13[%346, %c0_103] : memref<64x128xf32, #tpu.memory_space<vmem>>, vector<8x128xf32>
    %348 = arith.truncf %339 : vector<8x32xf32> to vector<8x32xbf16>
    %349 = arith.index_cast %c4_i32_98 : i32 to index
    %350 = memref.load %arg0[%349] : memref<8xi32, #tpu.memory_space<smem>>
    %c0_i32_104 = arith.constant 0 : i32
    %351 = arith.cmpi eq, %350, %c0_i32_104 : i32
    %352 = arith.extui %351 : i1 to i32
    %c0_i32_105 = arith.constant 0 : i32
    %353 = arith.cmpi ne, %352, %c0_i32_105 : i32
    %354:2 = scf.if %353 -> (vector<8x128xf32>, vector<8x128xf32>) {
      %cst_141 = arith.constant dense<0.000000e+00> : vector<8x256xf32>
      %460 = tpu.matmul %348, %19, %cst_141 {dimension_numbers = #tpu.dot_dimension_numbers<[1], [0], [0], [1], [0, 0, 1, 1], [], []>} : vector<8x32xbf16>, vector<32x256xbf16>, vector<8x256xf32> -> vector<8x256xf32>
      %461 = vector.extract_strided_slice %460 {offsets = [0, 0], sizes = [8, 128], strides = [1, 1]} : vector<8x256xf32> to vector<8x128xf32>
      %462 = vector.extract_strided_slice %460 {offsets = [0, 128], sizes = [8, 128], strides = [1, 1]} : vector<8x256xf32> to vector<8x128xf32>
      %463 = arith.addf %462, %35 : vector<8x128xf32>
      %cst_142 = arith.constant dense<0xFF800000> : vector<8xf32>
      %464 = vector.multi_reduction <maximumf>, %463, %cst_142 [1] : vector<8x128xf32> to vector<8xf32>
      %465 = vector.shape_cast %464 : vector<8xf32> to vector<8x1xf32>
      %466 = vector.broadcast %465 : vector<8x1xf32> to vector<8x128xf32>
      %467 = arith.cmpf oeq, %463, %466 : vector<8x128xf32>
      %c128_i32 = arith.constant 128 : i32
      %468 = vector.broadcast %c128_i32 : i32 to vector<8x128xi32>
      %469 = arith.select %467, %25, %468 : vector<8x128xi1>, vector<8x128xi32>
      %cst_143 = arith.constant dense<2147483647> : vector<8xi32>
      %470 = vector.multi_reduction <minsi>, %469, %cst_143 [1] : vector<8x128xi32> to vector<8xi32>
      %471 = vector.shape_cast %470 : vector<8xi32> to vector<8x1xi32>
      %472 = vector.broadcast %471 : vector<8x1xi32> to vector<8x64xi32>
      %473 = arith.cmpi eq, %26, %472 : vector<8x64xi32>
      %474 = arith.extui %473 : vector<8x64xi1> to vector<8x64xi32>
      %475 = arith.sitofp %474 : vector<8x64xi32> to vector<8x64xf32>
      %476 = arith.truncf %475 : vector<8x64xf32> to vector<8x64xbf16>
      %cst_144 = arith.constant dense<0.000000e+00> : vector<8x128xf32>
      %477 = tpu.matmul %476, %17, %cst_144 {dimension_numbers = #tpu.dot_dimension_numbers<[1], [0], [0], [1], [0, 0, 1, 1], [], []>} : vector<8x64xbf16>, vector<64x128xbf16>, vector<8x128xf32> -> vector<8x128xf32>
      %478 = arith.addf %477, %24 : vector<8x128xf32>
      scf.yield %461, %478 : vector<8x128xf32>, vector<8x128xf32>
    } else {
      %cst_141 = arith.constant dense<0.000000e+00> : vector<8x128xf32>
      %460 = tpu.matmul %348, %20, %cst_141 {dimension_numbers = #tpu.dot_dimension_numbers<[1], [0], [0], [1], [0, 0, 1, 1], [], []>} : vector<8x32xbf16>, vector<32x128xbf16>, vector<8x128xf32> -> vector<8x128xf32>
      scf.yield %460, %347 : vector<8x128xf32>, vector<8x128xf32>
    }
    %c5_i32_106 = arith.constant 5 : i32
    %355 = arith.addf %354#1, %354#0 : vector<8x128xf32>
    %356 = vector.extract_strided_slice %355 {offsets = [0, 0], sizes = [8, 96], strides = [1, 1]} : vector<8x128xf32> to vector<8x96xf32>
    %357 = arith.negf %356 : vector<8x96xf32>
    %358 = math.exp %357 : vector<8x96xf32>
    %cst_107 = arith.constant 1.000000e+00 : f32
    %359 = vector.broadcast %cst_107 : f32 to vector<8x96xf32>
    %360 = arith.addf %359, %358 : vector<8x96xf32>
    %361 = arith.divf %359, %360 : vector<8x96xf32>
    %362 = vector.extract_strided_slice %355 {offsets = [0, 96], sizes = [8, 32], strides = [1, 1]} : vector<8x128xf32> to vector<8x32xf32>
    %363 = math.tanh %362 : vector<8x32xf32>
    %364 = vector.extract_strided_slice %361 {offsets = [0, 32], sizes = [8, 32], strides = [1, 1]} : vector<8x96xf32> to vector<8x32xf32>
    %365 = arith.mulf %364, %336 : vector<8x32xf32>
    %366 = vector.extract_strided_slice %361 {offsets = [0, 0], sizes = [8, 32], strides = [1, 1]} : vector<8x96xf32> to vector<8x32xf32>
    %367 = arith.mulf %366, %363 : vector<8x32xf32>
    %368 = arith.addf %365, %367 : vector<8x32xf32>
    %369 = vector.extract_strided_slice %361 {offsets = [0, 64], sizes = [8, 32], strides = [1, 1]} : vector<8x96xf32> to vector<8x32xf32>
    %370 = math.tanh %368 : vector<8x32xf32>
    %371 = arith.mulf %369, %370 : vector<8x32xf32>
    %c8_i32_108 = arith.constant 8 : i32
    %372 = arith.muli %c5_i32_106, %c8_i32_108 : i32
    %373 = tpu.assume_multiple %372, 8 : i32
    %374 = arith.index_cast %373 : i32 to index
    %c0_109 = arith.constant 0 : index
    %375 = vector.load %arg14[%374, %c0_109] : memref<64x32xf32, #tpu.memory_space<vmem>>, vector<8x32xf32>
    tpu.vector_store %arg14[%374, %c0_109], %371 {strides = array<i32>} : memref<64x32xf32, #tpu.memory_space<vmem>>, vector<8x32xf32>,
    %c8_i32_110 = arith.constant 8 : i32
    %376 = arith.muli %c5_i32_106, %c8_i32_110 : i32
    %377 = tpu.assume_multiple %376, 8 : i32
    %378 = arith.index_cast %377 : i32 to index
    %c0_111 = arith.constant 0 : index
    %379 = vector.load %arg13[%378, %c0_111] : memref<64x128xf32, #tpu.memory_space<vmem>>, vector<8x128xf32>
    %380 = arith.truncf %371 : vector<8x32xf32> to vector<8x32xbf16>
    %381 = arith.index_cast %c5_i32_106 : i32 to index
    %382 = memref.load %arg0[%381] : memref<8xi32, #tpu.memory_space<smem>>
    %c0_i32_112 = arith.constant 0 : i32
    %383 = arith.cmpi eq, %382, %c0_i32_112 : i32
    %384 = arith.extui %383 : i1 to i32
    %c0_i32_113 = arith.constant 0 : i32
    %385 = arith.cmpi ne, %384, %c0_i32_113 : i32
    %386:2 = scf.if %385 -> (vector<8x128xf32>, vector<8x128xf32>) {
      %cst_141 = arith.constant dense<0.000000e+00> : vector<8x256xf32>
      %460 = tpu.matmul %380, %19, %cst_141 {dimension_numbers = #tpu.dot_dimension_numbers<[1], [0], [0], [1], [0, 0, 1, 1], [], []>} : vector<8x32xbf16>, vector<32x256xbf16>, vector<8x256xf32> -> vector<8x256xf32>
      %461 = vector.extract_strided_slice %460 {offsets = [0, 0], sizes = [8, 128], strides = [1, 1]} : vector<8x256xf32> to vector<8x128xf32>
      %462 = vector.extract_strided_slice %460 {offsets = [0, 128], sizes = [8, 128], strides = [1, 1]} : vector<8x256xf32> to vector<8x128xf32>
      %463 = arith.addf %462, %35 : vector<8x128xf32>
      %cst_142 = arith.constant dense<0xFF800000> : vector<8xf32>
      %464 = vector.multi_reduction <maximumf>, %463, %cst_142 [1] : vector<8x128xf32> to vector<8xf32>
      %465 = vector.shape_cast %464 : vector<8xf32> to vector<8x1xf32>
      %466 = vector.broadcast %465 : vector<8x1xf32> to vector<8x128xf32>
      %467 = arith.cmpf oeq, %463, %466 : vector<8x128xf32>
      %c128_i32 = arith.constant 128 : i32
      %468 = vector.broadcast %c128_i32 : i32 to vector<8x128xi32>
      %469 = arith.select %467, %25, %468 : vector<8x128xi1>, vector<8x128xi32>
      %cst_143 = arith.constant dense<2147483647> : vector<8xi32>
      %470 = vector.multi_reduction <minsi>, %469, %cst_143 [1] : vector<8x128xi32> to vector<8xi32>
      %471 = vector.shape_cast %470 : vector<8xi32> to vector<8x1xi32>
      %472 = vector.broadcast %471 : vector<8x1xi32> to vector<8x64xi32>
      %473 = arith.cmpi eq, %26, %472 : vector<8x64xi32>
      %474 = arith.extui %473 : vector<8x64xi1> to vector<8x64xi32>
      %475 = arith.sitofp %474 : vector<8x64xi32> to vector<8x64xf32>
      %476 = arith.truncf %475 : vector<8x64xf32> to vector<8x64xbf16>
      %cst_144 = arith.constant dense<0.000000e+00> : vector<8x128xf32>
      %477 = tpu.matmul %476, %17, %cst_144 {dimension_numbers = #tpu.dot_dimension_numbers<[1], [0], [0], [1], [0, 0, 1, 1], [], []>} : vector<8x64xbf16>, vector<64x128xbf16>, vector<8x128xf32> -> vector<8x128xf32>
      %478 = arith.addf %477, %24 : vector<8x128xf32>
      scf.yield %461, %478 : vector<8x128xf32>, vector<8x128xf32>
    } else {
      %cst_141 = arith.constant dense<0.000000e+00> : vector<8x128xf32>
      %460 = tpu.matmul %380, %20, %cst_141 {dimension_numbers = #tpu.dot_dimension_numbers<[1], [0], [0], [1], [0, 0, 1, 1], [], []>} : vector<8x32xbf16>, vector<32x128xbf16>, vector<8x128xf32> -> vector<8x128xf32>
      scf.yield %460, %379 : vector<8x128xf32>, vector<8x128xf32>
    }
    %c6_i32_114 = arith.constant 6 : i32
    %387 = arith.addf %386#1, %386#0 : vector<8x128xf32>
    %388 = vector.extract_strided_slice %387 {offsets = [0, 0], sizes = [8, 96], strides = [1, 1]} : vector<8x128xf32> to vector<8x96xf32>
    %389 = arith.negf %388 : vector<8x96xf32>
    %390 = math.exp %389 : vector<8x96xf32>
    %cst_115 = arith.constant 1.000000e+00 : f32
    %391 = vector.broadcast %cst_115 : f32 to vector<8x96xf32>
    %392 = arith.addf %391, %390 : vector<8x96xf32>
    %393 = arith.divf %391, %392 : vector<8x96xf32>
    %394 = vector.extract_strided_slice %387 {offsets = [0, 96], sizes = [8, 32], strides = [1, 1]} : vector<8x128xf32> to vector<8x32xf32>
    %395 = math.tanh %394 : vector<8x32xf32>
    %396 = vector.extract_strided_slice %393 {offsets = [0, 32], sizes = [8, 32], strides = [1, 1]} : vector<8x96xf32> to vector<8x32xf32>
    %397 = arith.mulf %396, %368 : vector<8x32xf32>
    %398 = vector.extract_strided_slice %393 {offsets = [0, 0], sizes = [8, 32], strides = [1, 1]} : vector<8x96xf32> to vector<8x32xf32>
    %399 = arith.mulf %398, %395 : vector<8x32xf32>
    %400 = arith.addf %397, %399 : vector<8x32xf32>
    %401 = vector.extract_strided_slice %393 {offsets = [0, 64], sizes = [8, 32], strides = [1, 1]} : vector<8x96xf32> to vector<8x32xf32>
    %402 = math.tanh %400 : vector<8x32xf32>
    %403 = arith.mulf %401, %402 : vector<8x32xf32>
    %c8_i32_116 = arith.constant 8 : i32
    %404 = arith.muli %c6_i32_114, %c8_i32_116 : i32
    %405 = tpu.assume_multiple %404, 8 : i32
    %406 = arith.index_cast %405 : i32 to index
    %c0_117 = arith.constant 0 : index
    %407 = vector.load %arg14[%406, %c0_117] : memref<64x32xf32, #tpu.memory_space<vmem>>, vector<8x32xf32>
    tpu.vector_store %arg14[%406, %c0_117], %403 {strides = array<i32>} : memref<64x32xf32, #tpu.memory_space<vmem>>, vector<8x32xf32>,
    %c8_i32_118 = arith.constant 8 : i32
    %408 = arith.muli %c6_i32_114, %c8_i32_118 : i32
    %409 = tpu.assume_multiple %408, 8 : i32
    %410 = arith.index_cast %409 : i32 to index
    %c0_119 = arith.constant 0 : index
    %411 = vector.load %arg13[%410, %c0_119] : memref<64x128xf32, #tpu.memory_space<vmem>>, vector<8x128xf32>
    %412 = arith.truncf %403 : vector<8x32xf32> to vector<8x32xbf16>
    %413 = arith.index_cast %c6_i32_114 : i32 to index
    %414 = memref.load %arg0[%413] : memref<8xi32, #tpu.memory_space<smem>>
    %c0_i32_120 = arith.constant 0 : i32
    %415 = arith.cmpi eq, %414, %c0_i32_120 : i32
    %416 = arith.extui %415 : i1 to i32
    %c0_i32_121 = arith.constant 0 : i32
    %417 = arith.cmpi ne, %416, %c0_i32_121 : i32
    %418:2 = scf.if %417 -> (vector<8x128xf32>, vector<8x128xf32>) {
      %cst_141 = arith.constant dense<0.000000e+00> : vector<8x256xf32>
      %460 = tpu.matmul %412, %19, %cst_141 {dimension_numbers = #tpu.dot_dimension_numbers<[1], [0], [0], [1], [0, 0, 1, 1], [], []>} : vector<8x32xbf16>, vector<32x256xbf16>, vector<8x256xf32> -> vector<8x256xf32>
      %461 = vector.extract_strided_slice %460 {offsets = [0, 0], sizes = [8, 128], strides = [1, 1]} : vector<8x256xf32> to vector<8x128xf32>
      %462 = vector.extract_strided_slice %460 {offsets = [0, 128], sizes = [8, 128], strides = [1, 1]} : vector<8x256xf32> to vector<8x128xf32>
      %463 = arith.addf %462, %35 : vector<8x128xf32>
      %cst_142 = arith.constant dense<0xFF800000> : vector<8xf32>
      %464 = vector.multi_reduction <maximumf>, %463, %cst_142 [1] : vector<8x128xf32> to vector<8xf32>
      %465 = vector.shape_cast %464 : vector<8xf32> to vector<8x1xf32>
      %466 = vector.broadcast %465 : vector<8x1xf32> to vector<8x128xf32>
      %467 = arith.cmpf oeq, %463, %466 : vector<8x128xf32>
      %c128_i32 = arith.constant 128 : i32
      %468 = vector.broadcast %c128_i32 : i32 to vector<8x128xi32>
      %469 = arith.select %467, %25, %468 : vector<8x128xi1>, vector<8x128xi32>
      %cst_143 = arith.constant dense<2147483647> : vector<8xi32>
      %470 = vector.multi_reduction <minsi>, %469, %cst_143 [1] : vector<8x128xi32> to vector<8xi32>
      %471 = vector.shape_cast %470 : vector<8xi32> to vector<8x1xi32>
      %472 = vector.broadcast %471 : vector<8x1xi32> to vector<8x64xi32>
      %473 = arith.cmpi eq, %26, %472 : vector<8x64xi32>
      %474 = arith.extui %473 : vector<8x64xi1> to vector<8x64xi32>
      %475 = arith.sitofp %474 : vector<8x64xi32> to vector<8x64xf32>
      %476 = arith.truncf %475 : vector<8x64xf32> to vector<8x64xbf16>
      %cst_144 = arith.constant dense<0.000000e+00> : vector<8x128xf32>
      %477 = tpu.matmul %476, %17, %cst_144 {dimension_numbers = #tpu.dot_dimension_numbers<[1], [0], [0], [1], [0, 0, 1, 1], [], []>} : vector<8x64xbf16>, vector<64x128xbf16>, vector<8x128xf32> -> vector<8x128xf32>
      %478 = arith.addf %477, %24 : vector<8x128xf32>
      scf.yield %461, %478 : vector<8x128xf32>, vector<8x128xf32>
    } else {
      %cst_141 = arith.constant dense<0.000000e+00> : vector<8x128xf32>
      %460 = tpu.matmul %412, %20, %cst_141 {dimension_numbers = #tpu.dot_dimension_numbers<[1], [0], [0], [1], [0, 0, 1, 1], [], []>} : vector<8x32xbf16>, vector<32x128xbf16>, vector<8x128xf32> -> vector<8x128xf32>
      scf.yield %460, %411 : vector<8x128xf32>, vector<8x128xf32>
    }
    %c7_i32_122 = arith.constant 7 : i32
    %419 = arith.addf %418#1, %418#0 : vector<8x128xf32>
    %420 = vector.extract_strided_slice %419 {offsets = [0, 0], sizes = [8, 96], strides = [1, 1]} : vector<8x128xf32> to vector<8x96xf32>
    %421 = arith.negf %420 : vector<8x96xf32>
    %422 = math.exp %421 : vector<8x96xf32>
    %cst_123 = arith.constant 1.000000e+00 : f32
    %423 = vector.broadcast %cst_123 : f32 to vector<8x96xf32>
    %424 = arith.addf %423, %422 : vector<8x96xf32>
    %425 = arith.divf %423, %424 : vector<8x96xf32>
    %426 = vector.extract_strided_slice %419 {offsets = [0, 96], sizes = [8, 32], strides = [1, 1]} : vector<8x128xf32> to vector<8x32xf32>
    %427 = math.tanh %426 : vector<8x32xf32>
    %428 = vector.extract_strided_slice %425 {offsets = [0, 32], sizes = [8, 32], strides = [1, 1]} : vector<8x96xf32> to vector<8x32xf32>
    %429 = arith.mulf %428, %400 : vector<8x32xf32>
    %430 = vector.extract_strided_slice %425 {offsets = [0, 0], sizes = [8, 32], strides = [1, 1]} : vector<8x96xf32> to vector<8x32xf32>
    %431 = arith.mulf %430, %427 : vector<8x32xf32>
    %432 = arith.addf %429, %431 : vector<8x32xf32>
    %433 = vector.extract_strided_slice %425 {offsets = [0, 64], sizes = [8, 32], strides = [1, 1]} : vector<8x96xf32> to vector<8x32xf32>
    %434 = math.tanh %432 : vector<8x32xf32>
    %435 = arith.mulf %433, %434 : vector<8x32xf32>
    %c8_i32_124 = arith.constant 8 : i32
    %436 = arith.muli %c7_i32_122, %c8_i32_124 : i32
    %437 = tpu.assume_multiple %436, 8 : i32
    %438 = arith.index_cast %437 : i32 to index
    %c0_125 = arith.constant 0 : index
    %439 = vector.load %arg14[%438, %c0_125] : memref<64x32xf32, #tpu.memory_space<vmem>>, vector<8x32xf32>
    tpu.vector_store %arg14[%438, %c0_125], %435 {strides = array<i32>} : memref<64x32xf32, #tpu.memory_space<vmem>>, vector<8x32xf32>,
    %c8_i32_126 = arith.constant 8 : i32
    %440 = arith.muli %c7_i32_122, %c8_i32_126 : i32
    %441 = tpu.assume_multiple %440, 8 : i32
    %442 = arith.index_cast %441 : i32 to index
    %c0_127 = arith.constant 0 : index
    %443 = vector.load %arg13[%442, %c0_127] : memref<64x128xf32, #tpu.memory_space<vmem>>, vector<8x128xf32>
    %444 = arith.truncf %435 : vector<8x32xf32> to vector<8x32xbf16>
    %445 = arith.index_cast %c7_i32_122 : i32 to index
    %446 = memref.load %arg0[%445] : memref<8xi32, #tpu.memory_space<smem>>
    %c0_i32_128 = arith.constant 0 : i32
    %447 = arith.cmpi eq, %446, %c0_i32_128 : i32
    %448 = arith.extui %447 : i1 to i32
    %c0_i32_129 = arith.constant 0 : i32
    %449 = arith.cmpi ne, %448, %c0_i32_129 : i32
    %450:2 = scf.if %449 -> (vector<8x128xf32>, vector<8x128xf32>) {
      %cst_141 = arith.constant dense<0.000000e+00> : vector<8x256xf32>
      %460 = tpu.matmul %444, %19, %cst_141 {dimension_numbers = #tpu.dot_dimension_numbers<[1], [0], [0], [1], [0, 0, 1, 1], [], []>} : vector<8x32xbf16>, vector<32x256xbf16>, vector<8x256xf32> -> vector<8x256xf32>
      %461 = vector.extract_strided_slice %460 {offsets = [0, 0], sizes = [8, 128], strides = [1, 1]} : vector<8x256xf32> to vector<8x128xf32>
      %462 = vector.extract_strided_slice %460 {offsets = [0, 128], sizes = [8, 128], strides = [1, 1]} : vector<8x256xf32> to vector<8x128xf32>
      %463 = arith.addf %462, %35 : vector<8x128xf32>
      %cst_142 = arith.constant dense<0xFF800000> : vector<8xf32>
      %464 = vector.multi_reduction <maximumf>, %463, %cst_142 [1] : vector<8x128xf32> to vector<8xf32>
      %465 = vector.shape_cast %464 : vector<8xf32> to vector<8x1xf32>
      %466 = vector.broadcast %465 : vector<8x1xf32> to vector<8x128xf32>
      %467 = arith.cmpf oeq, %463, %466 : vector<8x128xf32>
      %c128_i32 = arith.constant 128 : i32
      %468 = vector.broadcast %c128_i32 : i32 to vector<8x128xi32>
      %469 = arith.select %467, %25, %468 : vector<8x128xi1>, vector<8x128xi32>
      %cst_143 = arith.constant dense<2147483647> : vector<8xi32>
      %470 = vector.multi_reduction <minsi>, %469, %cst_143 [1] : vector<8x128xi32> to vector<8xi32>
      %471 = vector.shape_cast %470 : vector<8xi32> to vector<8x1xi32>
      %472 = vector.broadcast %471 : vector<8x1xi32> to vector<8x64xi32>
      %473 = arith.cmpi eq, %26, %472 : vector<8x64xi32>
      %474 = arith.extui %473 : vector<8x64xi1> to vector<8x64xi32>
      %475 = arith.sitofp %474 : vector<8x64xi32> to vector<8x64xf32>
      %476 = arith.truncf %475 : vector<8x64xf32> to vector<8x64xbf16>
      %cst_144 = arith.constant dense<0.000000e+00> : vector<8x128xf32>
      %477 = tpu.matmul %476, %17, %cst_144 {dimension_numbers = #tpu.dot_dimension_numbers<[1], [0], [0], [1], [0, 0, 1, 1], [], []>} : vector<8x64xbf16>, vector<64x128xbf16>, vector<8x128xf32> -> vector<8x128xf32>
      %478 = arith.addf %477, %24 : vector<8x128xf32>
      scf.yield %461, %478 : vector<8x128xf32>, vector<8x128xf32>
    } else {
      %cst_141 = arith.constant dense<0.000000e+00> : vector<8x128xf32>
      %460 = tpu.matmul %444, %20, %cst_141 {dimension_numbers = #tpu.dot_dimension_numbers<[1], [0], [0], [1], [0, 0, 1, 1], [], []>} : vector<8x32xbf16>, vector<32x128xbf16>, vector<8x128xf32> -> vector<8x128xf32>
      scf.yield %460, %443 : vector<8x128xf32>, vector<8x128xf32>
    }
    %c7_i32_130 = arith.constant 7 : i32
    %c0_131 = arith.constant 0 : index
    %c0_132 = arith.constant 0 : index
    %451 = vector.load %arg14[%c0_131, %c0_132] : memref<64x32xf32, #tpu.memory_space<vmem>>, vector<64x32xf32>
    %452 = arith.truncf %451 : vector<64x32xf32> to vector<64x32xbf16>
    %cst_133 = arith.constant dense<0.000000e+00> : vector<64x128xf32>
    %453 = tpu.matmul %452, %21, %cst_133 {dimension_numbers = #tpu.dot_dimension_numbers<[1], [0], [0], [1], [0, 0, 1, 1], [], []>} : vector<64x32xbf16>, vector<32x128xbf16>, vector<64x128xf32> -> vector<64x128xf32>
    %c0_134 = arith.constant 0 : index
    %c0_135 = arith.constant 0 : index
    %454 = vector.load %arg10[%c0_134, %c0_135] : memref<1x128xf32, #tpu.memory_space<vmem>>, vector<1x128xf32>
    %455 = vector.broadcast %454 : vector<1x128xf32> to vector<64x128xf32>
    %456 = arith.addf %453, %455 : vector<64x128xf32>
    %c0_136 = arith.constant 0 : index
    %c0_137 = arith.constant 0 : index
    %457 = vector.load %arg11[%c0_136, %c0_137] : memref<64x128xf32, #tpu.memory_space<vmem>>, vector<64x128xf32>
    tpu.vector_store %arg11[%c0_136, %c0_137], %456 {strides = array<i32>} : memref<64x128xf32, #tpu.memory_space<vmem>>, vector<64x128xf32>,
    %cst_138 = arith.constant 0.000000e+00 : f32
    %458 = vector.broadcast %cst_138 : f32 to vector<8x128xf32>
    %c0_139 = arith.constant 0 : index
    %c0_140 = arith.constant 0 : index
    %459 = vector.load %arg11[%c0_139, %c0_140] : memref<64x128xf32, #tpu.memory_space<vmem>>, vector<8x128xf32>
    tpu.vector_store %arg11[%c0_139, %c0_140], %458 {strides = array<i32>} : memref<64x128xf32, #tpu.memory_space<vmem>>, vector<8x128xf32>,
    return
  }
}

</mosaic_0001>

<bundles_post_ra>
// kernel: seq2seq_forward.1
= control target key start
LH: loop header
LB: loop body
LE: loop exit
PB: predicated region body
PF: predicated region fallthrough
CT: control target
= control target key end

     0   :  { %16 = vsyncpa [#allocation6], 0  ;;  %s4467_s0 = inlined_call_operand.vmem [shape: s32[8], index: 0, kind: input, shape index: {}]   ;;  %s4468_s1 = inlined_call_operand.vmem [shape: bf16[64,32], index: 1, kind: input, shape index: {}]   ;;  %s4469_s2 = inlined_call_operand.vmem [shape: bf16[64,32], index: 2, kind: input, shape index: {}]   ;;  %s4470_s3 = inlined_call_operand.vmem [shape: bf16[64,32], index: 3, kind: input, shape index: {}]   ;;  %s4471_s4 = inlined_call_operand.vmem [shape: bf16[32,128], index: 4, kind: input, shape index: {}]   ;;  %s4472_s5 = inlined_call_operand.vmem [shape: bf16[32,128], index: 5, kind: input, shape index: {}]   ;;  %s4473_s6 = inlined_call_operand.vmem [shape: f32[1,128], index: 6, kind: input, shape index: {}]   ;;  %s4474_s7 = inlined_call_operand.vmem [shape: bf16[32,128], index: 7, kind: input, shape index: {}]   ;;  %s4475_s8 = inlined_call_operand.vmem [shape: f32[1,128], index: 8, kind: input, shape index: {}]   ;;  %s4476_s9 = inlined_call_operand.vmem [shape: bf16[32,256], index: 9, kind: input, shape index: {}]   ;;  %s4477_s10 = inlined_call_operand.vmem [shape: f32[1,128], index: 10, kind: input, shape index: {}]   ;;  %s4478_s11 = inlined_call_operand.vmem [shape: f32[64,128], index: 11, kind: output, shape index: {}]  }
   0x1   :  { %s23_s19 = sshll.u32 %s4467_s0, 4  ;;  %s24_s19 = int_to_ptr.vmem [resolvable:$true] %s23_s19 }
   0x2   :  { %s3508_s20 = scalar_lea.vmem %s24_s19, 16  ;;  %p3513_p1 = scmp.lt.s32.totalorder %s24_s19, %s24_s19 }
   0x3   :  { %p3509_p0 = scmp.ne.s32.totalorder %s24_s19, %s3508_s20  ;;  %p3514_p2 = scmp.lt.s32.totalorder %s3508_s20, %s3508_s20 }
   0x5   :  { %p3515_p3 = por %p3514_p2, %p3513_p1 }
   0x7   :  { %p3516_p4 = pnand %p3515_p3, %p3509_p0 }
   0x9   :  { %3519 = shalt.err (!%p3516_p4)
}
   0xa   :  { %s3714_s21 = smov [#allocation5]  }
   0xb   :  { %26 = dma.vmem_to_smem %s24_s19, 16, %s3714_s21, [#allocation6]  }
   0xc   :  { %3616 = dma.done.wait [#allocation6], 16  }
   0xd   :  { %3617 = vsyncadd [#allocation6], 4294967280 }
   0xe   :  { %50 = sfence }
   0xf   :  { %v3366_v0 = vld [vmem:[%s4474_s7] sm:$0xff]   ;;  %vm103_vm0 = vcmask 261120   ;;  %v473_v1 = vlaneseq  ;;  %v3367_v2 = vld [vmem:[%s4474_s7 + $0x8] sm:$0xff]   ;;  %v3715_v5 = vmov 0.0   ;;  %v3853_v8 = vld [vmem:[%s4476_s9 + $0x10] sm:$0xff]  ;;  %vm3717_vm2 = vmmov 0  }
  0x10   :  { %2893 = vmatprep.subr.bf16.mxu1 %v3366_v0  ;;  %v3368_v3 = vld [vmem:[%s4469_s2] sm:$0xff]   ;;  %1084 = vst.msk [vmem:[#allocation4] sm:$0xff] %vm103_vm0, %v3715_v5  ;;  %v3848_v7 = vld [vmem:[%s4476_s9 + $0x8] sm:$0xff]  ;;  %v3859_v9 = vld [vmem:[%s4476_s9 + $0x18] sm:$0xff]  ;;  %v3716_v12 = vmov -1e+09  }
  0x11   :  { %v3835_v4 = vand.u32 127, %v473_v1  ;;  %2894 = vmatpush3.bf16.msra.mxu1 %v3366_v0  ;;  %2897 = vmatprep.mubr.msk.bf16.mxu1 %vm103_vm0, %v3368_v3  ;;  %v3843_v6 = vld [vmem:[%s4476_s9] sm:$0xff]  ;;  %v3869_v11 = vld [vmem:[%s4476_s9 + $0xc] sm:$0xf]  ;;  %v3877_v15 = vld [vmem:[%s4476_s9 + $0x14] sm:$0xf] }
  0x12   :  { %2895 = vmatprep.subr.bf16.mxu1 %v3367_v2  ;;  %v3864_v10 = vld [vmem:[%s4476_s9 + $0x4] sm:$0xf]  ;;  %v3369_v14 = vld [vmem:[%s4469_s2 + $0x8] sm:$0xff]   ;;  %v3882_v16 = vld [vmem:[%s4476_s9 + $0x1c] sm:$0xf]  ;;  %v3718_v27 = vmov 0  }
  0x13   :  { %vm482_vm1 = vcmp.lt.s32.totalorder %v3835_v4, 32  ;;  %v2687_v17 = vld [vmem:[%s4477_s10] ss:$0 sm:$0xff]  ;;  %v3372_v21 = vld [vmem:[%s4471_s4 + $0x8] sm:$0xff]   ;;  %v3373_v22 = vld [vmem:[%s4469_s2 + $0x10] sm:$0xff]   ;;  %s3720_s0 = smov 64  }
  0x14   :  { %v483_v13 = vsel %vm482_vm1, 0.0, %v3716_v12  ;;  %v3893_v19 = vld [vmem:[%s4472_s5] sm:$0xff]   ;;  %v3374_v23 = vld [vmem:[%s4469_s2 + $0x18] sm:$0xff]   ;;  %v3914_v24 = vld [vmem:[%s4472_s5 + $0x8] sm:$0xff]  }
  0x15   :  { %2896 = vmatpush3.bf16.msra.mxu1 %v3367_v2  ;;  %v3887_v18 = vadd.f32 %v2687_v17, %v483_v13  ;;  %v3371_v20 = vld [vmem:[%s4471_s4] sm:$0xff]   ;;  %v3377_v26 = vld [vmem:[%s4468_s1 + $0x8] sm:$0xff]  }
  0x16   :  { %2917 = vmatprep.subr.bf16.mxu1 %v3715_v5  ;;  %2881 = vmatprep.subr.bf16.mxu0 %v3371_v20  ;;  %v3376_v25 = vld [vmem:[%s4468_s1] sm:$0xff]  }
  0x17   :  { %2882 = vmatpush3.bf16.msra.mxu0 %v3371_v20  ;;  %2885 = vmatprep.mubr.msk.bf16.mxu0 %vm103_vm0, %v3376_v25  ;;  %v3938_v28 = vld [vmem:[%s4475_s8] ss:$0 sm:$0xff] }
  0x18   :  { %2898 = vmatmul.mubr.msk.bf16.vlgmr.msra.gmra.mrb[0].mxu1 %vm103_vm0, %v3369_v14  ;;  %2883 = vmatprep.subr.bf16.mxu0 %v3372_v21  ;;  %v3955_v43 = vld [vmem:[%s4473_s6] ss:$0 sm:$0xff]  ;;  %s3719_s6 = smov 32  }
  0x19   :  { %2918 = vmatpush3.bf16.msra.mxu1 %v3893_v19  ;;  %2901 = vmatprep.mubr.msk.bf16.mxu1 %vm103_vm0, %v3373_v22 }
  0x1a   :  { %2919 = vmatprep.subr.bf16.mxu1 %v3715_v5 }
  0x1b   :  { %2884 = vmatpush3.bf16.msra.mxu0 %v3372_v21 }
  0x1d   :  { %2920 = vmatpush3.bf16.msra.mxu1 %v3914_v24 }
  0x1e   :  { %2925 = vmatprep.subr.bf16.mxu1 %v3715_v5  ;;  %2886 = vmatmul.mubr.msk.bf16.vlgmr.msra.gmra.mrb[0].mxu0 %vm103_vm0, %v3377_v26 }
  0x20   :  { %2902 = vmatmul.mubr.msk.bf16.gmra.mrb[4].mxu1 %vm103_vm0, %v3374_v23 }
  0x21   :  { %2921 = vmatprep.mubr.msk.bf16.mxu1 %vm3717_vm2, %v3715_v5 }
  0x28   :  { %2922 = vmatmul.mubr.bf16.vlgmr.msra.gmra.mrb[8].mxu1 %v3718_v27 }
  0x29   :  { %2926 = vmatpush3.bf16.msra.mxu1 %v3893_v19  ;;  %2929 = vmatprep.mubr.msk.bf16.mxu1 %vm3717_vm2, %v3715_v5 }
  0x2a   :  { %2927 = vmatprep.subr.bf16.mxu1 %v3715_v5 }
  0x2d   :  { %2928 = vmatpush3.bf16.msra.mxu1 %v3914_v24 }
  0x2e   :  { %2941 = vmatprep.subr.bf16.mxu1 %v3715_v5 }
  0xeb   :  { %v2899_v29 = vpop.f32.mrb[0].mxu1 }
  0xec   :  { %v295_v30 = vadd.f32 %v2899_v29, %v3938_v28  ;;  %v286_v31 = vpop.f32.mrb[1].mxu1 }
  0xed   :  { %v3942_v32 = vadd.f32 %v3938_v28, %v286_v31  ;;  %v2900_v33 = vpop.f32.mrb[2].mxu1 }
  0xee   :  { %319 = vst [vmem:[#allocation3 + $0x10] sm:$0xff] %v295_v30  ;;  %v298_v34 = vadd.f32 %v2900_v33, %v3938_v28  ;;  %v289_v35 = vpop.f32.mrb[3].mxu1 }
  0xef   :  { %v3946_v36 = vadd.f32 %v3938_v28, %v289_v35  }
  0xf0   :  { %320 = vst [vmem:[#allocation3 + $0x18] sm:$0xff] %v298_v34 }
  0xf1   :  { %v3949_v40 = vpop.f32.mrb[0].mxu0 }
  0xf2   :  { %v150_v44 = vpop.f32.mrb[1].mxu0 }
  0xf3   :  { %v2903_v37 = vpop.f32.mrb[4].mxu1  ;;  %v3957_v46 = vpop.f32.mrb[2].mxu0  ;;  %v151_v49 = vadd.f32 %v3955_v43, %v150_v44  ;;  %v3382_v44 = vld [vmem:[%s4470_s3] sm:$0xff]  }
  0xf4   :  { %v311_v38 = vadd.f32 %v2903_v37, %v3938_v28  ;;  %v302_v39 = vpop.f32.mrb[5].mxu1  ;;  %v153_v48 = vpop.f32.mrb[3].mxu0 }
  0xf5   :  { %v303_v41 = vadd.f32 %v3938_v28, %v302_v39  ;;  %v2904_v42 = vpop.f32.mrb[6].mxu1  ;;  %v154_v14 = vadd.f32 %v3955_v43, %v153_v48  ;;  %v3379_v39 = vld [vmem:[%s4468_s1 + $0x10] sm:$0xff]  }
  0xf6   :  { %323 = vst [vmem:[#allocation3 + $0x30] sm:$0xff] %v311_v38  ;;  %v305_v45 = vpop.f32.mrb[7].mxu1  ;;  %v3378_v38 = vld [vmem:[%s4474_s7] sm:$0xff]   ;;  %v3381_v42 = vld [vmem:[%s4474_s7 + $0x8] sm:$0xff]   ;;  %2889 = vmatprep.mubr.msk.bf16.mxu0 %vm103_vm0, %v3379_v39  ;;  %v3384_v48 = vld [vmem:[%s4470_s3 + $0x10] sm:$0xff]  }
  0xf7   :  { %321 = vst [vmem:[#allocation3 + $0x20] sm:$0xff] %v303_v41  ;;  %v306_v47 = vadd.f32 %v3938_v28, %v305_v45  ;;  %v3380_v41 = vld [vmem:[%s4468_s1 + $0x18] sm:$0xff]   ;;  %2905 = vmatprep.subr.bf16.mxu0 %v3378_v38 }
  0xf8   :  { %2906 = vmatpush3.bf16.msra.mxu0 %v3378_v38 }
  0xf9   :  { %322 = vst [vmem:[#allocation3 + $0x28] sm:$0xff] %v306_v47  ;;  %2890 = vmatmul.mubr.msk.bf16.gmra.mrb[4].mxu0 %vm103_vm0, %v3380_v41  ;;  %2907 = vmatprep.subr.bf16.mxu0 %v3381_v42  ;;  %v3383_v47 = vld [vmem:[%s4470_s3 + $0x8] sm:$0xff]  }
  0xfa   :  { %2909 = vmatprep.mubr.msk.bf16.mxu0 %vm103_vm0, %v3382_v44 }
  0xfb   :  { %v535_v50 = vpop.f32.mrb[8].mxu1 }
  0xfc   :  { %v541_v51 = vadd.f32 %v535_v50, %v151_v49  ;;  %v2923_v52 = vpop.f32.mrb[9].mxu1  ;;  %2908 = vmatpush3.bf16.msra.mxu0 %v3381_v42  ;;  %v3385_v49 = vld [vmem:[%s4470_s3 + $0x18] sm:$0xff]  }
  0xfd   :  { %v538_v53 = vpop.f32.mrb[10].mxu1  ;;  %2933 = vmatprep.subr.bf16.mxu0 %v3715_v5 }
  0xfe   :  { %3388 = vtanh.f32 %v541_v51  ;;  %v2924_v54 = vpop.f32.mrb[11].mxu1  ;;  %v2690_v56 = vmul.f32 -1.442695, %v541_v51 }
 0x100   :  { %3390 = vpow2.f32 %v2690_v56 }
 0x101   :  { %2910 = vmatmul.mubr.msk.bf16.vlgmr.msra.gmra.mrb[8].mxu0 %vm103_vm0, %v3383_v47 }
 0x102   :  { %2934 = vmatpush3.bf16.msra.mxu0 %v3893_v19  ;;  %2913 = vmatprep.mubr.msk.bf16.mxu0 %vm103_vm0, %v3384_v48 }
 0x103   :  { %2935 = vmatprep.subr.bf16.mxu0 %v3715_v5 }
 0x106   :  { %2936 = vmatpush3.bf16.msra.mxu0 %v3914_v24 }
 0x107   :  { %2949 = vmatprep.subr.bf16.mxu0 %v3715_v5 }
 0x108   :  { %v3389_v55 = vpop.eup %3388 }
 0x109   :  { %551 = vrot.lane.b32.xlu0 %v3389_v55, %s3719_s6  ;;  %2914 = vmatmul.mubr.msk.bf16.gmra.mrb[12].mxu0 %vm103_vm0, %v3385_v49 }
 0x10a   :  { %v3391_v57 = vpop.eup %3390  ;;  %2937 = vmatprep.mubr.msk.bf16.mxu0 %vm3717_vm2, %v3715_v5 }
 0x10b   :  { %v545_v58 = vadd.f32 1.0, %v3391_v57 }
 0x10d   :  { %3392 = vrcp.f32 %v545_v58 }
 0x117   :  { %v3393_v59 = vpop.eup %3392 }
 0x118   :  { %v549_v62 = vmul.f32 0.0, %v3393_v59 }
 0x17b   :  { %v552_v60 = vpop.permute.xlu0 %551 }
 0x17c   :  { %v554_v61 = vmul.f32 %v3393_v59, %v552_v60 }
 0x17e   :  { %556 = vrot.lane.b32.xlu0 %v554_v61, %s3719_s6 }
 0x1cc   :  { %v4017_v53 = vpop.f32.mrb[4].mxu0 }
 0x1cd   :  { %v4019_v54 = vpop.f32.mrb[5].mxu0 }
 0x1ce   :  { %v4021_v55 = vpop.f32.mrb[6].mxu0 }
 0x1cf   :  { %v4023_v56 = vpop.f32.mrb[7].mxu0 }
 0x1d4   :  { %v2911_v57 = vpop.f32.mrb[8].mxu0 }
 0x1d5   :  { %v415_v58 = vpop.f32.mrb[9].mxu0 }
 0x1f0   :  { %v557_v63 = vpop.permute.xlu0 %556 }
 0x1f1   :  { %v559_v0 = vadd.f32 %v557_v63, %v549_v62 }
 0x1f3   :  { %3394 = vtanh.f32 %v559_v0 }
 0x1fd   :  { %v3395_v1 = vpop.eup %3394 }
 0x1fe   :  { %562 = vrot.lane.b32.xlu1 %v3395_v1, %s3719_s6 }
 0x270   :  { %v563_v2 = vpop.permute.xlu1 %562 }
 0x271   :  { %v565_v3 = vmul.f32 %v3393_v59, %v563_v2  ;;  %v2912_v59 = vpop.f32.mrb[10].mxu0 }
 0x272   :  { %v4025_v60 = vpack.c.bf16 %v2912_v59, %v2911_v57  ;;  %v418_v61 = vpop.f32.mrb[11].mxu0 }
 0x273   :  { %v568_v12 = vpack.c.bf16 %v565_v3, %v565_v3  ;;  %v4027_v62 = vpack.c.bf16 %v418_v61, %v415_v58  ;;  %v2915_v63 = vpop.f32.mrb[12].mxu0 }
 0x275   :  { %570 = vrot.lane.b32.xlu1 %v568_v12, %s3720_s0 }
 0x2e7   :  { %v571_v13 = vpop.permute.xlu1 %570 }
 0x2e8   :  { %2930 = vmatmul.mubr.msk.bf16.vlgmr.msra.gmra.mrb[12].mxu1 %vm103_vm0, %v571_v13 }
 0x2e9   :  { %2942 = vmatpush3.bf16.msra.mxu1 %v3893_v19  ;;  %2945 = vmatprep.mubr.msk.bf16.mxu1 %vm3717_vm2, %v3715_v5 }
 0x2ea   :  { %2943 = vmatprep.subr.bf16.mxu1 %v3715_v5 }
 0x2ed   :  { %2944 = vmatpush3.bf16.msra.mxu1 %v3914_v24 }
 0x2ee   :  { %2957 = vmatprep.subr.bf16.mxu1 %v3715_v5 }
 0x3bb   :  { %v609_v17 = vpop.f32.mrb[12].mxu1 }
 0x3bc   :  { %v615_v20 = vadd.f32 %v609_v17, %v154_v14  ;;  %v2931_v21 = vpop.f32.mrb[13].mxu1  ;;  %v159_v14 = vadd.f32 %v3949_v40, %v3955_v43 }
 0x3bd   :  { %v612_v22 = vpop.f32.mrb[14].mxu1 }
 0x3be   :  { %3396 = vtanh.f32 %v615_v20  ;;  %v2932_v23 = vpop.f32.mrb[15].mxu1  ;;  %v2692_v26 = vmul.f32 -1.442695, %v615_v20 }
 0x3c0   :  { %3398 = vpow2.f32 %v2692_v26 }
 0x3c8   :  { %v3397_v25 = vpop.eup %3396 }
 0x3c9   :  { %625 = vrot.lane.b32.xlu0 %v3397_v25, %s3719_s6 }
 0x3ca   :  { %v3399_v27 = vpop.eup %3398 }
 0x3cb   :  { %v619_v29 = vadd.f32 1.0, %v3399_v27 }
 0x3cd   :  { %3400 = vrcp.f32 %v619_v29 }
 0x3d7   :  { %v3401_v30 = vpop.eup %3400 }
 0x3d8   :  { %v623_v34 = vmul.f32 %v3401_v30, %v559_v0  ;;  %v431_v0 = vpop.f32.mrb[13].mxu0 }
 0x3d9   :  { %v2916_v1 = vpop.f32.mrb[14].mxu0 }
 0x3da   :  { %v4029_v2 = vpack.c.bf16 %v2916_v1, %v2915_v63  ;;  %v434_v3 = vpop.f32.mrb[15].mxu0 }
 0x3db   :  { %v4031_v12 = vpack.c.bf16 %v434_v3, %v431_v0 }
 0x43b   :  { %v626_v31 = vpop.permute.xlu0 %625 }
 0x43c   :  { %v628_v33 = vmul.f32 %v3401_v30, %v626_v31 }
 0x43e   :  { %630 = vrot.lane.b32.xlu1 %v628_v33, %s3719_s6 }
 0x4b0   :  { %v631_v35 = vpop.permute.xlu1 %630 }
 0x4b1   :  { %v3975_v37 = vadd.f32 %v631_v35, %v623_v34 }
 0x4b3   :  { %3402 = vtanh.f32 %v3975_v37 }
 0x4bd   :  { %v3403_v45 = vpop.eup %3402 }
 0x4be   :  { %636 = vrot.lane.b32.xlu0 %v3403_v45, %s3719_s6 }
 0x530   :  { %v637_v50 = vpop.permute.xlu0 %636 }
 0x531   :  { %v639_v51 = vmul.f32 %v3401_v30, %v637_v50 }
 0x533   :  { %v642_v52 = vpack.c.bf16 %v639_v51, %v639_v51 }
 0x535   :  { %644 = vrot.lane.b32.xlu1 %v642_v52, %s3720_s0 }
 0x5a7   :  { %v645_v13 = vpop.permute.xlu1 %644 }
 0x5a8   :  { %2938 = vmatmul.mubr.msk.bf16.vlgmr.msra.gmra.mrb[16].mxu0 %vm103_vm0, %v645_v13 }
 0x5a9   :  { %2950 = vmatpush3.bf16.msra.mxu0 %v3893_v19  ;;  %2953 = vmatprep.mubr.msk.bf16.mxu0 %vm3717_vm2, %v3715_v5 }
 0x5aa   :  { %2951 = vmatprep.subr.bf16.mxu0 %v3715_v5 }
 0x5ad   :  { %2952 = vmatpush3.bf16.msra.mxu0 %v3914_v24 }
 0x5ae   :  { %2965 = vmatprep.subr.bf16.mxu0 %v3715_v5 }
 0x67b   :  { %v683_v17 = vpop.f32.mrb[16].mxu0 }
 0x67c   :  { %v689_v20 = vadd.f32 %v683_v17, %v159_v14  ;;  %v2939_v21 = vpop.f32.mrb[17].mxu0 }
 0x67d   :  { %v686_v22 = vpop.f32.mrb[18].mxu0  ;;  %v167_v21 = vadd.f32 %v3955_v43, %v4019_v54 }
 0x67e   :  { %3404 = vtanh.f32 %v689_v20  ;;  %v2940_v23 = vpop.f32.mrb[19].mxu0  ;;  %v2694_v26 = vmul.f32 -1.442695, %v689_v20 }
 0x680   :  { %3406 = vpow2.f32 %v2694_v26 }
 0x688   :  { %v3405_v25 = vpop.eup %3404 }
 0x689   :  { %699 = vrot.lane.b32.xlu0 %v3405_v25, %s3719_s6 }
 0x68a   :  { %v3407_v27 = vpop.eup %3406 }
 0x68b   :  { %v693_v29 = vadd.f32 1.0, %v3407_v27 }
 0x68d   :  { %3408 = vrcp.f32 %v693_v29 }
 0x697   :  { %v3409_v30 = vpop.eup %3408 }
 0x698   :  { %v697_v40 = vmul.f32 %v3409_v30, %v3975_v37  ;;  %v162_v37 = vadd.f32 %v3957_v46, %v3955_v43 }
 0x6fb   :  { %v700_v31 = vpop.permute.xlu0 %699 }
 0x6fc   :  { %v702_v33 = vmul.f32 %v3409_v30, %v700_v31 }
 0x6fe   :  { %704 = vrot.lane.b32.xlu1 %v702_v33, %s3719_s6 }
 0x770   :  { %v705_v34 = vpop.permute.xlu1 %704 }
 0x771   :  { %v707_v35 = vadd.f32 %v705_v34, %v697_v40 }
 0x773   :  { %3410 = vtanh.f32 %v707_v35 }
 0x77d   :  { %v3411_v38 = vpop.eup %3410 }
 0x77e   :  { %710 = vrot.lane.b32.xlu0 %v3411_v38, %s3719_s6 }
 0x7f0   :  { %v711_v39 = vpop.permute.xlu0 %710 }
 0x7f1   :  { %v713_v41 = vmul.f32 %v3409_v30, %v711_v39 }
 0x7f3   :  { %v716_v42 = vpack.c.bf16 %v713_v41, %v713_v41 }
 0x7f5   :  { %718 = vrot.lane.b32.xlu1 %v716_v42, %s3720_s0 }
 0x867   :  { %v719_v44 = vpop.permute.xlu1 %718 }
 0x868   :  { %2946 = vmatmul.mubr.msk.bf16.vlgmr.msra.gmra.mrb[16].mxu1 %vm103_vm0, %v719_v44 }
 0x869   :  { %2958 = vmatpush3.bf16.msra.mxu1 %v3893_v19  ;;  %2961 = vmatprep.mubr.msk.bf16.mxu1 %vm3717_vm2, %v3715_v5 }
 0x86a   :  { %2959 = vmatprep.subr.bf16.mxu1 %v3715_v5 }
 0x86d   :  { %2960 = vmatpush3.bf16.msra.mxu1 %v3914_v24 }
 0x86e   :  { %2973 = vmatprep.subr.bf16.mxu1 %v3715_v5 }
 0x93b   :  { %v757_v45 = vpop.f32.mrb[16].mxu1 }
 0x93c   :  { %v763_v47 = vadd.f32 %v757_v45, %v162_v37  ;;  %v2947_v48 = vpop.f32.mrb[17].mxu1 }
 0x93d   :  { %v760_v49 = vpop.f32.mrb[18].mxu1 }
 0x93e   :  { %3412 = vtanh.f32 %v763_v47  ;;  %v2948_v50 = vpop.f32.mrb[19].mxu1  ;;  %v2696_v52 = vmul.f32 -1.442695, %v763_v47  ;;  %v170_v47 = vadd.f32 %v3955_v43, %v4023_v56 }
 0x940   :  { %3414 = vpow2.f32 %v2696_v52 }
 0x948   :  { %v3413_v51 = vpop.eup %3412 }
 0x949   :  { %773 = vrot.lane.b32.xlu0 %v3413_v51, %s3719_s6 }
 0x94a   :  { %v3415_v57 = vpop.eup %3414 }
 0x94b   :  { %v767_v58 = vadd.f32 1.0, %v3415_v57 }
 0x94d   :  { %3416 = vrcp.f32 %v767_v58 }
 0x957   :  { %v3417_v59 = vpop.eup %3416 }
 0x958   :  { %v771_v46 = vmul.f32 %v3417_v59, %v707_v35 }
 0x9bb   :  { %v774_v61 = vpop.permute.xlu0 %773 }
 0x9bc   :  { %v776_v63 = vmul.f32 %v3417_v59, %v774_v61 }
 0x9be   :  { %778 = vrot.lane.b32.xlu1 %v776_v63, %s3719_s6 }
 0xa30   :  { %v779_v0 = vpop.permute.xlu1 %778 }
 0xa31   :  { %v781_v1 = vadd.f32 %v779_v0, %v771_v46 }
 0xa33   :  { %3418 = vtanh.f32 %v781_v1 }
 0xa3d   :  { %v3419_v3 = vpop.eup %3418 }
 0xa3e   :  { %784 = vrot.lane.b32.xlu0 %v3419_v3, %s3719_s6 }
 0xab0   :  { %v785_v13 = vpop.permute.xlu0 %784 }
 0xab1   :  { %v787_v14 = vmul.f32 %v3417_v59, %v785_v13 }
 0xab3   :  { %v790_v17 = vpack.c.bf16 %v787_v14, %v787_v14 }
 0xab5   :  { %792 = vrot.lane.b32.xlu1 %v790_v17, %s3720_s0 }
 0xb27   :  { %v793_v20 = vpop.permute.xlu1 %792 }
 0xb28   :  { %2954 = vmatmul.mubr.msk.bf16.vlgmr.msra.gmra.mrb[20].mxu0 %vm103_vm0, %v793_v20  ;;  %v175_v20 = vadd.f32 %v4017_v53, %v3955_v43 }
 0xb29   :  { %2966 = vmatpush3.bf16.msra.mxu0 %v3893_v19  ;;  %2969 = vmatprep.mubr.msk.bf16.mxu0 %vm3717_vm2, %v3715_v5 }
 0xb2a   :  { %2967 = vmatprep.subr.bf16.mxu0 %v3715_v5 }
 0xb2d   :  { %2968 = vmatpush3.bf16.msra.mxu0 %v3914_v24 }
 0xb2e   :  { %2981 = vmatprep.subr.bf16.mxu0 %v3715_v5 }
 0xbfb   :  { %v831_v22 = vpop.f32.mrb[20].mxu0 }
 0xbfc   :  { %v837_v23 = vadd.f32 %v831_v22, %v167_v21  ;;  %v2955_v25 = vpop.f32.mrb[21].mxu0 }
 0xbfd   :  { %v834_v26 = vpop.f32.mrb[22].mxu0 }
 0xbfe   :  { %3420 = vtanh.f32 %v837_v23  ;;  %v2956_v27 = vpop.f32.mrb[23].mxu0  ;;  %v2698_v30 = vmul.f32 -1.442695, %v837_v23 }
 0xc00   :  { %3422 = vpow2.f32 %v2698_v30 }
 0xc08   :  { %v3421_v29 = vpop.eup %3420 }
 0xc09   :  { %847 = vrot.lane.b32.xlu0 %v3421_v29, %s3719_s6 }
 0xc0a   :  { %v3423_v31 = vpop.eup %3422 }
 0xc0b   :  { %v841_v33 = vadd.f32 1.0, %v3423_v31 }
 0xc0d   :  { %3424 = vrcp.f32 %v841_v33 }
 0xc17   :  { %v3425_v40 = vpop.eup %3424 }
 0xc18   :  { %v845_v54 = vmul.f32 %v3425_v40, %v781_v1 }
 0xc7b   :  { %v848_v34 = vpop.permute.xlu0 %847 }
 0xc7c   :  { %v850_v35 = vmul.f32 %v3425_v40, %v848_v34 }
 0xc7e   :  { %852 = vrot.lane.b32.xlu1 %v850_v35, %s3719_s6 }
 0xcf0   :  { %v853_v38 = vpop.permute.xlu1 %852 }
 0xcf1   :  { %v855_v39 = vadd.f32 %v853_v38, %v845_v54 }
 0xcf3   :  { %3426 = vtanh.f32 %v855_v39 }
 0xcfd   :  { %v3427_v41 = vpop.eup %3426 }
 0xcfe   :  { %858 = vrot.lane.b32.xlu0 %v3427_v41, %s3719_s6 }
 0xd70   :  { %v859_v42 = vpop.permute.xlu0 %858 }
 0xd71   :  { %v861_v44 = vmul.f32 %v3425_v40, %v859_v42 }
 0xd73   :  { %v864_v37 = vpack.c.bf16 %v861_v44, %v861_v44 }
 0xd75   :  { %866 = vrot.lane.b32.xlu1 %v864_v37, %s3720_s0  ;;  %v178_v37 = vadd.f32 %v4021_v55, %v3955_v43 }
 0xde7   :  { %v867_v45 = vpop.permute.xlu1 %866 }
 0xde8   :  { %2962 = vmatmul.mubr.msk.bf16.vlgmr.msra.gmra.mrb[20].mxu1 %vm103_vm0, %v867_v45 }
 0xde9   :  { %2974 = vmatpush3.bf16.msra.mxu1 %v3893_v19  ;;  %2977 = vmatprep.mubr.msk.bf16.mxu1 %vm3717_vm2, %v3715_v5 }
 0xdea   :  { %2975 = vmatprep.subr.bf16.mxu1 %v3715_v5 }
 0xded   :  { %2976 = vmatpush3.bf16.msra.mxu1 %v3914_v24 }
 0xebb   :  { %v905_v48 = vpop.f32.mrb[20].mxu1 }
 0xebc   :  { %v911_v49 = vadd.f32 %v905_v48, %v170_v47  ;;  %v2963_v50 = vpop.f32.mrb[21].mxu1 }
 0xebd   :  { %v908_v51 = vpop.f32.mrb[22].mxu1 }
 0xebe   :  { %3428 = vtanh.f32 %v911_v49  ;;  %v2964_v52 = vpop.f32.mrb[23].mxu1  ;;  %v2700_v19 = vmul.f32 -1.442695, %v911_v49 }
 0xec0   :  { %3430 = vpow2.f32 %v2700_v19 }
 0xec8   :  { %v3429_v57 = vpop.eup %3428 }
 0xec9   :  { %921 = vrot.lane.b32.xlu0 %v3429_v57, %s3719_s6 }
 0xeca   :  { %v3431_v58 = vpop.eup %3430 }
 0xecb   :  { %v915_v59 = vadd.f32 1.0, %v3431_v58 }
 0xecd   :  { %3432 = vrcp.f32 %v915_v59 }
 0xed7   :  { %v3433_v61 = vpop.eup %3432 }
 0xed8   :  { %v919_v56 = vmul.f32 %v3433_v61, %v855_v39 }
 0xf3b   :  { %v922_v63 = vpop.permute.xlu0 %921 }
 0xf3c   :  { %v924_v24 = vmul.f32 %v3433_v61, %v922_v63 }
 0xf3e   :  { %926 = vrot.lane.b32.xlu1 %v924_v24, %s3719_s6  ;;  %v4102_v24 = vld [vmem:[%s4476_s9] ss:$8 sps:$4 sm:$0xff]  }
 0xfb0   :  { %v927_v46 = vpop.permute.xlu1 %926 }
 0xfb1   :  { %v929_v0 = vadd.f32 %v927_v46, %v919_v56  ;;  %v4108_v56 = vld [vmem:[%s4476_s9 + $0x10] ss:$8 sps:$4 sm:$0xff]   ;;  %s4122_s9 = sld [smem:[#allocation5 + $0x1]] }
 0xfb3   :  { %3434 = vtanh.f32 %v929_v0 }
 0xfb7   :  { %p1180_p5 = scmp.eq.s32.totalorder %s4122_s9, 0  ;;  %p2710_p6 = scmp.ne.s32.totalorder %s4122_s9, 0 }
 0xfb8   :  { %s3721_s21 = smov (!%p2710_p6), 64   ;;  %vm3724_vm5 = vmmov (!%p2710_p6), 0   ;;  %vm1274_vm7 = vcmask (!%p2710_p6), 523264  }
 0xfbd   :  { %v3435_v1 = vpop.eup %3434 }
 0xfbe   :  { %932 = vrot.lane.b32.xlu0 %v3435_v1, %s3719_s6 }
0x1030   :  { %v933_v3 = vpop.permute.xlu0 %932 }
0x1031   :  { %v935_v13 = vmul.f32 %v3433_v61, %v933_v3 }
0x1033   :  { %v938_v14 = vpack.c.bf16 %v935_v13, %v935_v13 }
0x1035   :  { %940 = vrot.lane.b32.xlu1 %v938_v14, %s3720_s0 }
0x10a7   :  { %v941_v17 = vpop.permute.xlu1 %940 }
0x10a8   :  { %2970 = vmatmul.mubr.msk.bf16.vlgmr.msra.gmra.mrb[24].mxu0 %vm103_vm0, %v941_v17 }
0x10a9   :  { %2985 = vmatprep.mubr.msk.bf16.mxu0 %vm3717_vm2, %v3715_v5  ;;  %2982 = vmatpush3.bf16.msra.mxu0 %v4102_v24 }
0x10aa   :  { %2983 = vmatprep.subr.bf16.mxu0 %v3715_v5 }
0x10ad   :  { %2984 = vmatpush3.bf16.msra.mxu0 %v4108_v56 }
0x117b   :  { %v979_v21 = vpop.f32.mrb[24].mxu0 }
0x117c   :  { %v985_v22 = vadd.f32 %v979_v21, %v175_v20  ;;  %v2971_v23 = vpop.f32.mrb[25].mxu0 }
0x117d   :  { %v982_v25 = vpop.f32.mrb[26].mxu0 }
0x117e   :  { %3436 = vtanh.f32 %v985_v22  ;;  %v2972_v26 = vpop.f32.mrb[27].mxu0  ;;  %v2702_v29 = vmul.f32 -1.442695, %v985_v22 }
0x1180   :  { %3438 = vpow2.f32 %v2702_v29 }
0x1188   :  { %v3437_v27 = vpop.eup %3436 }
0x1189   :  { %995 = vrot.lane.b32.xlu0 %v3437_v27, %s3719_s6 }
0x118a   :  { %v3439_v30 = vpop.eup %3438 }
0x118b   :  { %v989_v31 = vadd.f32 1.0, %v3439_v30 }
0x118d   :  { %3440 = vrcp.f32 %v989_v31 }
0x1197   :  { %v3441_v33 = vpop.eup %3440 }
0x1198   :  { %v993_v53 = vmul.f32 %v3441_v33, %v929_v0 }
0x11fb   :  { %v996_v40 = vpop.permute.xlu0 %995 }
0x11fc   :  { %v998_v34 = vmul.f32 %v3441_v33, %v996_v40 }
0x11fe   :  { %1000 = vrot.lane.b32.xlu1 %v998_v34, %s3719_s6 }
0x1270   :  { %v1001_v35 = vpop.permute.xlu1 %1000 }
0x1271   :  { %v1003_v54 = vadd.f32 %v1001_v35, %v993_v53 }
0x1273   :  { %3442 = vtanh.f32 %v1003_v54 }
0x127d   :  { %v3443_v38 = vpop.eup %3442 }
0x127e   :  { %1006 = vrot.lane.b32.xlu0 %v3443_v38, %s3719_s6 }
0x12f0   :  { %v1007_v39 = vpop.permute.xlu0 %1006 }
0x12f1   :  { %v1009_v41 = vmul.f32 %v3441_v33, %v1007_v39  ;;  %v4130_v39 = vmov 0  }
0x12f3   :  { %v1012_v42 = vpack.c.bf16 %v1009_v41, %v1009_v41  ;;  %v4132_v41 = vmov 0  }
0x12f5   :  { %1014 = vrot.lane.b32.xlu1 %v1012_v42, %s3720_s0  ;;  %v2712_v42 = vcombine.high (!%p2710_p6), %v3843_v6, %v3848_v7 }
0x12f7   :  { %1210 = vmatprep.subr.bf16.mxu0 (!%p2710_p6), %v2712_v42 }
0x1367   :  { %v1015_v44 = vpop.permute.xlu1 %1014 }
0x1368   :  { %2978 = vmatmul.mubr.msk.bf16.vlgmr.msra.gmra.mrb[24].mxu1 %vm103_vm0, %v1015_v44  ;;  %v2711_v44 = vcombine.low (!%p2710_p6), %v3843_v6, %v3848_v7 }
0x143b   :  { %v1053_v45 = vpop.f32.mrb[24].mxu1 }
0x143c   :  { %v1059_v47 = vadd.f32 %v1053_v45, %v178_v37  ;;  %v2979_v48 = vpop.f32.mrb[25].mxu1  ;;  %v2714_v37 = vcombine.high (!%p2710_p6), %v3853_v8, %v3859_v9  ;;  %v3722_v45 = vmov (!%p2710_p6), 0  }
0x143d   :  { %v1056_v49 = vpop.f32.mrb[26].mxu1 }
0x143e   :  { %3444 = vtanh.f32 %v1059_v47  ;;  %v2980_v50 = vpop.f32.mrb[27].mxu1  ;;  %v2704_v52 = vmul.f32 -1.442695, %v1059_v47  ;;  %v2713_v47 = vcombine.low (!%p2710_p6), %v3853_v8, %v3859_v9 }
0x1440   :  { %3446 = vpow2.f32 %v2704_v52 }
0x1448   :  { %v3445_v51 = vpop.eup %3444 }
0x1449   :  { %1069 = vrot.lane.b32.xlu0 %v3445_v51, %s3719_s6 }
0x144a   :  { %v3447_v57 = vpop.eup %3446 }
0x144b   :  { %v1063_v19 = vadd.f32 1.0, %v3447_v57 }
0x144d   :  { %3448 = vrcp.f32 %v1063_v19 }
0x1457   :  { %v3449_v58 = vpop.eup %3448 }
0x1458   :  { %v1067_v43 = vmul.f32 %v3449_v58, %v1003_v54 }
0x14bb   :  { %v1070_v59 = vpop.permute.xlu0 %1069 }
0x14bc   :  { %v1072_v61 = vmul.f32 %v3449_v58, %v1070_v59 }
0x14be   :  { %1074 = vrot.lane.b32.xlu1 %v1072_v61, %s3719_s6  ;;  %v3723_v61 = vmov (!%p2710_p6), 0.0  }
0x14bf   :  { %2989 = vmatprep.subr.bf16.mxu1 (!%p2710_p6), %v3723_v61  ;;  %2997 = vmatprep.mubr.msk.bf16.mxu1 (!%p2710_p6), %vm3724_vm5, %v3723_v61 }
0x14c0   :  { %2990 = vmatpush3.bf16.msra.mxu1 (!%p2710_p6), %v4027_v62 }
0x14c1   :  { %2991 = vmatprep.subr.bf16.mxu1 (!%p2710_p6), %v3723_v61 }
0x14c4   :  { %2992 = vmatpush3.bf16.msra.mxu1 (!%p2710_p6), %v4025_v60 }
0x14c5   :  { %2993 = vmatprep.subr.bf16.mxu1 (!%p2710_p6), %v3723_v61 }
0x14c8   :  { %2994 = vmatpush3.bf16.msra.mxu1 (!%p2710_p6), %v4031_v12 }
0x14c9   :  { %2995 = vmatprep.subr.bf16.mxu1 (!%p2710_p6), %v3723_v61 }
0x14cc   :  { %2996 = vmatpush3.bf16.msra.mxu1 (!%p2710_p6), %v4029_v2 }
0x1530   :  { %v1075_v55 = vpop.permute.xlu1 %1074 }
0x1531   :  { %v1077_v63 = vadd.f32 %v1075_v55, %v1067_v43 }
0x1533   :  { %3450 = vtanh.f32 %v1077_v63 }
0x153d   :  { %v3451_v46 = vpop.eup %3450 }
0x153e   :  { %1080 = vrot.lane.b32.xlu0 %v3451_v46, %s3719_s6 }
0x15b0   :  { %v1081_v0 = vpop.permute.xlu0 %1080 }
0x15b1   :  { %v1083_v1 = vmul.f32 %v3449_v58, %v1081_v0 }
0x15b3   :  { %v1085_v3 = vpack.c.bf16 %v1083_v1, %v1083_v1 }
0x15b5   :  { %1087 = vrot.lane.b32.xlu1 %v1085_v3, %s3720_s0 }
0x1627   :  { %v1088_v13 = vpop.permute.xlu1 %1087 }
0x1628   :  { %2986 = vmatmul.mubr.msk.bf16.vlgmr.msra.gmra.mrb[28].mxu0 %vm103_vm0, %v1088_v13 }
0x1629   :  { %1242 = vmatprep.mubr.bf16.mxu0 (!%p2710_p6), %v3722_v45  ;;  %1211 = vmatpush1.bf16.msra.mxu0 (!%p2710_p6), %v2711_v44 }
0x162a   :  { %1212 = vmatprep.subr.bf16.mxu0 (!%p2710_p6), %v2714_v37 }
0x162d   :  { %1213 = vmatpush1.bf16.msra.mxu0 (!%p2710_p6), %v2713_v47 }
0x16fb   :  { %v1138_v14 = vpop.f32.mrb[28].mxu0 }
0x16fc   :  { %v1145_v17 = vadd.f32 %v1138_v14, %v3942_v32  ;;  %v2987_v20 = vpop.f32.mrb[29].mxu0 }
0x16fd   :  { %v1141_v21 = vpop.f32.mrb[30].mxu0 }
0x16fe   :  { %3452 = vtanh.f32 %v1145_v17  ;;  %v2988_v22 = vpop.f32.mrb[31].mxu0  ;;  %v2708_v25 = vmul.f32 -1.442695, %v1145_v17 }
0x1700   :  { %3454 = vpow2.f32 %v2708_v25 }
0x1708   :  { %v3453_v23 = vpop.eup %3452 }
0x1709   :  { %1155 = vrot.lane.b32.xlu0 %v3453_v23, %s3719_s6 }
0x170a   :  { %v3455_v26 = vpop.eup %3454 }
0x170b   :  { %v1149_v27 = vadd.f32 1.0, %v3455_v26 }
0x170d   :  { %3456 = vrcp.f32 %v1149_v27 }
0x1717   :  { %v3457_v29 = vpop.eup %3456 }
0x1718   :  { %v1153_v33 = vmul.f32 %v3457_v29, %v1077_v63 }
0x177b   :  { %v1156_v30 = vpop.permute.xlu0 %1155 }
0x177c   :  { %v1158_v31 = vmul.f32 %v3457_v29, %v1156_v30 }
0x177e   :  { %1160 = vrot.lane.b32.xlu1 %v1158_v31, %s3719_s6 }
0x17f0   :  { %v1161_v40 = vpop.permute.xlu1 %1160 }
0x17f1   :  { %v4118_v32 = vadd.f32 %v1161_v40, %v1153_v33 }
0x17f3   :  { %3458 = vtanh.f32 %v4118_v32 }
0x17fd   :  { %v3459_v34 = vpop.eup %3458 }
0x17fe   :  { %1166 = vrot.lane.b32.xlu0 %v3459_v34, %s3719_s6 }
0x1870   :  { %v1167_v53 = vpop.permute.xlu0 %1166 }
0x1871   :  { %v1169_v35 = vmul.f32 %v3457_v29, %v1167_v53 }
0x1873   :  { %v4125_v54 = vpack.c.bf16 %v1169_v35, %v1169_v35  ;;  %1171 = vrot.lane.b32.xlu1 %v1169_v35, %s3720_s0 }
0x1875   :  { %1185 = vrot.lane.b32.xlu0 (!%p2710_p6), %v4125_v54, %s3721_s21 }
0x18e0   :  { %1183 = sbr.rel (%p2710_p6) target bundleno = 7248 (0x1c50), region = 53 }
0x18e5   :  { %v1172_v38 = vpop.permute.xlu1 %1171 }
0x18e6   :  { %1175 = vst.msk [vmem:[#allocation4 + $0x8] sm:$0xff] %vm103_vm0, %v1172_v38 }
0x18e7   :  { %v1186_v48 = vpop.permute.xlu0 %1185 }
0x18e8   :  { %2715 = vmatmul.mubr.msk.bf16.vlgmr.msra.gmra.mrb[0].mxu0 %vm103_vm0, %v1186_v48 }
0x19bb   :  { %v1244_v41 = vpop.f32.mrb[0].mxu0  }
0x19bc   :  { %v1246_v49 = vpop.f32.mrb[1].mxu0 }
0x19bd   :  { %v1251_v50 = vadd.f32 %v1246_v49, %v3887_v18  ;;  %v1248_v51 = vpop.f32.mrb[2].mxu0 }
0x19be   :  { %v1249_v52 = vpop.f32.mrb[3].mxu0 }
0x19bf   :  { %1252 = vmax.xlane.f32.xlu0 %v1251_v50 }
0x1a4c   :  { %v1253_v57 = vpop.xlane.xlu0 %1252 }
0x1a4d   :  { %vm1254_vm3 = vcmp.eq.f32.partialorder %v1251_v50, %v1253_v57 }
0x1a4e   :  { %v1255_v19 = vsel %vm1254_vm3, %v3835_v4, 128 }
0x1a4f   :  { %v1257_v58 = vshra.s32 %v1255_v19, 16  ;;  %v1256_v43 = vand.u32 65535, %v1255_v19 }
0x1a51   :  { %v1259_v59 = vcvt.s32.f32 %v1257_v58  ;;  %v1258_v55 = vcvt.s32.f32 %v1256_v43 }
0x1a53   :  { %1260 = vmin.xlane.f32.xlu1 %v1259_v59 }
0x1ae0   :  { %v1261_v63 = vpop.xlane.xlu1 %1260 }
0x1ae1   :  { %vm1262_vm4 = vcmp.eq.f32.partialorder %v1259_v59, %v1261_v63  ;;  %v1267_v0 = vcvt.f32.s32 %v1261_v63 }
0x1ae2   :  { %v1263_v46 = vsel %vm1262_vm4, %v1258_v55, inf }
0x1ae3   :  { %1264 = vmin.xlane.f32.xlu1 %v1263_v46  ;;  %v1268_v3 = vshll.u32 %v1267_v0, 16 }
0x1b70   :  { %v1265_v1 = vpop.xlane.xlu1 %1264 }
0x1b71   :  { %v1266_v13 = vcvt.f32.s32 %v1265_v1 }
0x1b73   :  { %v1269_v14 = vadd.s32 %v1268_v3, %v1266_v13 }
0x1b75   :  { %vm1270_vm6 = vcmp.eq.s32.totalorder %v3835_v4, %v1269_v14 }
0x1b76   :  { %v2716_v17 = vsel %vm1270_vm6, 1.0, %v3723_v61 }
0x1b77   :  { %v1273_v20 = vpack.c.bf16 %v2716_v17, %v2716_v17 }
0x1b79   :  { %2998 = vmatmul.mubr.msk.bf16.vlgmr.msra.gmra.mrb[0].mxu1 %vm1274_vm7, %v1273_v20 }
0x1c4c   :  { %v1312_v21 = vpop.f32.mrb[0].mxu1 }
0x1c4d   :  { %v1313_v39 = vadd.f32 %v3938_v28, %v1312_v21   ;;  %v2999_v22 = vpop.f32.mrb[1].mxu1 }
0x1c4e   :  { %v1315_v23 = vpop.f32.mrb[2].mxu1 }
0x1c4f   :  { %v3000_v25 = vpop.f32.mrb[3].mxu1 }
0x1c50 PF:  { %v3626_v26 = vmov %v3620_v39   ;;  %v3630_v27 = vmov %v3624_v41   ;;  %1322 = sbr.rel (%p1180_p5) target bundleno = 7579 (0x1d9b), region = 57  ;;  %s3725_s22 = smov (!%p1180_p5), 64   ;;  %v3726_v29 = vmov (!%p1180_p5), 0.0   ;;  %vm3727_vm8 = vmmov (!%p1180_p5), 0   ;;  %v3624_v41 = vphi %v4132_v41, %v1244_v41   ;;  %v3620_v39 = vphi %v4130_v39, %v1313_v39  }
0x1c51   :  { %1324 = vrot.lane.b32.xlu0 (!%p1180_p5), %v4125_v54, %s3725_s22  ;;  %3001 = vmatprep.subr.bf16.mxu0 (!%p1180_p5), %v3726_v29  ;;  %v3627_v26 = vmov (!%p1180_p5), %v3946_v36  }
0x1c52   :  { %3002 = vmatpush3.bf16.msra.mxu0 (!%p1180_p5), %v4102_v24  ;;  %3005 = vmatprep.mubr.msk.bf16.mxu0 (!%p1180_p5), %vm3727_vm8, %v3726_v29 }
0x1c53   :  { %3003 = vmatprep.subr.bf16.mxu0 (!%p1180_p5), %v3726_v29 }
0x1c56   :  { %3004 = vmatpush3.bf16.msra.mxu0 (!%p1180_p5), %v4108_v56 }
0x1cc3   :  { %v1325_v30 = vpop.permute.xlu0 %1324 }
0x1cc4   :  { %3006 = vmatmul.mubr.msk.bf16.vlgmr.msra.gmra.mrb[0].mxu0 %vm103_vm0, %v1325_v30 }
0x1d97   :  { %v1363_v27 = vpop.f32.mrb[0].mxu0  }
0x1d98   :  { %v3007_v31 = vpop.f32.mrb[1].mxu0 }
0x1d99   :  { %v1366_v33 = vpop.f32.mrb[2].mxu0 }
0x1d9a   :  { %v3008_v40 = vpop.f32.mrb[3].mxu0 }
0x1d9b PF:  { %v1371_v34 = vadd.f32 %v3628_v26, %v3632_v27  ;;  %s4172_s2 = sld [smem:[#allocation5 + $0x2]]  ;;  %v4174_v47 = vld [vmem:[#allocation3 + $0x10] sm:$0xff]   ;;  %v4182_v51 = vmov 0   ;;  %v4184_v52 = vmov 0   ;;  %v3632_v27 = vphi %v3630_v27, %v1363_v27   ;;  %v3628_v26 = vphi %v3626_v26, %v3627_v26  }
0x1d9d   :  { %3460 = vtanh.f32 %v1371_v34  ;;  %v2719_v35 = vmul.f32 -1.442695, %v1371_v34 }
0x1d9f   :  { %3462 = vpow2.f32 %v2719_v35 }
0x1da1   :  { %p1406_p7 = scmp.eq.s32.totalorder %s4172_s2, 0  ;;  %p2721_p8 = scmp.ne.s32.totalorder %s4172_s2, 0 }
0x1da2   :  { %v2723_v57 = vcombine.high (!%p2721_p8), %v3843_v6, %v3848_v7  ;;  %v2722_v19 = vcombine.low (!%p2721_p8), %v3843_v6, %v3848_v7  ;;  %v2725_v58 = vcombine.high (!%p2721_p8), %v3853_v8, %v3859_v9  ;;  %s3728_s5 = smov (!%p2721_p8), 64   ;;  %v3729_v59 = vmov (!%p2721_p8), 0  }
0x1da3   :  { %1468 = vmatprep.mubr.bf16.mxu0 (!%p2721_p8), %v3729_v59  ;;  %v2724_v61 = vcombine.low (!%p2721_p8), %v3853_v8, %v3859_v9  ;;  %v3730_v17 = vmov (!%p2721_p8), 0.0   ;;  %vm3731_vm11 = vmmov (!%p2721_p8), 0   ;;  %vm1500_vm13 = vcmask (!%p2721_p8), 523264  }
0x1da4   :  { %1436 = vmatprep.subr.bf16.mxu0 (!%p2721_p8), %v2723_v57  ;;  %3009 = vmatprep.subr.bf16.mxu1 (!%p2721_p8), %v3730_v17 }
0x1da5   :  { %1437 = vmatpush1.bf16.msra.mxu0 (!%p2721_p8), %v2722_v19  ;;  %3010 = vmatpush3.bf16.msra.mxu1 (!%p2721_p8), %v4027_v62 }
0x1da6   :  { %1438 = vmatprep.subr.bf16.mxu0 (!%p2721_p8), %v2725_v58  ;;  %3011 = vmatprep.subr.bf16.mxu1 (!%p2721_p8), %v3730_v17 }
0x1da7   :  { %v3461_v53 = vpop.eup %3460  ;;  %3017 = vmatprep.mubr.msk.bf16.mxu1 (!%p2721_p8), %vm3731_vm11, %v3730_v17 }
0x1da8   :  { %1381 = vrot.lane.b32.xlu0 %v3461_v53, %s3719_s6 }
0x1da9   :  { %v3463_v54 = vpop.eup %3462  ;;  %1439 = vmatpush1.bf16.msra.mxu0 (!%p2721_p8), %v2724_v61  ;;  %3012 = vmatpush3.bf16.msra.mxu1 (!%p2721_p8), %v4025_v60 }
0x1daa   :  { %v1375_v38 = vadd.f32 1.0, %v3463_v54  ;;  %3013 = vmatprep.subr.bf16.mxu1 (!%p2721_p8), %v3730_v17 }
0x1dac   :  { %3464 = vrcp.f32 %v1375_v38 }
0x1dad   :  { %3014 = vmatpush3.bf16.msra.mxu1 (!%p2721_p8), %v4031_v12 }
0x1dae   :  { %3015 = vmatprep.subr.bf16.mxu1 (!%p2721_p8), %v3730_v17 }
0x1db1   :  { %3016 = vmatpush3.bf16.msra.mxu1 (!%p2721_p8), %v4029_v2 }
0x1db6   :  { %v3465_v39 = vpop.eup %3464 }
0x1db7   :  { %v1379_v36 = vmul.f32 %v3465_v39, %v4118_v32 }
0x1e1a   :  { %v1382_v41 = vpop.permute.xlu0 %1381 }
0x1e1b   :  { %v1384_v42 = vmul.f32 %v3465_v39, %v1382_v41 }
0x1e1d   :  { %1386 = vrot.lane.b32.xlu0 %v1384_v42, %s3719_s6 }
0x1e8f   :  { %v1387_v44 = vpop.permute.xlu0 %1386 }
0x1e90   :  { %v4168_v37 = vadd.f32 %v1387_v44, %v1379_v36 }
0x1e92   :  { %3466 = vtanh.f32 %v4168_v37 }
0x1e9c   :  { %v3467_v45 = vpop.eup %3466 }
0x1e9d   :  { %1392 = vrot.lane.b32.xlu1 %v3467_v45, %s3719_s6 }
0x1f0f   :  { %v1393_v48 = vpop.permute.xlu1 %1392 }
0x1f10   :  { %v1395_v49 = vmul.f32 %v3465_v39, %v1393_v48 }
0x1f12   :  { %v4177_v50 = vpack.c.bf16 %v1395_v49, %v1395_v49  ;;  %1397 = vrot.lane.b32.xlu1 %v1395_v49, %s3720_s0 }
0x1f14   :  { %1411 = vrot.lane.b32.xlu0 (!%p2721_p8), %v4177_v50, %s3728_s5 }
0x1f7f   :  { %1409 = sbr.rel (%p2721_p8) target bundleno = 8943 (0x22ef), region = 61 }
0x1f84   :  { %v1398_v32 = vpop.permute.xlu1 %1397 }
0x1f85   :  { %1401 = vst.msk [vmem:[#allocation4 + $0x10] sm:$0xff] %vm103_vm0, %v1398_v32 }
0x1f86   :  { %v1412_v43 = vpop.permute.xlu0 %1411 }
0x1f87   :  { %2726 = vmatmul.mubr.msk.bf16.vlgmr.msra.gmra.mrb[0].mxu0 %vm103_vm0, %v1412_v43 }
0x205a   :  { %v1470_v52 = vpop.f32.mrb[0].mxu0  }
0x205b   :  { %v1472_v55 = vpop.f32.mrb[1].mxu0 }
0x205c   :  { %v1477_v63 = vadd.f32 %v1472_v55, %v3887_v18  ;;  %v1474_v46 = vpop.f32.mrb[2].mxu0 }
0x205d   :  { %v1475_v0 = vpop.f32.mrb[3].mxu0 }
0x205e   :  { %1478 = vmax.xlane.f32.xlu0 %v1477_v63 }
0x20eb   :  { %v1479_v1 = vpop.xlane.xlu0 %1478 }
0x20ec   :  { %vm1480_vm9 = vcmp.eq.f32.partialorder %v1477_v63, %v1479_v1 }
0x20ed   :  { %v1481_v3 = vsel %vm1480_vm9, %v3835_v4, 128 }
0x20ee   :  { %v1483_v13 = vshra.s32 %v1481_v3, 16  ;;  %v1482_v20 = vand.u32 65535, %v1481_v3 }
0x20f0   :  { %v1485_v14 = vcvt.s32.f32 %v1483_v13  ;;  %v1484_v21 = vcvt.s32.f32 %v1482_v20 }
0x20f2   :  { %1486 = vmin.xlane.f32.xlu1 %v1485_v14 }
0x217f   :  { %v1487_v22 = vpop.xlane.xlu1 %1486 }
0x2180   :  { %vm1488_vm10 = vcmp.eq.f32.partialorder %v1485_v14, %v1487_v22  ;;  %v1493_v25 = vcvt.f32.s32 %v1487_v22 }
0x2181   :  { %v1489_v23 = vsel %vm1488_vm10, %v1484_v21, inf }
0x2182   :  { %1490 = vmin.xlane.f32.xlu1 %v1489_v23  ;;  %v1494_v27 = vshll.u32 %v1493_v25, 16 }
0x220f   :  { %v1491_v26 = vpop.xlane.xlu1 %1490 }
0x2210   :  { %v1492_v29 = vcvt.f32.s32 %v1491_v26 }
0x2212   :  { %v1495_v30 = vadd.s32 %v1494_v27, %v1492_v29 }
0x2214   :  { %vm1496_vm12 = vcmp.eq.s32.totalorder %v3835_v4, %v1495_v30 }
0x2215   :  { %v2727_v31 = vsel %vm1496_vm12, 1.0, %v3730_v17 }
0x2216   :  { %v1499_v33 = vpack.c.bf16 %v2727_v31, %v2727_v31 }
0x2218   :  { %3018 = vmatmul.mubr.msk.bf16.vlgmr.msra.gmra.mrb[0].mxu1 %vm1500_vm13, %v1499_v33 }
0x22eb   :  { %v1538_v40 = vpop.f32.mrb[0].mxu1 }
0x22ec   :  { %v1539_v51 = vadd.f32 %v3938_v28, %v1538_v40   ;;  %v3019_v34 = vpop.f32.mrb[1].mxu1 }
0x22ed   :  { %v1541_v53 = vpop.f32.mrb[2].mxu1 }
0x22ee   :  { %v3020_v35 = vpop.f32.mrb[3].mxu1 }
0x22ef PF:  { %v3642_v54 = vmov %v3636_v51   ;;  %v3646_v38 = vmov %v3640_v52   ;;  %1548 = sbr.rel (%p1406_p7) target bundleno = 9274 (0x243a), region = 65  ;;  %s3732_s8 = smov (!%p1406_p7), 64   ;;  %v3733_v39 = vmov (!%p1406_p7), 0.0   ;;  %vm3734_vm14 = vmmov (!%p1406_p7), 0   ;;  %v3640_v52 = vphi %v4184_v52, %v1470_v52   ;;  %v3636_v51 = vphi %v4182_v51, %v1539_v51  }
0x22f0   :  { %1550 = vrot.lane.b32.xlu0 (!%p1406_p7), %v4177_v50, %s3732_s8  ;;  %3021 = vmatprep.subr.bf16.mxu0 (!%p1406_p7), %v3733_v39  ;;  %v3643_v54 = vmov (!%p1406_p7), %v4174_v47  }
0x22f1   :  { %3022 = vmatpush3.bf16.msra.mxu0 (!%p1406_p7), %v4102_v24  ;;  %3025 = vmatprep.mubr.msk.bf16.mxu0 (!%p1406_p7), %vm3734_vm14, %v3733_v39 }
0x22f2   :  { %3023 = vmatprep.subr.bf16.mxu0 (!%p1406_p7), %v3733_v39 }
0x22f5   :  { %3024 = vmatpush3.bf16.msra.mxu0 (!%p1406_p7), %v4108_v56 }
0x2362   :  { %v1551_v41 = vpop.permute.xlu0 %1550 }
0x2363   :  { %3026 = vmatmul.mubr.msk.bf16.vlgmr.msra.gmra.mrb[0].mxu0 %vm103_vm0, %v1551_v41 }
0x2436   :  { %v1589_v38 = vpop.f32.mrb[0].mxu0  }
0x2437   :  { %v3027_v42 = vpop.f32.mrb[1].mxu0 }
0x2438   :  { %v1592_v36 = vpop.f32.mrb[2].mxu0 }
0x2439   :  { %v3028_v44 = vpop.f32.mrb[3].mxu0 }
0x243a PF:  { %v1597_v45 = vadd.f32 %v3644_v54, %v3648_v38  ;;  %s4224_s23 = sld [smem:[#allocation5 + $0x3]]  ;;  %v4226_v61 = vld [vmem:[#allocation3 + $0x18] sm:$0xff]   ;;  %v4234_v46 = vmov 0   ;;  %v4236_v0 = vmov 0   ;;  %v3648_v38 = vphi %v3646_v38, %v1589_v38   ;;  %v3644_v54 = vphi %v3642_v54, %v3643_v54  }
0x243c   :  { %3468 = vtanh.f32 %v1597_v45  ;;  %v2730_v49 = vmul.f32 -1.442695, %v1597_v45 }
0x243e   :  { %3470 = vpow2.f32 %v2730_v49 }
0x2440   :  { %p1632_p9 = scmp.eq.s32.totalorder %s4224_s23, 0  ;;  %p2732_p10 = scmp.ne.s32.totalorder %s4224_s23, 0 }
0x2441   :  { %v2734_v1 = vcombine.high (!%p2732_p10), %v3843_v6, %v3848_v7  ;;  %v2733_v3 = vcombine.low (!%p2732_p10), %v3843_v6, %v3848_v7  ;;  %v2736_v13 = vcombine.high (!%p2732_p10), %v3853_v8, %v3859_v9  ;;  %s3735_s24 = smov (!%p2732_p10), 64   ;;  %v3736_v14 = vmov (!%p2732_p10), 0  }
0x2442   :  { %1694 = vmatprep.mubr.bf16.mxu0 (!%p2732_p10), %v3736_v14  ;;  %v2735_v17 = vcombine.low (!%p2732_p10), %v3853_v8, %v3859_v9  ;;  %v3737_v31 = vmov (!%p2732_p10), 0.0   ;;  %vm3738_vm2 = vmmov (!%p2732_p10), 0   ;;  %vm1726_vm4 = vcmask (!%p2732_p10), 523264  }
0x2443   :  { %1662 = vmatprep.subr.bf16.mxu0 (!%p2732_p10), %v2734_v1  ;;  %3029 = vmatprep.subr.bf16.mxu1 (!%p2732_p10), %v3737_v31 }
0x2444   :  { %1663 = vmatpush1.bf16.msra.mxu0 (!%p2732_p10), %v2733_v3  ;;  %3030 = vmatpush3.bf16.msra.mxu1 (!%p2732_p10), %v4027_v62 }
0x2445   :  { %1664 = vmatprep.subr.bf16.mxu0 (!%p2732_p10), %v2736_v13  ;;  %3031 = vmatprep.subr.bf16.mxu1 (!%p2732_p10), %v3737_v31 }
0x2446   :  { %v3469_v48 = vpop.eup %3468  ;;  %3037 = vmatprep.mubr.msk.bf16.mxu1 (!%p2732_p10), %vm3738_vm2, %v3737_v31 }
0x2447   :  { %1607 = vrot.lane.b32.xlu0 %v3469_v48, %s3719_s6 }
0x2448   :  { %v3471_v50 = vpop.eup %3470  ;;  %1665 = vmatpush1.bf16.msra.mxu0 (!%p2732_p10), %v2735_v17  ;;  %3032 = vmatpush3.bf16.msra.mxu1 (!%p2732_p10), %v4025_v60 }
0x2449   :  { %v1601_v32 = vadd.f32 1.0, %v3471_v50  ;;  %3033 = vmatprep.subr.bf16.mxu1 (!%p2732_p10), %v3737_v31 }
0x244b   :  { %3472 = vrcp.f32 %v1601_v32 }
0x244c   :  { %3034 = vmatpush3.bf16.msra.mxu1 (!%p2732_p10), %v4031_v12 }
0x244d   :  { %3035 = vmatprep.subr.bf16.mxu1 (!%p2732_p10), %v3737_v31 }
0x2450   :  { %3036 = vmatpush3.bf16.msra.mxu1 (!%p2732_p10), %v4029_v2 }
0x2455   :  { %v3473_v51 = vpop.eup %3472 }
0x2456   :  { %v1605_v47 = vmul.f32 %v3473_v51, %v4168_v37 }
0x24b9   :  { %v1608_v52 = vpop.permute.xlu0 %1607 }
0x24ba   :  { %v1610_v57 = vmul.f32 %v3473_v51, %v1608_v52 }
0x24bc   :  { %1612 = vrot.lane.b32.xlu0 %v1610_v57, %s3719_s6 }
0x252e   :  { %v1613_v19 = vpop.permute.xlu0 %1612 }
0x252f   :  { %v4220_v58 = vadd.f32 %v1613_v19, %v1605_v47 }
0x2531   :  { %3474 = vtanh.f32 %v4220_v58 }
0x253b   :  { %v3475_v59 = vpop.eup %3474 }
0x253c   :  { %1618 = vrot.lane.b32.xlu1 %v3475_v59, %s3719_s6 }
0x25ae   :  { %v1619_v43 = vpop.permute.xlu1 %1618 }
0x25af   :  { %v1621_v55 = vmul.f32 %v3473_v51, %v1619_v43 }
0x25b1   :  { %v4229_v63 = vpack.c.bf16 %v1621_v55, %v1621_v55  ;;  %1623 = vrot.lane.b32.xlu1 %v1621_v55, %s3720_s0 }
0x25b3   :  { %1637 = vrot.lane.b32.xlu0 (!%p2732_p10), %v4229_v63, %s3735_s24 }
0x261e   :  { %1635 = sbr.rel (%p2732_p10) target bundleno = 10638 (0x298e), region = 69 }
0x2623   :  { %v1624_v37 = vpop.permute.xlu1 %1623 }
0x2624   :  { %1627 = vst.msk [vmem:[#allocation4 + $0x18] sm:$0xff] %vm103_vm0, %v1624_v37 }
0x2625   :  { %v1638_v20 = vpop.permute.xlu0 %1637 }
0x2626   :  { %2737 = vmatmul.mubr.msk.bf16.vlgmr.msra.gmra.mrb[0].mxu0 %vm103_vm0, %v1638_v20 }
0x26f9   :  { %v1696_v0 = vpop.f32.mrb[0].mxu0  }
0x26fa   :  { %v1698_v21 = vpop.f32.mrb[1].mxu0 }
0x26fb   :  { %v1703_v22 = vadd.f32 %v1698_v21, %v3887_v18  ;;  %v1700_v23 = vpop.f32.mrb[2].mxu0 }
0x26fc   :  { %v1701_v25 = vpop.f32.mrb[3].mxu0 }
0x26fd   :  { %1704 = vmax.xlane.f32.xlu0 %v1703_v22 }
0x278a   :  { %v1705_v26 = vpop.xlane.xlu0 %1704 }
0x278b   :  { %vm1706_vm15 = vcmp.eq.f32.partialorder %v1703_v22, %v1705_v26 }
0x278c   :  { %v1707_v27 = vsel %vm1706_vm15, %v3835_v4, 128 }
0x278d   :  { %v1709_v29 = vshra.s32 %v1707_v27, 16  ;;  %v1708_v33 = vand.u32 65535, %v1707_v27 }
0x278f   :  { %v1711_v30 = vcvt.s32.f32 %v1709_v29  ;;  %v1710_v40 = vcvt.s32.f32 %v1708_v33 }
0x2791   :  { %1712 = vmin.xlane.f32.xlu1 %v1711_v30 }
0x281e   :  { %v1713_v34 = vpop.xlane.xlu1 %1712 }
0x281f   :  { %vm1714_vm1 = vcmp.eq.f32.partialorder %v1711_v30, %v1713_v34  ;;  %v1719_v35 = vcvt.f32.s32 %v1713_v34 }
0x2820   :  { %v1715_v53 = vsel %vm1714_vm1, %v1710_v40, inf }
0x2821   :  { %1716 = vmin.xlane.f32.xlu1 %v1715_v53  ;;  %v1720_v38 = vshll.u32 %v1719_v35, 16 }
0x28ae   :  { %v1717_v54 = vpop.xlane.xlu1 %1716 }
0x28af   :  { %v1718_v39 = vcvt.f32.s32 %v1717_v54 }
0x28b1   :  { %v1721_v41 = vadd.s32 %v1720_v38, %v1718_v39 }
0x28b3   :  { %vm1722_vm3 = vcmp.eq.s32.totalorder %v3835_v4, %v1721_v41 }
0x28b4   :  { %v2738_v42 = vsel %vm1722_vm3, 1.0, %v3737_v31 }
0x28b5   :  { %v1725_v36 = vpack.c.bf16 %v2738_v42, %v2738_v42 }
0x28b7   :  { %3038 = vmatmul.mubr.msk.bf16.vlgmr.msra.gmra.mrb[0].mxu1 %vm1726_vm4, %v1725_v36 }
0x298a   :  { %v1764_v44 = vpop.f32.mrb[0].mxu1 }
0x298b   :  { %v1765_v46 = vadd.f32 %v3938_v28, %v1764_v44   ;;  %v3039_v45 = vpop.f32.mrb[1].mxu1 }
0x298c   :  { %v1767_v48 = vpop.f32.mrb[2].mxu1 }
0x298d   :  { %v3040_v49 = vpop.f32.mrb[3].mxu1 }
0x298e PF:  { %v3658_v50 = vmov %v3652_v46   ;;  %v3662_v32 = vmov %v3656_v0   ;;  %1774 = sbr.rel (%p1632_p9) target bundleno = 10969 (0x2ad9), region = 73  ;;  %s3739_s25 = smov (!%p1632_p9), 64   ;;  %v3740_v51 = vmov (!%p1632_p9), 0.0   ;;  %vm3741_vm5 = vmmov (!%p1632_p9), 0   ;;  %v3656_v0 = vphi %v4236_v0, %v1696_v0   ;;  %v3652_v46 = vphi %v4234_v46, %v1765_v46  }
0x298f   :  { %1776 = vrot.lane.b32.xlu0 (!%p1632_p9), %v4229_v63, %s3739_s25  ;;  %3041 = vmatprep.subr.bf16.mxu0 (!%p1632_p9), %v3740_v51  ;;  %v3659_v50 = vmov (!%p1632_p9), %v4226_v61  }
0x2990   :  { %3042 = vmatpush3.bf16.msra.mxu0 (!%p1632_p9), %v4102_v24  ;;  %3045 = vmatprep.mubr.msk.bf16.mxu0 (!%p1632_p9), %vm3741_vm5, %v3740_v51 }
0x2991   :  { %3043 = vmatprep.subr.bf16.mxu0 (!%p1632_p9), %v3740_v51 }
0x2994   :  { %3044 = vmatpush3.bf16.msra.mxu0 (!%p1632_p9), %v4108_v56 }
0x2a01   :  { %v1777_v52 = vpop.permute.xlu0 %1776 }
0x2a02   :  { %3046 = vmatmul.mubr.msk.bf16.vlgmr.msra.gmra.mrb[0].mxu0 %vm103_vm0, %v1777_v52 }
0x2ad5   :  { %v1815_v32 = vpop.f32.mrb[0].mxu0  }
0x2ad6   :  { %v3047_v57 = vpop.f32.mrb[1].mxu0 }
0x2ad7   :  { %v1818_v47 = vpop.f32.mrb[2].mxu0 }
0x2ad8   :  { %v3048_v19 = vpop.f32.mrb[3].mxu0 }
0x2ad9 PF:  { %v1823_v59 = vadd.f32 %v3660_v50, %v3664_v32  ;;  %s4276_s26 = sld [smem:[#allocation5 + $0x4]]  ;;  %v4278_v17 = vld [vmem:[#allocation3 + $0x20] sm:$0xff]   ;;  %v4286_v23 = vmov 0   ;;  %v4288_v25 = vmov 0   ;;  %v3664_v32 = vphi %v3662_v32, %v1815_v32   ;;  %v3660_v50 = vphi %v3658_v50, %v3659_v50  }
0x2adb   :  { %3476 = vtanh.f32 %v1823_v59  ;;  %v2741_v55 = vmul.f32 -1.442695, %v1823_v59 }
0x2add   :  { %3478 = vpow2.f32 %v2741_v55 }
0x2adf   :  { %p1858_p11 = scmp.eq.s32.totalorder %s4276_s26, 0  ;;  %p2743_p12 = scmp.ne.s32.totalorder %s4276_s26, 0 }
0x2ae0   :  { %v2745_v26 = vcombine.high (!%p2743_p12), %v3843_v6, %v3848_v7  ;;  %v2744_v27 = vcombine.low (!%p2743_p12), %v3843_v6, %v3848_v7  ;;  %v2747_v29 = vcombine.high (!%p2743_p12), %v3853_v8, %v3859_v9  ;;  %s3742_s27 = smov (!%p2743_p12), 64   ;;  %v3743_v30 = vmov (!%p2743_p12), 0  }
0x2ae1   :  { %1920 = vmatprep.mubr.bf16.mxu0 (!%p2743_p12), %v3743_v30  ;;  %v2746_v31 = vcombine.low (!%p2743_p12), %v3853_v8, %v3859_v9  ;;  %v3744_v42 = vmov (!%p2743_p12), 0.0   ;;  %vm3745_vm8 = vmmov (!%p2743_p12), 0   ;;  %vm1952_vm10 = vcmask (!%p2743_p12), 523264  }
0x2ae2   :  { %1888 = vmatprep.subr.bf16.mxu0 (!%p2743_p12), %v2745_v26  ;;  %3049 = vmatprep.subr.bf16.mxu1 (!%p2743_p12), %v3744_v42 }
0x2ae3   :  { %1889 = vmatpush1.bf16.msra.mxu0 (!%p2743_p12), %v2744_v27  ;;  %3050 = vmatpush3.bf16.msra.mxu1 (!%p2743_p12), %v4027_v62 }
0x2ae4   :  { %1890 = vmatprep.subr.bf16.mxu0 (!%p2743_p12), %v2747_v29  ;;  %3051 = vmatprep.subr.bf16.mxu1 (!%p2743_p12), %v3744_v42 }
0x2ae5   :  { %v3477_v43 = vpop.eup %3476  ;;  %3057 = vmatprep.mubr.msk.bf16.mxu1 (!%p2743_p12), %vm3745_vm8, %v3744_v42 }
0x2ae6   :  { %1833 = vrot.lane.b32.xlu0 %v3477_v43, %s3719_s6 }
0x2ae7   :  { %v3479_v63 = vpop.eup %3478  ;;  %1891 = vmatpush1.bf16.msra.mxu0 (!%p2743_p12), %v2746_v31  ;;  %3052 = vmatpush3.bf16.msra.mxu1 (!%p2743_p12), %v4025_v60 }
0x2ae8   :  { %v1827_v37 = vadd.f32 1.0, %v3479_v63  ;;  %3053 = vmatprep.subr.bf16.mxu1 (!%p2743_p12), %v3744_v42 }
0x2aea   :  { %3480 = vrcp.f32 %v1827_v37 }
0x2aeb   :  { %3054 = vmatpush3.bf16.msra.mxu1 (!%p2743_p12), %v4031_v12 }
0x2aec   :  { %3055 = vmatprep.subr.bf16.mxu1 (!%p2743_p12), %v3744_v42 }
0x2aef   :  { %3056 = vmatpush3.bf16.msra.mxu1 (!%p2743_p12), %v4029_v2 }
0x2af4   :  { %v3481_v46 = vpop.eup %3480 }
0x2af5   :  { %v1831_v61 = vmul.f32 %v3481_v46, %v4220_v58 }
0x2b58   :  { %v1834_v0 = vpop.permute.xlu0 %1833 }
0x2b59   :  { %v1836_v1 = vmul.f32 %v3481_v46, %v1834_v0 }
0x2b5b   :  { %1838 = vrot.lane.b32.xlu0 %v1836_v1, %s3719_s6 }
0x2bcd   :  { %v1839_v3 = vpop.permute.xlu0 %1838 }
0x2bce   :  { %v4272_v13 = vadd.f32 %v1839_v3, %v1831_v61 }
0x2bd0   :  { %3482 = vtanh.f32 %v4272_v13 }
0x2bda   :  { %v3483_v14 = vpop.eup %3482 }
0x2bdb   :  { %1844 = vrot.lane.b32.xlu1 %v3483_v14, %s3719_s6 }
0x2c4d   :  { %v1845_v20 = vpop.permute.xlu1 %1844 }
0x2c4e   :  { %v1847_v21 = vmul.f32 %v3481_v46, %v1845_v20 }
0x2c50   :  { %v4281_v22 = vpack.c.bf16 %v1847_v21, %v1847_v21  ;;  %1849 = vrot.lane.b32.xlu1 %v1847_v21, %s3720_s0 }
0x2c52   :  { %1863 = vrot.lane.b32.xlu0 (!%p2743_p12), %v4281_v22, %s3742_s27 }
0x2cbd   :  { %1861 = sbr.rel (%p2743_p12) target bundleno = 12333 (0x302d), region = 77 }
0x2cc2   :  { %v1850_v58 = vpop.permute.xlu1 %1849 }
0x2cc3   :  { %1853 = vst.msk [vmem:[#allocation4 + $0x20] sm:$0xff] %vm103_vm0, %v1850_v58 }
0x2cc4   :  { %v1864_v33 = vpop.permute.xlu0 %1863 }
0x2cc5   :  { %2748 = vmatmul.mubr.msk.bf16.vlgmr.msra.gmra.mrb[0].mxu0 %vm103_vm0, %v1864_v33 }
0x2d98   :  { %v1922_v25 = vpop.f32.mrb[0].mxu0  }
0x2d99   :  { %v1924_v40 = vpop.f32.mrb[1].mxu0 }
0x2d9a   :  { %v1929_v34 = vadd.f32 %v1924_v40, %v3887_v18  ;;  %v1926_v53 = vpop.f32.mrb[2].mxu0 }
0x2d9b   :  { %v1927_v35 = vpop.f32.mrb[3].mxu0 }
0x2d9c   :  { %1930 = vmax.xlane.f32.xlu0 %v1929_v34 }
0x2e29   :  { %v1931_v54 = vpop.xlane.xlu0 %1930 }
0x2e2a   :  { %vm1932_vm6 = vcmp.eq.f32.partialorder %v1929_v34, %v1931_v54 }
0x2e2b   :  { %v1933_v38 = vsel %vm1932_vm6, %v3835_v4, 128 }
0x2e2c   :  { %v1935_v39 = vshra.s32 %v1933_v38, 16  ;;  %v1934_v36 = vand.u32 65535, %v1933_v38 }
0x2e2e   :  { %v1937_v41 = vcvt.s32.f32 %v1935_v39  ;;  %v1936_v44 = vcvt.s32.f32 %v1934_v36 }
0x2e30   :  { %1938 = vmin.xlane.f32.xlu1 %v1937_v41 }
0x2ebd   :  { %v1939_v45 = vpop.xlane.xlu1 %1938 }
0x2ebe   :  { %vm1940_vm7 = vcmp.eq.f32.partialorder %v1937_v41, %v1939_v45  ;;  %v1945_v49 = vcvt.f32.s32 %v1939_v45 }
0x2ebf   :  { %v1941_v48 = vsel %vm1940_vm7, %v1936_v44, inf }
0x2ec0   :  { %1942 = vmin.xlane.f32.xlu1 %v1941_v48  ;;  %v1946_v32 = vshll.u32 %v1945_v49, 16 }
0x2f4d   :  { %v1943_v50 = vpop.xlane.xlu1 %1942 }
0x2f4e   :  { %v1944_v51 = vcvt.f32.s32 %v1943_v50 }
0x2f50   :  { %v1947_v52 = vadd.s32 %v1946_v32, %v1944_v51 }
0x2f52   :  { %vm1948_vm9 = vcmp.eq.s32.totalorder %v3835_v4, %v1947_v52 }
0x2f53   :  { %v2749_v57 = vsel %vm1948_vm9, 1.0, %v3744_v42 }
0x2f54   :  { %v1951_v47 = vpack.c.bf16 %v2749_v57, %v2749_v57 }
0x2f56   :  { %3058 = vmatmul.mubr.msk.bf16.vlgmr.msra.gmra.mrb[0].mxu1 %vm1952_vm10, %v1951_v47 }
0x3029   :  { %v1990_v19 = vpop.f32.mrb[0].mxu1 }
0x302a   :  { %v1991_v23 = vadd.f32 %v3938_v28, %v1990_v19   ;;  %v3059_v59 = vpop.f32.mrb[1].mxu1 }
0x302b   :  { %v1993_v43 = vpop.f32.mrb[2].mxu1 }
0x302c   :  { %v3060_v55 = vpop.f32.mrb[3].mxu1 }
0x302d PF:  { %v3674_v63 = vmov %v3668_v23   ;;  %v3678_v37 = vmov %v3672_v25   ;;  %2000 = sbr.rel (%p1858_p11) target bundleno = 12664 (0x3178), region = 81  ;;  %s3746_s28 = smov (!%p1858_p11), 64   ;;  %v3747_v46 = vmov (!%p1858_p11), 0.0   ;;  %vm3748_vm11 = vmmov (!%p1858_p11), 0   ;;  %v3672_v25 = vphi %v4288_v25, %v1922_v25   ;;  %v3668_v23 = vphi %v4286_v23, %v1991_v23  }
0x302e   :  { %2002 = vrot.lane.b32.xlu0 (!%p1858_p11), %v4281_v22, %s3746_s28  ;;  %3061 = vmatprep.subr.bf16.mxu0 (!%p1858_p11), %v3747_v46  ;;  %v3675_v63 = vmov (!%p1858_p11), %v4278_v17  }
0x302f   :  { %3062 = vmatpush3.bf16.msra.mxu0 (!%p1858_p11), %v4102_v24  ;;  %3065 = vmatprep.mubr.msk.bf16.mxu0 (!%p1858_p11), %vm3748_vm11, %v3747_v46 }
0x3030   :  { %3063 = vmatprep.subr.bf16.mxu0 (!%p1858_p11), %v3747_v46 }
0x3033   :  { %3064 = vmatpush3.bf16.msra.mxu0 (!%p1858_p11), %v4108_v56 }
0x30a0   :  { %v2003_v0 = vpop.permute.xlu0 %2002 }
0x30a1   :  { %3066 = vmatmul.mubr.msk.bf16.vlgmr.msra.gmra.mrb[0].mxu0 %vm103_vm0, %v2003_v0 }
0x3174   :  { %v2041_v37 = vpop.f32.mrb[0].mxu0  }
0x3175   :  { %v3067_v1 = vpop.f32.mrb[1].mxu0 }
0x3176   :  { %v2044_v61 = vpop.f32.mrb[2].mxu0 }
0x3177   :  { %v3068_v3 = vpop.f32.mrb[3].mxu0 }
0x3178 PF:  { %v2049_v14 = vadd.f32 %v3676_v63, %v3680_v37  ;;  %s4328_s29 = sld [smem:[#allocation5 + $0x5]]  ;;  %v4330_v31 = vld [vmem:[#allocation3 + $0x28] sm:$0xff]   ;;  %v4338_v53 = vmov 0   ;;  %v4340_v35 = vmov 0   ;;  %v3680_v37 = vphi %v3678_v37, %v2041_v37   ;;  %v3676_v63 = vphi %v3674_v63, %v3675_v63  }
0x317a   :  { %3484 = vtanh.f32 %v2049_v14  ;;  %v2752_v21 = vmul.f32 -1.442695, %v2049_v14 }
0x317c   :  { %3486 = vpow2.f32 %v2752_v21 }
0x317e   :  { %p2084_p13 = scmp.eq.s32.totalorder %s4328_s29, 0  ;;  %p2754_p0 = scmp.ne.s32.totalorder %s4328_s29, 0 }
0x317f   :  { %v2756_v54 = vcombine.high (!%p2754_p0), %v3843_v6, %v3848_v7  ;;  %v2755_v38 = vcombine.low (!%p2754_p0), %v3843_v6, %v3848_v7  ;;  %v2758_v39 = vcombine.high (!%p2754_p0), %v3853_v8, %v3859_v9  ;;  %s3749_s30 = smov (!%p2754_p0), 64   ;;  %v3750_v41 = vmov (!%p2754_p0), 0  }
0x3180   :  { %2146 = vmatprep.mubr.bf16.mxu0 (!%p2754_p0), %v3750_v41  ;;  %v2757_v42 = vcombine.low (!%p2754_p0), %v3853_v8, %v3859_v9  ;;  %v3751_v57 = vmov (!%p2754_p0), 0.0   ;;  %vm3752_vm14 = vmmov (!%p2754_p0), 0   ;;  %vm2178_vm1 = vcmask (!%p2754_p0), 523264  }
0x3181   :  { %2114 = vmatprep.subr.bf16.mxu0 (!%p2754_p0), %v2756_v54  ;;  %3069 = vmatprep.subr.bf16.mxu1 (!%p2754_p0), %v3751_v57 }
0x3182   :  { %2115 = vmatpush1.bf16.msra.mxu0 (!%p2754_p0), %v2755_v38  ;;  %3070 = vmatpush3.bf16.msra.mxu1 (!%p2754_p0), %v4027_v62 }
0x3183   :  { %2116 = vmatprep.subr.bf16.mxu0 (!%p2754_p0), %v2758_v39  ;;  %3071 = vmatprep.subr.bf16.mxu1 (!%p2754_p0), %v3751_v57 }
0x3184   :  { %v3485_v20 = vpop.eup %3484  ;;  %3077 = vmatprep.mubr.msk.bf16.mxu1 (!%p2754_p0), %vm3752_vm14, %v3751_v57 }
0x3185   :  { %2059 = vrot.lane.b32.xlu0 %v3485_v20, %s3719_s6 }
0x3186   :  { %v3487_v22 = vpop.eup %3486  ;;  %2117 = vmatpush1.bf16.msra.mxu0 (!%p2754_p0), %v2757_v42  ;;  %3072 = vmatpush3.bf16.msra.mxu1 (!%p2754_p0), %v4025_v60 }
0x3187   :  { %v2053_v58 = vadd.f32 1.0, %v3487_v22  ;;  %3073 = vmatprep.subr.bf16.mxu1 (!%p2754_p0), %v3751_v57 }
0x3189   :  { %3488 = vrcp.f32 %v2053_v58 }
0x318a   :  { %3074 = vmatpush3.bf16.msra.mxu1 (!%p2754_p0), %v4031_v12 }
0x318b   :  { %3075 = vmatprep.subr.bf16.mxu1 (!%p2754_p0), %v3751_v57 }
0x318e   :  { %3076 = vmatpush3.bf16.msra.mxu1 (!%p2754_p0), %v4029_v2 }
0x3193   :  { %v3489_v23 = vpop.eup %3488 }
0x3194   :  { %v2057_v17 = vmul.f32 %v3489_v23, %v4272_v13 }
0x31f7   :  { %v2060_v25 = vpop.permute.xlu0 %2059 }
0x31f8   :  { %v2062_v26 = vmul.f32 %v3489_v23, %v2060_v25 }
0x31fa   :  { %2064 = vrot.lane.b32.xlu0 %v2062_v26, %s3719_s6 }
0x326c   :  { %v2065_v27 = vpop.permute.xlu0 %2064 }
0x326d   :  { %v4324_v29 = vadd.f32 %v2065_v27, %v2057_v17 }
0x326f   :  { %3490 = vtanh.f32 %v4324_v29 }
0x3279   :  { %v3491_v30 = vpop.eup %3490 }
0x327a   :  { %2070 = vrot.lane.b32.xlu1 %v3491_v30, %s3719_s6 }
0x32ec   :  { %v2071_v33 = vpop.permute.xlu1 %2070 }
0x32ed   :  { %v2073_v40 = vmul.f32 %v3489_v23, %v2071_v33 }
0x32ef   :  { %v4333_v34 = vpack.c.bf16 %v2073_v40, %v2073_v40  ;;  %2075 = vrot.lane.b32.xlu1 %v2073_v40, %s3720_s0 }
0x32f1   :  { %2089 = vrot.lane.b32.xlu0 (!%p2754_p0), %v4333_v34, %s3749_s30 }
0x335c   :  { %2087 = sbr.rel (%p2754_p0) target bundleno = 14028 (0x36cc), region = 85 }
0x3361   :  { %v2076_v13 = vpop.permute.xlu1 %2075 }
0x3362   :  { %2079 = vst.msk [vmem:[#allocation4 + $0x28] sm:$0xff] %vm103_vm0, %v2076_v13 }
0x3363   :  { %v2090_v36 = vpop.permute.xlu0 %2089 }
0x3364   :  { %2759 = vmatmul.mubr.msk.bf16.vlgmr.msra.gmra.mrb[0].mxu0 %vm103_vm0, %v2090_v36 }
0x3437   :  { %v2148_v35 = vpop.f32.mrb[0].mxu0  }
0x3438   :  { %v2150_v44 = vpop.f32.mrb[1].mxu0 }
0x3439   :  { %v2155_v45 = vadd.f32 %v2150_v44, %v3887_v18  ;;  %v2152_v48 = vpop.f32.mrb[2].mxu0 }
0x343a   :  { %v2153_v49 = vpop.f32.mrb[3].mxu0 }
0x343b   :  { %2156 = vmax.xlane.f32.xlu0 %v2155_v45 }
0x34c8   :  { %v2157_v50 = vpop.xlane.xlu0 %2156 }
0x34c9   :  { %vm2158_vm12 = vcmp.eq.f32.partialorder %v2155_v45, %v2157_v50 }
0x34ca   :  { %v2159_v32 = vsel %vm2158_vm12, %v3835_v4, 128 }
0x34cb   :  { %v2161_v51 = vshra.s32 %v2159_v32, 16  ;;  %v2160_v47 = vand.u32 65535, %v2159_v32 }
0x34cd   :  { %v2163_v52 = vcvt.s32.f32 %v2161_v51  ;;  %v2162_v19 = vcvt.s32.f32 %v2160_v47 }
0x34cf   :  { %2164 = vmin.xlane.f32.xlu1 %v2163_v52 }
0x355c   :  { %v2165_v59 = vpop.xlane.xlu1 %2164 }
0x355d   :  { %vm2166_vm13 = vcmp.eq.f32.partialorder %v2163_v52, %v2165_v59  ;;  %v2171_v55 = vcvt.f32.s32 %v2165_v59 }
0x355e   :  { %v2167_v43 = vsel %vm2166_vm13, %v2162_v19, inf }
0x355f   :  { %2168 = vmin.xlane.f32.xlu1 %v2167_v43  ;;  %v2172_v37 = vshll.u32 %v2171_v55, 16 }
0x35ec   :  { %v2169_v63 = vpop.xlane.xlu1 %2168 }
0x35ed   :  { %v2170_v46 = vcvt.f32.s32 %v2169_v63 }
0x35ef   :  { %v2173_v0 = vadd.s32 %v2172_v37, %v2170_v46 }
0x35f1   :  { %vm2174_vm15 = vcmp.eq.s32.totalorder %v3835_v4, %v2173_v0 }
0x35f2   :  { %v2760_v1 = vsel %vm2174_vm15, 1.0, %v3751_v57 }
0x35f3   :  { %v2177_v61 = vpack.c.bf16 %v2760_v1, %v2760_v1 }
0x35f5   :  { %3078 = vmatmul.mubr.msk.bf16.vlgmr.msra.gmra.mrb[0].mxu1 %vm2178_vm1, %v2177_v61 }
0x36c8   :  { %v2216_v3 = vpop.f32.mrb[0].mxu1 }
0x36c9   :  { %v2217_v53 = vadd.f32 %v3938_v28, %v2216_v3   ;;  %v3079_v14 = vpop.f32.mrb[1].mxu1 }
0x36ca   :  { %v2219_v20 = vpop.f32.mrb[2].mxu1 }
0x36cb   :  { %v3080_v21 = vpop.f32.mrb[3].mxu1 }
0x36cc PF:  { %v3690_v22 = vmov %v3684_v53   ;;  %v3694_v58 = vmov %v3688_v35   ;;  %2226 = sbr.rel (%p2084_p13) target bundleno = 14359 (0x3817), region = 89  ;;  %s3753_s12 = smov (!%p2084_p13), 64   ;;  %v3754_v23 = vmov (!%p2084_p13), 0.0   ;;  %vm3755_vm2 = vmmov (!%p2084_p13), 0   ;;  %v3688_v35 = vphi %v4340_v35, %v2148_v35   ;;  %v3684_v53 = vphi %v4338_v53, %v2217_v53  }
0x36cd   :  { %2228 = vrot.lane.b32.xlu0 (!%p2084_p13), %v4333_v34, %s3753_s12  ;;  %3081 = vmatprep.subr.bf16.mxu0 (!%p2084_p13), %v3754_v23  ;;  %v3691_v22 = vmov (!%p2084_p13), %v4330_v31  }
0x36ce   :  { %3082 = vmatpush3.bf16.msra.mxu0 (!%p2084_p13), %v4102_v24  ;;  %3085 = vmatprep.mubr.msk.bf16.mxu0 (!%p2084_p13), %vm3755_vm2, %v3754_v23 }
0x36cf   :  { %3083 = vmatprep.subr.bf16.mxu0 (!%p2084_p13), %v3754_v23 }
0x36d2   :  { %3084 = vmatpush3.bf16.msra.mxu0 (!%p2084_p13), %v4108_v56 }
0x373f   :  { %v2229_v25 = vpop.permute.xlu0 %2228 }
0x3740   :  { %3086 = vmatmul.mubr.msk.bf16.vlgmr.msra.gmra.mrb[0].mxu0 %vm103_vm0, %v2229_v25 }
0x3813   :  { %v2267_v58 = vpop.f32.mrb[0].mxu0  }
0x3814   :  { %v3087_v26 = vpop.f32.mrb[1].mxu0 }
0x3815   :  { %v2270_v17 = vpop.f32.mrb[2].mxu0 }
0x3816   :  { %v3088_v27 = vpop.f32.mrb[3].mxu0 }
0x3817 PF:  { %v2275_v30 = vadd.f32 %v3692_v22, %v3696_v58  ;;  %s4380_s13 = sld [smem:[#allocation5 + $0x6]]  ;;  %v4382_v42 = vld [vmem:[#allocation3 + $0x30] sm:$0xff]   ;;  %v4390_v48 = vmov 0   ;;  %v4392_v49 = vmov 0   ;;  %v3696_v58 = vphi %v3694_v58, %v2267_v58   ;;  %v3692_v22 = vphi %v3690_v22, %v3691_v22  }
0x3819   :  { %3492 = vtanh.f32 %v2275_v30  ;;  %v2763_v40 = vmul.f32 -1.442695, %v2275_v30 }
0x381b   :  { %3494 = vpow2.f32 %v2763_v40 }
0x381d   :  { %p2310_p1 = scmp.eq.s32.totalorder %s4380_s13, 0  ;;  %p2765_p2 = scmp.ne.s32.totalorder %s4380_s13, 0 }
0x381e   :  { %v2767_v50 = vcombine.high (!%p2765_p2), %v3843_v6, %v3848_v7  ;;  %v2766_v32 = vcombine.low (!%p2765_p2), %v3843_v6, %v3848_v7  ;;  %v2769_v51 = vcombine.high (!%p2765_p2), %v3853_v8, %v3859_v9  ;;  %s3756_s14 = smov (!%p2765_p2), 64   ;;  %v3757_v52 = vmov (!%p2765_p2), 0  }
0x381f   :  { %2372 = vmatprep.mubr.bf16.mxu0 (!%p2765_p2), %v3757_v52  ;;  %v2768_v57 = vcombine.low (!%p2765_p2), %v3853_v8, %v3859_v9  ;;  %v3758_v8 = vmov (!%p2765_p2), 0.0   ;;  %vm3759_vm5 = vmmov (!%p2765_p2), 0   ;;  %vm2404_vm7 = vcmask (!%p2765_p2), 523264  }
0x3820   :  { %2340 = vmatprep.subr.bf16.mxu0 (!%p2765_p2), %v2767_v50  ;;  %3089 = vmatprep.subr.bf16.mxu1 (!%p2765_p2), %v3758_v8 }
0x3821   :  { %2341 = vmatpush1.bf16.msra.mxu0 (!%p2765_p2), %v2766_v32  ;;  %3090 = vmatpush3.bf16.msra.mxu1 (!%p2765_p2), %v4027_v62 }
0x3822   :  { %2342 = vmatprep.subr.bf16.mxu0 (!%p2765_p2), %v2769_v51  ;;  %3091 = vmatprep.subr.bf16.mxu1 (!%p2765_p2), %v3758_v8 }
0x3823   :  { %v3493_v33 = vpop.eup %3492  ;;  %3097 = vmatprep.mubr.msk.bf16.mxu1 (!%p2765_p2), %vm3759_vm5, %v3758_v8 }
0x3824   :  { %2285 = vrot.lane.b32.xlu0 %v3493_v33, %s3719_s6 }
0x3825   :  { %v3495_v34 = vpop.eup %3494  ;;  %2343 = vmatpush1.bf16.msra.mxu0 (!%p2765_p2), %v2768_v57  ;;  %3092 = vmatpush3.bf16.msra.mxu1 (!%p2765_p2), %v4025_v60 }
0x3826   :  { %v2279_v13 = vadd.f32 1.0, %v3495_v34  ;;  %3093 = vmatprep.subr.bf16.mxu1 (!%p2765_p2), %v3758_v8 }
0x3828   :  { %3496 = vrcp.f32 %v2279_v13 }
0x3829   :  { %3094 = vmatpush3.bf16.msra.mxu1 (!%p2765_p2), %v4031_v12 }
0x382a   :  { %3095 = vmatprep.subr.bf16.mxu1 (!%p2765_p2), %v3758_v8 }
0x382d   :  { %3096 = vmatpush3.bf16.msra.mxu1 (!%p2765_p2), %v4029_v2 }
0x3832   :  { %v3497_v53 = vpop.eup %3496 }
0x3833   :  { %v2283_v31 = vmul.f32 %v3497_v53, %v4324_v29 }
0x3896   :  { %v2286_v35 = vpop.permute.xlu0 %2285 }
0x3897   :  { %v2288_v54 = vmul.f32 %v3497_v53, %v2286_v35 }
0x3899   :  { %2290 = vrot.lane.b32.xlu0 %v2288_v54, %s3719_s6 }
0x390b   :  { %v2291_v38 = vpop.permute.xlu0 %2290 }
0x390c   :  { %v4376_v39 = vadd.f32 %v2291_v38, %v2283_v31 }
0x390e   :  { %3498 = vtanh.f32 %v4376_v39 }
0x3918   :  { %v3499_v41 = vpop.eup %3498 }
0x3919   :  { %2296 = vrot.lane.b32.xlu1 %v3499_v41, %s3719_s6 }
0x398b   :  { %v2297_v36 = vpop.permute.xlu1 %2296 }
0x398c   :  { %v2299_v44 = vmul.f32 %v3497_v53, %v2297_v36 }
0x398e   :  { %v4385_v45 = vpack.c.bf16 %v2299_v44, %v2299_v44  ;;  %2301 = vrot.lane.b32.xlu1 %v2299_v44, %s3720_s0 }
0x3990   :  { %2315 = vrot.lane.b32.xlu0 (!%p2765_p2), %v4385_v45, %s3756_s14 }
0x39fb   :  { %2313 = sbr.rel (%p2765_p2) target bundleno = 15723 (0x3d6b), region = 93 }
0x3a00   :  { %v2302_v29 = vpop.permute.xlu1 %2301 }
0x3a01   :  { %2305 = vst.msk [vmem:[#allocation4 + $0x30] sm:$0xff] %vm103_vm0, %v2302_v29 }
0x3a02   :  { %v2316_v47 = vpop.permute.xlu0 %2315 }
0x3a03   :  { %2770 = vmatmul.mubr.msk.bf16.vlgmr.msra.gmra.mrb[0].mxu0 %vm103_vm0, %v2316_v47 }
0x3ad6   :  { %v2374_v49 = vpop.f32.mrb[0].mxu0  }
0x3ad7   :  { %v2376_v6 = vpop.f32.mrb[1].mxu0 }
0x3ad8   :  { %v2381_v7 = vadd.f32 %v2376_v6, %v3887_v18  ;;  %v2378_v19 = vpop.f32.mrb[2].mxu0 }
0x3ad9   :  { %v2379_v59 = vpop.f32.mrb[3].mxu0 }
0x3ada   :  { %2382 = vmax.xlane.f32.xlu0 %v2381_v7 }
0x3b67   :  { %v2383_v43 = vpop.xlane.xlu0 %2382 }
0x3b68   :  { %vm2384_vm3 = vcmp.eq.f32.partialorder %v2381_v7, %v2383_v43 }
0x3b69   :  { %v2385_v55 = vsel %vm2384_vm3, %v3835_v4, 128 }
0x3b6a   :  { %v2387_v63 = vshra.s32 %v2385_v55, 16  ;;  %v2386_v9 = vand.u32 65535, %v2385_v55 }
0x3b6c   :  { %v2389_v37 = vcvt.s32.f32 %v2387_v63  ;;  %v2388_v18 = vcvt.s32.f32 %v2386_v9 }
0x3b6e   :  { %2390 = vmin.xlane.f32.xlu1 %v2389_v37 }
0x3bfb   :  { %v2391_v46 = vpop.xlane.xlu1 %2390 }
0x3bfc   :  { %vm2392_vm4 = vcmp.eq.f32.partialorder %v2389_v37, %v2391_v46  ;;  %v2397_v1 = vcvt.f32.s32 %v2391_v46 }
0x3bfd   :  { %v2393_v0 = vsel %vm2392_vm4, %v2388_v18, inf }
0x3bfe   :  { %2394 = vmin.xlane.f32.xlu1 %v2393_v0  ;;  %v2398_v62 = vshll.u32 %v2397_v1, 16 }
0x3c8b   :  { %v2395_v61 = vpop.xlane.xlu1 %2394 }
0x3c8c   :  { %v2396_v3 = vcvt.f32.s32 %v2395_v61 }
0x3c8e   :  { %v2399_v14 = vadd.s32 %v2398_v62, %v2396_v3 }
0x3c90   :  { %vm2400_vm6 = vcmp.eq.s32.totalorder %v3835_v4, %v2399_v14 }
0x3c91   :  { %v2771_v60 = vsel %vm2400_vm6, 1.0, %v3758_v8 }
0x3c92   :  { %v2403_v12 = vpack.c.bf16 %v2771_v60, %v2771_v60 }
0x3c94   :  { %3098 = vmatmul.mubr.msk.bf16.vlgmr.msra.gmra.mrb[0].mxu1 %vm2404_vm7, %v2403_v12 }
0x3d67   :  { %v2442_v2 = vpop.f32.mrb[0].mxu1 }
0x3d68   :  { %v2443_v48 = vadd.f32 %v3938_v28, %v2442_v2   ;;  %v3099_v20 = vpop.f32.mrb[1].mxu1 }
0x3d69   :  { %v2445_v21 = vpop.f32.mrb[2].mxu1 }
0x3d6a   :  { %v3100_v22 = vpop.f32.mrb[3].mxu1 }
0x3d6b PF:  { %v3706_v4 = vmov %v3700_v48   ;;  %v3710_v58 = vmov %v3704_v49   ;;  %2452 = sbr.rel (%p2310_p1) target bundleno = 16054 (0x3eb6), region = 97  ;;  %s3760_s1 = smov (!%p2310_p1), 64   ;;  %v3761_v28 = vmov (!%p2310_p1), 0.0   ;;  %vm3762_vm8 = vmmov (!%p2310_p1), 0   ;;  %v3704_v49 = vphi %v4392_v49, %v2374_v49   ;;  %v3700_v48 = vphi %v4390_v48, %v2443_v48  }
0x3d6c   :  { %2454 = vrot.lane.b32.xlu0 (!%p2310_p1), %v4385_v45, %s3760_s1  ;;  %3101 = vmatprep.subr.bf16.mxu0 (!%p2310_p1), %v3761_v28  ;;  %v3707_v4 = vmov (!%p2310_p1), %v4382_v42  }
0x3d6d   :  { %3102 = vmatpush3.bf16.msra.mxu0 (!%p2310_p1), %v4102_v24  ;;  %3105 = vmatprep.mubr.msk.bf16.mxu0 (!%p2310_p1), %vm3762_vm8, %v3761_v28 }
0x3d6e   :  { %3103 = vmatprep.subr.bf16.mxu0 (!%p2310_p1), %v3761_v28 }
0x3d71   :  { %3104 = vmatpush3.bf16.msra.mxu0 (!%p2310_p1), %v4108_v56 }
0x3dde   :  { %v2455_v23 = vpop.permute.xlu0 %2454 }
0x3ddf   :  { %3106 = vmatmul.mubr.msk.bf16.vlgmr.msra.gmra.mrb[0].mxu0 %vm103_vm0, %v2455_v23 }
0x3eb2   :  { %v2493_v58 = vpop.f32.mrb[0].mxu0  }
0x3eb3   :  { %v3107_v25 = vpop.f32.mrb[1].mxu0 }
0x3eb4   :  { %v2496_v26 = vpop.f32.mrb[2].mxu0 }
0x3eb5   :  { %v3108_v17 = vpop.f32.mrb[3].mxu0 }
0x3eb6 PF:  { %v2501_v24 = vadd.f32 %v3708_v4, %v3712_v58  ;;  %2648 = vst [vmem:[%s4478_s11] sm:$0xff] %v3715_v5  ;;  %v2776_v5 = vcombine.low %v3864_v10, %v3869_v11  ;;  %v2777_v38 = vcombine.low %v3877_v15, %v3882_v16  ;;  %v2532_v41 = vld [vmem:[#allocation4] sm:$0xff]  ;;  %v2533_v42 = vld [vmem:[#allocation4 + $0x8] sm:$0xff]  ;;  %v2534_v36 = vld [vmem:[#allocation4 + $0x10] sm:$0xff]  ;;  %v3712_v58 = vphi %v3710_v58, %v2493_v58   ;;  %v3708_v4 = vphi %v3706_v4, %v3707_v4  }
0x3eb7   :  { %v2535_v44 = vld [vmem:[#allocation4 + $0x18] sm:$0xff]  ;;  %v2536_v45 = vld [vmem:[#allocation4 + $0x20] sm:$0xff]  ;;  %v2537_v29 = vld [vmem:[#allocation4 + $0x28] sm:$0xff] }
0x3eb8   :  { %3500 = vtanh.f32 %v2501_v24  ;;  %v2774_v27 = vmul.f32 -1.442695, %v2501_v24  ;;  %3109 = vmatprep.subr.bf16.mxu0 %v2776_v5  ;;  %3121 = vmatprep.subr.bf16.mxu1 %v2776_v5  ;;  %v2541_v10 = vpack.c.bf16 %v2535_v44, %v2534_v36  ;;  %v2542_v11 = vpack.c.bf16 %v2537_v29, %v2536_v45  ;;  %v2538_v49 = vld [vmem:[#allocation4 + $0x30] sm:$0xff]  ;;  %v2775_v51 = vld [vmem:[%s4477_s10] ss:$0 sm:$0xff] }
0x3eb9   :  { %3110 = vmatpush3.bf16.msra.mxu0 %v2776_v5  ;;  %3123 = vmatpush3.bf16.msra.mxu1 %v2776_v5 }
0x3eba   :  { %3502 = vpow2.f32 %v2774_v27  ;;  %3111 = vmatprep.subr.bf16.mxu0 %v2777_v38  ;;  %3122 = vmatprep.subr.bf16.mxu1 %v2777_v38 }
0x3ebb   :  { %3117 = vmatprep.mubr.msk.bf16.mxu1 %vm103_vm0, %v2542_v11 }
0x3ebd   :  { %3112 = vmatpush3.bf16.msra.mxu0 %v2777_v38  ;;  %3124 = vmatpush3.bf16.msra.mxu1 %v2777_v38 }
0x3ec2   :  { %v3501_v56 = vpop.eup %3500 }
0x3ec3   :  { %2511 = vrot.lane.b32.xlu0 %v3501_v56, %s3719_s6 }
0x3ec4   :  { %v3503_v30 = vpop.eup %3502 }
0x3ec5   :  { %v2505_v33 = vadd.f32 1.0, %v3503_v30 }
0x3ec7   :  { %3504 = vrcp.f32 %v2505_v33 }
0x3ed1   :  { %v3505_v40 = vpop.eup %3504 }
0x3ed2   :  { %v2509_v53 = vmul.f32 %v3505_v40, %v4376_v39  ;;  %v2540_v39 = vpack.c.bf16 %v2533_v42, %v2532_v41 }
0x3ed4   :  { %3113 = vmatprep.mubr.msk.bf16.mxu0 %vm103_vm0, %v2540_v39 }
0x3ed5   :  { %3114 = vmatmul.mubr.msk.bf16.vlgmr.msra.gmra.mrb[0].mxu0 %vm103_vm0, %v2541_v10 }
0x3f35   :  { %v2512_v34 = vpop.permute.xlu0 %2511 }
0x3f36   :  { %v2514_v13 = vmul.f32 %v3505_v40, %v2512_v34 }
0x3f38   :  { %2516 = vrot.lane.b32.xlu0 %v2514_v13, %s3719_s6 }
0x3fa8   :  { %v3115_v52 = vpop.f32.mrb[0].mxu0 }
0x3fa9   :  { %v2618_v57 = vadd.f32 %v3115_v52, %v2775_v51  ;;  %v2609_v47 = vpop.f32.mrb[1].mxu0 }
0x3faa   :  { %v2517_v35 = vpop.permute.xlu0 %2516  ;;  %v3116_v6 = vpop.f32.mrb[2].mxu0 }
0x3fab   :  { %v2519_v54 = vadd.f32 %v2517_v35, %v2509_v53  ;;  %2642 = vst [vmem:[%s4478_s11 + $0x10] sm:$0xff] %v2618_v57  ;;  %v2621_v7 = vadd.f32 %v3116_v6, %v2775_v51  ;;  %v2612_v19 = vpop.f32.mrb[3].mxu0 }
0x3fac   :  { %v2613_v59 = vadd.f32 %v2775_v51, %v2612_v19 }
0x3fad   :  { %3506 = vtanh.f32 %v2519_v54  ;;  %2643 = vst [vmem:[%s4478_s11 + $0x18] sm:$0xff] %v2621_v7 }
0x3fae   :  { %2641 = vst [vmem:[%s4478_s11 + $0x8] sm:$0xff] %v2613_v59 }
0x3fb7   :  { %v3507_v31 = vpop.eup %3506 }
0x3fb8   :  { %2522 = vrot.lane.b32.xlu1 %v3507_v31, %s3719_s6 }
0x402a   :  { %v2523_v15 = vpop.permute.xlu1 %2522 }
0x402b   :  { %v2525_v16 = vmul.f32 %v3505_v40, %v2523_v15 }
0x402d   :  { %2527 = vrot.lane.b32.xlu1 %v2525_v16, %s3720_s0 }
0x409f   :  { %v2528_v48 = vpop.permute.xlu1 %2527 }
0x40a0   :  { %2531 = vst.msk [vmem:[#allocation4 + $0x38] sm:$0xff] %vm103_vm0, %v2528_v48 }
0x40a7   :  { %v2539_v50 = vld [vmem:[#allocation4 + $0x38] sm:$0xff] }
0x40a8   :  { %v2543_v32 = vpack.c.bf16 %v2539_v50, %v2538_v49 }
0x40aa   :  { %3118 = vmatmul.mubr.msk.bf16.vlgmr.msra.gmra.mrb[0].mxu1 %vm103_vm0, %v2543_v32 }
0x417d   :  { %v3119_v43 = vpop.f32.mrb[0].mxu1 }
0x417e   :  { %v2634_v55 = vadd.f32 %v3119_v43, %v2775_v51  ;;  %v2625_v63 = vpop.f32.mrb[1].mxu1 }
0x417f   :  { %v2626_v37 = vadd.f32 %v2775_v51, %v2625_v63  ;;  %v3120_v8 = vpop.f32.mrb[2].mxu1 }
0x4180   :  { %2646 = vst [vmem:[%s4478_s11 + $0x30] sm:$0xff] %v2634_v55  ;;  %v2637_v9 = vadd.f32 %v3120_v8, %v2775_v51  ;;  %v2628_v18 = vpop.f32.mrb[3].mxu1 }
0x4181   :  { %2644 = vst [vmem:[%s4478_s11 + $0x20] sm:$0xff] %v2626_v37  ;;  %v2629_v46 = vadd.f32 %v2775_v51, %v2628_v18 }
0x4182   :  { %2647 = vst [vmem:[%s4478_s11 + $0x38] sm:$0xff] %v2637_v9 }
0x4183   :  { %2645 = vst [vmem:[%s4478_s11 + $0x28] sm:$0xff] %v2629_v46 }
0x4184   :  { %2653 = vsyncpa [#allocation6], 1 }

</bundles_post_ra>
